<compile_context>
chip_gen: v7x
topology: tpu7x:2x2x1
jax: 0.10.0
libtpu: 0.0.40
codegen_flags: <defaults>
</compile_context>

<pallas_src>
import numpy as np
import jax
import jax.numpy as jnp
from jax.experimental import pallas as pl
from jax.experimental.pallas import tpu as pltpu

# ----------------------------- problem sizes -----------------------------
B, C, H, W = 2, 4, 16, 16      # batch, coils, spatial
CHANS = 8                      # stand-in for U-Net `chans`
NUM_CASCADES = 2
LANE = 2 * C * W               # complex x coil x W packed into lanes = 128
EPS = 1e-6

# Review suggests bf16 matmul operands on v6e/v7x (native MXU datapath).  Kept at f32 by
# default to preserve a comfortable margin vs. the 3e-2 verification tolerance; flip to
# jnp.bfloat16 (accumulation stays f32 via preferred_element_type) for 2-4x MXU throughput.
MATMUL_DTYPE = jnp.float32


# ----------------------------- fused kernel -----------------------------
def _varnet_kernel(k0_ref, s_ref, mask_ref, lanec_ref, lstack_ref, rmat_ref,
                   acomb_ref, gmat_ref, rsum_ref, nmat_ref,
                   m1_ref, m2_ref, b1_ref, b2_ref, eta_ref,
                   kp_out_ref, comb_out_ref):
    f32 = jnp.float32
    M = k0_ref.shape[0]                       # bg*H rows (batch folded into sublanes)
    TW = 2 * W

    k0 = k0_ref[...]                          # (M, LANE) packed reference (masked) k-space
    s = s_ref[...]                            # (M, LANE) packed sensitivity maps
    msk = mask_ref[...]                       # (M, LANE) binary 0/1 sampling mask
    sgn = lanec_ref[0]                        # (1, LANE): -1 on real half, +1 on imag half
    blk0 = lanec_ref[1]                       # conv-K lane-block masks: lanes [0:2W)
    blk1 = lanec_ref[2]                       #                          lanes [2W:4W)
    blk2 = lanec_ref[3]                       #                          lanes [4W:6W)

    lf = lstack_ref[0]                        # (2M, M) stacked [Re; Im] forward row-DFT
    li = lstack_ref[1]                        # (2M, M) stacked [Re; Im] inverse row-DFT
    sh = lstack_ref[2]                        # (2M, M) stacked [row+1; row-1] shifts
    rfb = rmat_ref[0]                         # (LANE, LANE) forward column-DFT (coil blockdiag)
    rib = rmat_ref[1]                         # (LANE, LANE) inverse column-DFT
    acomb = acomb_ref[...]                    # (2*LANE, LANE) fused coil-combine (replicated cols)
    gmat = gmat_ref[...]                      # (2W, 2*LANE) fused coil-broadcast [g_r | g_i]
    rsum = rsum_ref[...]                      # (M, M) within-batch row-sum
    hmean = nmat_ref[0]                       # (LANE, LANE) per-half ones / n
    hvar = nmat_ref[1]                        # (LANE, LANE) per-half ones / (n-1)

    s_swap = pltpu.roll(s, LANE // 2, axis=1)  # sens with real/imag halves swapped

    def dot(a, b):
        return jnp.dot(a.astype(MATMUL_DTYPE), b.astype(MATMUL_DTYPE),
                       preferred_element_type=f32)

    def cleft(lstacked, x):
        # complex row-DFT on packed [re | im] lanes: one (2M,M)@(M,LANE) matmul, split halves
        tu = dot(lstacked, x)
        re_p, im_p = tu[:M], tu[M:]
        return re_p + sgn * pltpu.roll(im_p, LANE // 2, axis=1)

    def sens_reduce(kspace):
        # ifft2c, * conj(sens), sum over coils -- coil-combine fused into one K=256 matmul
        img = dot(cleft(li, kspace), rib)                                  # (M, LANE)
        cat = jnp.concatenate([img * s, img * s_swap], axis=1)             # (M, 2*LANE)
        return dot(cat, acomb)                                             # (M, LANE): [re|im] x3

    kp = k0
    for ci in range(NUM_CASCADES):
        red3 = sens_reduce(kp)                                             # replicated combined img

        # ---- regularizer: normalize -> conv3x3 -> ReLU -> conv3x3 -> un-normalize ----
        # per-(batch, channel) mean/std on the MXU (no XLU reduce->broadcast chain)
        mean3 = dot(dot(rsum, red3), hmean)
        cent3 = red3 - mean3
        std3 = jnp.sqrt(dot(dot(rsum, cent3 * cent3), hvar)) + EPS
        xn3 = cent3 / std3                                                 # (M, LANE)

        # conv1 (2->CHANS): all 3 row offsets + column shift + channel mix in ONE matmul
        sx = dot(sh, xn3)                                                  # (2M, LANE): [x(h+1); x(h-1)]
        x3 = blk0 * sx[M:] + blk1 * xn3 + blk2 * sx[:M]                    # [x(h-1)|x(h)|x(h+1)|0]
        hid = jnp.maximum(dot(x3, m1_ref[ci]) + b1_ref[ci], 0.0)           # (M, CHANS*W)

        # conv2 (CHANS->2): lane-aligned K-stack of full-width blocks
        sb = dot(sh, hid)                                                  # (2M, CHANS*W)
        h3 = jnp.concatenate([sb[M:], hid, sb[:M]], axis=1)                # (M, 3*CHANS*W)
        m_img = (dot(h3, m2_ref[ci]) + b2_ref[ci]) * std3[:, :TW] + mean3[:, :TW]

        # ---- sens_expand: fused coil-broadcast matmul, complex-mul by sens, fft2c ----
        mb = dot(m_img, gmat)                                              # (M, 2*LANE)
        e = mb[:, :LANE] * s + sgn * (mb[:, LANE:] * s_swap)
        model_k = dot(cleft(lf, e), rfb)

        # ---- soft data consistency + update (mask is strictly binary {0,1}) ----
        kp = kp - msk * (kp - k0) * eta_ref[ci] - model_k

    kp_out_ref[...] = kp
    comb_out_ref[...] = sens_reduce(kp)   # lane-dense 128-wide store; wrapper slices [:, :2W]


# ----------------------------- host-side constant matrices -----------------------------
def _dft_mats():
    """Centered-FFT matrices so that fft2c(X) = Lf @ X @ Rf, ifft2c(X) = Li @ X @ Ri."""
    def mat(n, axis, inverse):
        eye = np.eye(n, dtype=np.complex64)
        m = np.fft.ifftshift(eye, axes=(axis,))
        m = (np.fft.ifft if inverse else np.fft.fft)(m, axis=axis, norm="ortho")
        m = np.fft.fftshift(m, axes=(axis,))
        return m.astype(np.complex64)
    return mat(H, 0, False), mat(W, 1, False), mat(H, 0, True), mat(W, 1, True)


def _right_block(r):
    """(W,W) complex column-DFT -> (LANE,LANE) real matmul on (complex, coil, W) lanes."""
    rr = np.real(r).astype(np.float32)
    ri_ = np.imag(r).astype(np.float32)
    rb = np.zeros((2, C, W, 2, C, W), np.float32)
    for c in range(C):
        rb[0, c, :, 0, c, :] = rr
        rb[1, c, :, 0, c, :] = -ri_
        rb[0, c, :, 1, c, :] = ri_
        rb[1, c, :, 1, c, :] = rr
    return rb.reshape(LANE, LANE)


def _fixed_mats(bg):
    """All data-independent constant matrices, parameterized by the batch group `bg`."""
    m = bg * H
    lf, rf, li, ri = _dft_mats()
    ib = np.eye(bg, dtype=np.float32)

    def stack2(a, b):
        return np.vstack([np.kron(ib, a), np.kron(ib, b)]).astype(np.float32)

    lstack = np.stack([
        stack2(np.real(lf), np.imag(lf)),          # forward row-DFT  [Re; Im]
        stack2(np.real(li), np.imag(li)),          # inverse row-DFT  [Re; Im]
        stack2(np.eye(H, k=1), np.eye(H, k=-1)),   # row shifts       [h+1; h-1]
    ]).astype(np.float32)                          # (3, 2m, m)
    rmats = np.stack([_right_block(rf), _right_block(ri)]).astype(np.float32)  # (2, LANE, LANE)

    rsum = np.kron(ib, np.ones((H, H), np.float32)).astype(np.float32)          # (m, m)

    # per-half mean / variance block matrices (columns replicated into 3 lane blocks)
    n = float(H * W)
    nmats = np.zeros((2, LANE, LANE), np.float32)
    for q in range(2 * W):
        hq = q // W
        for d in range(3):
            for jj in range(2 * W):
                if jj // W == hq:
                    nmats[0, q, d * 2 * W + jj] = 1.0 / n
                    nmats[1, q, d * 2 * W + jj] = 1.0 / (n - 1.0)

    # fused coil-combine (sum_c x * conj(s)); output [re|im] replicated into blocks 0..2
    acomb = np.zeros((2 * LANE, LANE), np.float32)
    for d in range(3):
        for c in range(C):
            for w_ in range(W):
                jr = d * 2 * W + w_
                ji = d * 2 * W + W + w_
                acomb[0 * C * W + c * W + w_, jr] += 1.0          # xr*sr -> +re
                acomb[1 * C * W + c * W + w_, jr] += 1.0          # xi*si -> +re
                acomb[LANE + 0 * C * W + c * W + w_, ji] += -1.0  # xr*si -> -im
                acomb[LANE + 1 * C * W + c * W + w_, ji] += 1.0   # xi*sr -> +im

    # fused coil-broadcast for sens_expand: (2W, 2*LANE) = [g_r | g_i]
    g = np.zeros((2, W, 2, 2, C, W), np.float32)
    for c in range(C):
        for w_ in range(W):
            g[0, w_, 0, :, c, w_] = 1.0   # broadcast re over (complex, coil)
            g[1, w_, 1, :, c, w_] = 1.0   # broadcast im over (complex, coil)
    gmat = g.reshape(2 * W, 2 * LANE)

    # lane constants: [sgn, conv lane-block masks 0..2] (no in-kernel iota/select)
    lanec = np.zeros((4, 1, LANE), np.float32)
    lanec[0, 0] = np.where(np.arange(LANE) < LANE // 2, -1.0, 1.0)
    for d in range(3):
        lanec[1 + d, 0, d * 2 * W:(d + 1) * 2 * W] = 1.0

    return tuple(jnp.asarray(x) for x in
                 (lanec, lstack, rmats, acomb, gmat, rsum, nmats))


def _expand_params(params):
    """Fold 3x3 conv column shifts + channel mixing into K-stacked matmul matrices."""
    nc = len(params)
    m1 = np.zeros((nc, 3, 2, W, CHANS, W), np.float32)
    m2 = np.zeros((nc, 3, CHANS, W, 2, W), np.float32)
    b1 = np.zeros((nc, 1, CHANS * W), np.float32)
    b2 = np.zeros((nc, 1, 2 * W), np.float32)
    eta = np.zeros((nc,), np.float32)
    for t, (eta_t, w1, b1_t, w2, b2_t) in enumerate(params):
        w1 = np.asarray(w1)
        w2 = np.asarray(w2)
        for ky in range(3):
            for kx in range(3):
                dx = kx - 1
                for wp in range(W):
                    ws = wp + dx
                    if 0 <= ws < W:
                        m1[t, ky, :, ws, :, wp] += w1[ky, kx]
                        m2[t, ky, :, ws, :, wp] += w2[ky, kx]
        b1[t, 0] = np.repeat(np.asarray(b1_t), W)
        b2[t, 0] = np.repeat(np.asarray(b2_t), W)
        eta[t] = float(np.asarray(eta_t).reshape(-1)[0])
    # K-stack the three row-offset blocks (3 matmuls -> 1 per conv layer); conv1's K is
    # zero-padded from 3*2W=96 to LANE=128 so its input stays a full lane-dense vreg slab.
    m1s = m1.reshape(nc, 3 * 2 * W, CHANS * W)
    m1w = np.zeros((nc, LANE, CHANS * W), np.float32)
    m1w[:, :3 * 2 * W, :] = m1s
    m2s = m2.reshape(nc, 3 * CHANS * W, 2 * W)
    return (jnp.asarray(m1w), jnp.asarray(m2s),
            jnp.asarray(b1), jnp.asarray(b2), jnp.asarray(eta))


# ----------------------------- packing helpers (plain XLA, wrapper side) -----------------------------
def _pack_cplx(xr, xi):
    """(B,C,H,W) real/imag -> (B*H, LANE) with lane order (complex, coil, W)."""
    x = jnp.stack([xr, xi], axis=1)                  # (B, 2, C, H, W)
    x = jnp.transpose(x, (0, 3, 1, 2, 4))            # (B, H, 2, C, W)
    return x.reshape(xr.shape[0] * H, LANE)


def _unpack_cplx(xp):
    x = xp.reshape(-1, H, 2, C, W)
    x = jnp.transpose(x, (0, 2, 3, 1, 4))            # (B, 2, C, H, W)
    return x[:, 0], x[:, 1]


def _pick_batch_group():
    # v7x has 2 TensorCores/chip: keep a 2-way "parallel" grid so both are used.
    # v5e/v6e are single-TC: fold the whole batch into the sublane (M) dimension and run
    # a single grid step (no per-step overhead, taller MXU operands, half the matmul issues).
    try:
        kind = jax.devices()[0].device_kind.lower()
    except Exception:
        kind = ""
    if "v7" in kind and B % 2 == 0:
        return B // 2
    return B


# ----------------------------- wrapper -----------------------------
def stl_varnet_forward(kr, ki, mask2d, sens_r, sens_i, params):
    """STL_VarNet.forward -> (kspace_pred, im_comb), each as (real, imag)."""
    bg = _pick_batch_group()
    m = bg * H
    k0 = _pack_cplx(kr, ki)                              # (B*H, LANE)
    sp = _pack_cplx(sens_r, sens_i)                      # (B*H, LANE)
    mp = jnp.tile(jnp.tile(mask2d, (1, 2 * C)), (bg, 1)) # (m, LANE)
    lanec, lstack, rmats, acomb, gmat, rsum, nmats = _fixed_mats(bg)
    m1w, m2s, b1, b2, eta = _expand_params(params)

    batch = pl.BlockSpec((m, LANE), lambda b: (b, 0))

    def const(shape):
        rank = len(shape)
        return pl.BlockSpec(shape, lambda b, _r=rank: (0,) * _r)

    kp_pack, comb_pack = pl.pallas_call(
        _varnet_kernel,
        out_shape=(jax.ShapeDtypeStruct((B * H, LANE), jnp.float32),
                   jax.ShapeDtypeStruct((B * H, LANE), jnp.float32)),
        grid=(B // bg,),
        in_specs=[batch, batch,
                  const((m, LANE)),
                  const((4, 1, LANE)),
                  const((3, 2 * m, m)),
                  const((2, LANE, LANE)),
                  const((2 * LANE, LANE)),
                  const((2 * W, 2 * LANE)),
                  const((m, m)),
                  const((2, LANE, LANE)),
                  const((NUM_CASCADES, LANE, CHANS * W)),
                  const((NUM_CASCADES, 3 * CHANS * W, 2 * W)),
                  const((NUM_CASCADES, 1, CHANS * W)),
                  const((NUM_CASCADES, 1, 2 * W)),
                  pl.BlockSpec(memory_space=pltpu.MemorySpace.SMEM)],
        out_specs=(batch, batch),
        compiler_params=pltpu.CompilerParams(dimension_semantics=("parallel",)),
    )(k0, sp, mp, lanec, lstack, rmats, acomb, gmat, rsum, nmats, m1w, m2s, b1, b2, eta)

    kp_r, kp_i = _unpack_cplx(kp_pack)
    comb = jnp.transpose(comb_pack[:, :2 * W].reshape(B, H, 2, W), (0, 2, 1, 3))  # (B, 2, H, W)
    return kp_r, kp_i, comb[:, 0:1], comb[:, 1:2]


# ----------------------------- pure-JAX reference (for verification) -----------------------------
def _fft2c_ref(xr, xi, inverse):
    x = (xr + 1j * xi).astype(jnp.complex64)
    x = jnp.fft.ifftshift(x, axes=(-2, -1))
    x = (jnp.fft.ifftn if inverse else jnp.fft.fftn)(x, axes=(-2, -1), norm="ortho")
    x = jnp.fft.fftshift(x, axes=(-2, -1))
    return jnp.real(x), jnp.imag(x)


def _conv3x3_ref(x, w, b):
    xp = jnp.pad(x, ((0, 0), (0, 0), (1, 1), (1, 1)))
    out = jnp.zeros((x.shape[0], w.shape[3], H, W), jnp.float32)
    for ky in range(3):
        for kx in range(3):
            patch = xp[:, :, ky:ky + H, kx:kx + W]
            out = out + jnp.einsum("bchw,co->bohw", patch, w[ky, kx])
    return out + b[None, :, None, None]


def _model_ref(red_r, red_i, w1, b1, w2, b2):
    x = jnp.concatenate([red_r, red_i], axis=1)                 # (B, 2, H, W)
    mean = jnp.mean(x, axis=(2, 3), keepdims=True)
    std = jnp.sqrt(jnp.sum((x - mean) ** 2, axis=(2, 3), keepdims=True) / (H * W - 1)) + EPS
    xn = (x - mean) / std
    h = jnp.maximum(_conv3x3_ref(xn, w1, b1), 0.0)
    y = _conv3x3_ref(h, w2, b2) * std + mean
    return y[:, 0:1], y[:, 1:2]


def reference_forward(kr, ki, mask2d, sens_r, sens_i, params):
    m = mask2d[None, None]
    kp_r, kp_i = kr, ki
    for (eta, w1, b1, w2, b2) in params:
        ir, ii = _fft2c_ref(kp_r, kp_i, inverse=True)
        red_r = jnp.sum(ir * sens_r + ii * sens_i, axis=1, keepdims=True)
        red_i = jnp.sum(ii * sens_r - ir * sens_i, axis=1, keepdims=True)
        mr, mi = _model_ref(red_r, red_i, w1, b1, w2, b2)
        er = mr * sens_r - mi * sens_i
        ei = mr * sens_i + mi * sens_r
        tr, ti = _fft2c_ref(er, ei, inverse=False)
        dc_r = jnp.where(m > 0, kp_r - kr, 0.0) * eta[0, 0]
        dc_i = jnp.where(m > 0, kp_i - ki, 0.0) * eta[0, 0]
        kp_r = kp_r - dc_r - tr
        kp_i = kp_i - dc_i - ti
    ir, ii = _fft2c_ref(kp_r, kp_i, inverse=True)
    comb_r = jnp.sum(ir * sens_r + ii * sens_i, axis=1, keepdims=True)
    comb_i = jnp.sum(ii * sens_r - ir * sens_i, axis=1, keepdims=True)
    return kp_r, kp_i, comb_r, comb_i


# ----------------------------- main -----------------------------
if __name__ == "__main__":
    key = jax.random.PRNGKey(0)
    ks = jax.random.split(key, 6)

    mask_cols = (jax.random.uniform(ks[0], (W,)) < 0.6).astype(jnp.float32)
    mask2d = jnp.broadcast_to(mask_cols[None, :], (H, W)).astype(jnp.float32)

    kr = jax.random.normal(ks[1], (B, C, H, W), jnp.float32) * mask2d
    ki = jax.random.normal(ks[2], (B, C, H, W), jnp.float32) * mask2d
    sens_r = 0.5 * jax.random.normal(ks[3], (B, C, H, W), jnp.float32)
    sens_i = 0.5 * jax.random.normal(ks[4], (B, C, H, W), jnp.float32)

    # Deterministic synthetic per-cascade parameters: eta = 1 (like nn.Parameter(ones(1))),
    # small conv weights for the stand-in regularizer.
    params = []
    pkey = ks[5]
    for _ in range(NUM_CASCADES):
        pkey, ka, kb = jax.random.split(pkey, 3)
        w1 = 0.05 * jax.random.normal(ka, (3, 3, 2, CHANS), jnp.float32)
        b1 = 0.01 * jnp.ones((CHANS,), jnp.float32)
        w2 = 0.05 * jax.random.normal(kb, (3, 3, CHANS, 2), jnp.float32)
        b2 = 0.01 * jnp.ones((2,), jnp.float32)
        eta = jnp.ones((1, 1), jnp.float32)
        params.append((eta, w1, b1, w2, b2))

    kp_r, kp_i, comb_r, comb_i = stl_varnet_forward(kr, ki, mask2d, sens_r, sens_i, params)
    jax.block_until_ready((kp_r, kp_i, comb_r, comb_i))

    rp_r, rp_i, rc_r, rc_i = reference_forward(kr, ki, mask2d, sens_r, sens_i, params)
    for got, ref in ((kp_r, rp_r), (kp_i, rp_i), (comb_r, rc_r), (comb_i, rc_i)):
        assert np.allclose(np.asarray(got), np.asarray(ref), atol=3e-2, rtol=3e-2), \
            "Pallas result mismatch vs JAX reference"

    print("KERNEL_OK")
</pallas_src>

<mosaic_0001>
module attributes {stable_mosaic.version = 11 : i64} {
  func.func @_varnet_kernel(%arg0: i32, %arg1: memref<32x128xf32, #tpu.memory_space<vmem>>, %arg2: memref<32x128xf32, #tpu.memory_space<vmem>>, %arg3: memref<32x128xf32, #tpu.memory_space<vmem>>, %arg4: memref<4x1x128xf32, #tpu.memory_space<vmem>>, %arg5: memref<3x64x32xf32, #tpu.memory_space<vmem>>, %arg6: memref<2x128x128xf32, #tpu.memory_space<vmem>>, %arg7: memref<256x128xf32, #tpu.memory_space<vmem>>, %arg8: memref<32x256xf32, #tpu.memory_space<vmem>>, %arg9: memref<32x32xf32, #tpu.memory_space<vmem>>, %arg10: memref<2x128x128xf32, #tpu.memory_space<vmem>>, %arg11: memref<2x128x128xf32, #tpu.memory_space<vmem>>, %arg12: memref<2x384x32xf32, #tpu.memory_space<vmem>>, %arg13: memref<2x1x128xf32, #tpu.memory_space<vmem>>, %arg14: memref<2x1x32xf32, #tpu.memory_space<vmem>>, %arg15: memref<2xf32, #tpu.memory_space<smem>>, %arg16: memref<32x128xf32, #tpu.memory_space<vmem>>, %arg17: memref<32x128xf32, #tpu.memory_space<vmem>>) attributes {dimension_semantics = [#tpu.dimension_semantics<parallel>], iteration_bounds = array<i64: 1>, scalar_prefetch = 0 : i64, scratch_operands = 0 : i64, tpu.core_type = #tpu.core_type<tc>, window_params = [{transform_indices = @transform_0, window_bounds = array<i64: 32, 128>}, {transform_indices = @transform_1, window_bounds = array<i64: 32, 128>}, {pipeline_mode = #tpu.pipeline_mode<synchronous>, transform_indices = @transform_2, window_bounds = array<i64: 32, 128>}, {pipeline_mode = #tpu.pipeline_mode<synchronous>, transform_indices = @transform_3, window_bounds = array<i64: 4, 1, 128>}, {pipeline_mode = #tpu.pipeline_mode<synchronous>, transform_indices = @transform_4, window_bounds = array<i64: 3, 64, 32>}, {pipeline_mode = #tpu.pipeline_mode<synchronous>, transform_indices = @transform_5, window_bounds = array<i64: 2, 128, 128>}, {pipeline_mode = #tpu.pipeline_mode<synchronous>, transform_indices = @transform_6, window_bounds = array<i64: 256, 128>}, {pipeline_mode = #tpu.pipeline_mode<synchronous>, transform_indices = @transform_7, window_bounds = array<i64: 32, 256>}, {pipeline_mode = #tpu.pipeline_mode<synchronous>, transform_indices = @transform_8, window_bounds = array<i64: 32, 32>}, {pipeline_mode = #tpu.pipeline_mode<synchronous>, transform_indices = @transform_9, window_bounds = array<i64: 2, 128, 128>}, {pipeline_mode = #tpu.pipeline_mode<synchronous>, transform_indices = @transform_10, window_bounds = array<i64: 2, 128, 128>}, {pipeline_mode = #tpu.pipeline_mode<synchronous>, transform_indices = @transform_11, window_bounds = array<i64: 2, 384, 32>}, {pipeline_mode = #tpu.pipeline_mode<synchronous>, transform_indices = @transform_12, window_bounds = array<i64: 2, 1, 128>}, {pipeline_mode = #tpu.pipeline_mode<synchronous>, transform_indices = @transform_13, window_bounds = array<i64: 2, 1, 32>}, {transform_indices = @transform_14, window_bounds = array<i64: 2>}, {transform_indices = @transform_15, window_bounds = array<i64: 32, 128>}, {transform_indices = @transform_16, window_bounds = array<i64: 32, 128>}]} {
    %c0 = arith.constant 0 : index
    %c0_0 = arith.constant 0 : index
    %0 = vector.load %arg1[%c0, %c0_0] : memref<32x128xf32, #tpu.memory_space<vmem>>, vector<32x128xf32>
    %c0_1 = arith.constant 0 : index
    %c0_2 = arith.constant 0 : index
    %1 = vector.load %arg2[%c0_1, %c0_2] : memref<32x128xf32, #tpu.memory_space<vmem>>, vector<32x128xf32>
    %c0_3 = arith.constant 0 : index
    %c0_4 = arith.constant 0 : index
    %2 = vector.load %arg3[%c0_3, %c0_4] : memref<32x128xf32, #tpu.memory_space<vmem>>, vector<32x128xf32>
    %c0_5 = arith.constant 0 : index
    %c0_6 = arith.constant 0 : index
    %c0_7 = arith.constant 0 : index
    %3 = vector.load %arg4[%c0_5, %c0_6, %c0_7] : memref<4x1x128xf32, #tpu.memory_space<vmem>>, vector<1x1x128xf32>
    %4 = vector.shape_cast %3 : vector<1x1x128xf32> to vector<1x128xf32>
    %c1 = arith.constant 1 : index
    %c0_8 = arith.constant 0 : index
    %c0_9 = arith.constant 0 : index
    %5 = vector.load %arg4[%c1, %c0_8, %c0_9] : memref<4x1x128xf32, #tpu.memory_space<vmem>>, vector<1x1x128xf32>
    %6 = vector.shape_cast %5 : vector<1x1x128xf32> to vector<1x128xf32>
    %c2 = arith.constant 2 : index
    %c0_10 = arith.constant 0 : index
    %c0_11 = arith.constant 0 : index
    %7 = vector.load %arg4[%c2, %c0_10, %c0_11] : memref<4x1x128xf32, #tpu.memory_space<vmem>>, vector<1x1x128xf32>
    %8 = vector.shape_cast %7 : vector<1x1x128xf32> to vector<1x128xf32>
    %c3 = arith.constant 3 : index
    %c0_12 = arith.constant 0 : index
    %c0_13 = arith.constant 0 : index
    %9 = vector.load %arg4[%c3, %c0_12, %c0_13] : memref<4x1x128xf32, #tpu.memory_space<vmem>>, vector<1x1x128xf32>
    %10 = vector.shape_cast %9 : vector<1x1x128xf32> to vector<1x128xf32>
    %c0_14 = arith.constant 0 : index
    %c0_15 = arith.constant 0 : index
    %c0_16 = arith.constant 0 : index
    %11 = vector.load %arg5[%c0_14, %c0_15, %c0_16] : memref<3x64x32xf32, #tpu.memory_space<vmem>>, vector<1x64x32xf32>
    %12 = vector.shape_cast %11 : vector<1x64x32xf32> to vector<64x32xf32>
    %c1_17 = arith.constant 1 : index
    %c0_18 = arith.constant 0 : index
    %c0_19 = arith.constant 0 : index
    %13 = vector.load %arg5[%c1_17, %c0_18, %c0_19] : memref<3x64x32xf32, #tpu.memory_space<vmem>>, vector<1x64x32xf32>
    %14 = vector.shape_cast %13 : vector<1x64x32xf32> to vector<64x32xf32>
    %c2_20 = arith.constant 2 : index
    %c0_21 = arith.constant 0 : index
    %c0_22 = arith.constant 0 : index
    %15 = vector.load %arg5[%c2_20, %c0_21, %c0_22] : memref<3x64x32xf32, #tpu.memory_space<vmem>>, vector<1x64x32xf32>
    %16 = vector.shape_cast %15 : vector<1x64x32xf32> to vector<64x32xf32>
    %c0_23 = arith.constant 0 : index
    %c0_24 = arith.constant 0 : index
    %c0_25 = arith.constant 0 : index
    %17 = vector.load %arg6[%c0_23, %c0_24, %c0_25] : memref<2x128x128xf32, #tpu.memory_space<vmem>>, vector<1x128x128xf32>
    %18 = vector.shape_cast %17 : vector<1x128x128xf32> to vector<128x128xf32>
    %c1_26 = arith.constant 1 : index
    %c0_27 = arith.constant 0 : index
    %c0_28 = arith.constant 0 : index
    %19 = vector.load %arg6[%c1_26, %c0_27, %c0_28] : memref<2x128x128xf32, #tpu.memory_space<vmem>>, vector<1x128x128xf32>
    %20 = vector.shape_cast %19 : vector<1x128x128xf32> to vector<128x128xf32>
    %c0_29 = arith.constant 0 : index
    %c0_30 = arith.constant 0 : index
    %21 = vector.load %arg7[%c0_29, %c0_30] : memref<256x128xf32, #tpu.memory_space<vmem>>, vector<256x128xf32>
    %c0_31 = arith.constant 0 : index
    %c0_32 = arith.constant 0 : index
    %22 = vector.load %arg8[%c0_31, %c0_32] : memref<32x256xf32, #tpu.memory_space<vmem>>, vector<32x256xf32>
    %c0_33 = arith.constant 0 : index
    %c0_34 = arith.constant 0 : index
    %23 = vector.load %arg9[%c0_33, %c0_34] : memref<32x32xf32, #tpu.memory_space<vmem>>, vector<32x32xf32>
    %c0_35 = arith.constant 0 : index
    %c0_36 = arith.constant 0 : index
    %c0_37 = arith.constant 0 : index
    %24 = vector.load %arg10[%c0_35, %c0_36, %c0_37] : memref<2x128x128xf32, #tpu.memory_space<vmem>>, vector<1x128x128xf32>
    %25 = vector.shape_cast %24 : vector<1x128x128xf32> to vector<128x128xf32>
    %c1_38 = arith.constant 1 : index
    %c0_39 = arith.constant 0 : index
    %c0_40 = arith.constant 0 : index
    %26 = vector.load %arg10[%c1_38, %c0_39, %c0_40] : memref<2x128x128xf32, #tpu.memory_space<vmem>>, vector<1x128x128xf32>
    %27 = vector.shape_cast %26 : vector<1x128x128xf32> to vector<128x128xf32>
    %c64_i32 = arith.constant 64 : i32
    %28 = tpu.dynamic_rotate %1 by %c64_i32 dim 1 : vector<32x128xf32>, i32 -> vector<32x128xf32>
    %cst = arith.constant dense<0.000000e+00> : vector<64x128xf32>
    %29 = tpu.matmul %14, %0, %cst {dimension_numbers = #tpu.dot_dimension_numbers<[1], [0], [0], [1], [0, 0, 1, 1], [], []>} : vector<64x32xf32>, vector<32x128xf32>, vector<64x128xf32> -> vector<64x128xf32>
    %30 = vector.extract_strided_slice %29 {offsets = [0, 0], sizes = [32, 128], strides = [1, 1]} : vector<64x128xf32> to vector<32x128xf32>
    %31 = vector.extract_strided_slice %29 {offsets = [32, 0], sizes = [32, 128], strides = [1, 1]} : vector<64x128xf32> to vector<32x128xf32>
    %c64_i32_41 = arith.constant 64 : i32
    %32 = tpu.dynamic_rotate %31 by %c64_i32_41 dim 1 : vector<32x128xf32>, i32 -> vector<32x128xf32>
    %33 = vector.broadcast %4 : vector<1x128xf32> to vector<32x128xf32>
    %34 = arith.mulf %33, %32 : vector<32x128xf32>
    %35 = arith.addf %30, %34 : vector<32x128xf32>
    %cst_42 = arith.constant dense<0.000000e+00> : vector<32x128xf32>
    %36 = tpu.matmul %35, %20, %cst_42 {dimension_numbers = #tpu.dot_dimension_numbers<[1], [0], [0], [1], [0, 0, 1, 1], [], []>} : vector<32x128xf32>, vector<128x128xf32>, vector<32x128xf32> -> vector<32x128xf32>
    %37 = arith.mulf %36, %1 : vector<32x128xf32>
    %38 = arith.mulf %36, %28 : vector<32x128xf32>
    %39 = tpu.concatenate %37, %38 in 1 : vector<32x128xf32>, vector<32x128xf32> -> vector<32x256xf32>
    %cst_43 = arith.constant dense<0.000000e+00> : vector<32x128xf32>
    %40 = tpu.matmul %39, %21, %cst_43 {dimension_numbers = #tpu.dot_dimension_numbers<[1], [0], [0], [1], [0, 0, 1, 1], [], []>} : vector<32x256xf32>, vector<256x128xf32>, vector<32x128xf32> -> vector<32x128xf32>
    %cst_44 = arith.constant dense<0.000000e+00> : vector<32x128xf32>
    %41 = tpu.matmul %23, %40, %cst_44 {dimension_numbers = #tpu.dot_dimension_numbers<[1], [0], [0], [1], [0, 0, 1, 1], [], []>} : vector<32x32xf32>, vector<32x128xf32>, vector<32x128xf32> -> vector<32x128xf32>
    %cst_45 = arith.constant dense<0.000000e+00> : vector<32x128xf32>
    %42 = tpu.matmul %41, %25, %cst_45 {dimension_numbers = #tpu.dot_dimension_numbers<[1], [0], [0], [1], [0, 0, 1, 1], [], []>} : vector<32x128xf32>, vector<128x128xf32>, vector<32x128xf32> -> vector<32x128xf32>
    %43 = arith.subf %40, %42 : vector<32x128xf32>
    %44 = arith.mulf %43, %43 : vector<32x128xf32>
    %cst_46 = arith.constant dense<0.000000e+00> : vector<32x128xf32>
    %45 = tpu.matmul %23, %44, %cst_46 {dimension_numbers = #tpu.dot_dimension_numbers<[1], [0], [0], [1], [0, 0, 1, 1], [], []>} : vector<32x32xf32>, vector<32x128xf32>, vector<32x128xf32> -> vector<32x128xf32>
    %cst_47 = arith.constant dense<0.000000e+00> : vector<32x128xf32>
    %46 = tpu.matmul %45, %27, %cst_47 {dimension_numbers = #tpu.dot_dimension_numbers<[1], [0], [0], [1], [0, 0, 1, 1], [], []>} : vector<32x128xf32>, vector<128x128xf32>, vector<32x128xf32> -> vector<32x128xf32>
    %47 = math.sqrt %46 : vector<32x128xf32>
    %cst_48 = arith.constant 9.99999997E-7 : f32
    %48 = vector.broadcast %cst_48 : f32 to vector<32x128xf32>
    %49 = arith.addf %47, %48 : vector<32x128xf32>
    %50 = arith.divf %43, %49 : vector<32x128xf32>
    %cst_49 = arith.constant dense<0.000000e+00> : vector<64x128xf32>
    %51 = tpu.matmul %16, %50, %cst_49 {dimension_numbers = #tpu.dot_dimension_numbers<[1], [0], [0], [1], [0, 0, 1, 1], [], []>} : vector<64x32xf32>, vector<32x128xf32>, vector<64x128xf32> -> vector<64x128xf32>
    %52 = vector.extract_strided_slice %51 {offsets = [32, 0], sizes = [32, 128], strides = [1, 1]} : vector<64x128xf32> to vector<32x128xf32>
    %53 = vector.broadcast %6 : vector<1x128xf32> to vector<32x128xf32>
    %54 = arith.mulf %53, %52 : vector<32x128xf32>
    %55 = vector.broadcast %8 : vector<1x128xf32> to vector<32x128xf32>
    %56 = arith.mulf %55, %50 : vector<32x128xf32>
    %57 = arith.addf %54, %56 : vector<32x128xf32>
    %58 = vector.extract_strided_slice %51 {offsets = [0, 0], sizes = [32, 128], strides = [1, 1]} : vector<64x128xf32> to vector<32x128xf32>
    %59 = vector.broadcast %10 : vector<1x128xf32> to vector<32x128xf32>
    %60 = arith.mulf %59, %58 : vector<32x128xf32>
    %61 = arith.addf %57, %60 : vector<32x128xf32>
    %c0_50 = arith.constant 0 : index
    %c0_51 = arith.constant 0 : index
    %c0_52 = arith.constant 0 : index
    %62 = vector.load %arg11[%c0_50, %c0_51, %c0_52] : memref<2x128x128xf32, #tpu.memory_space<vmem>>, vector<1x128x128xf32>
    %63 = vector.shape_cast %62 : vector<1x128x128xf32> to vector<128x128xf32>
    %cst_53 = arith.constant dense<0.000000e+00> : vector<32x128xf32>
    %64 = tpu.matmul %61, %63, %cst_53 {dimension_numbers = #tpu.dot_dimension_numbers<[1], [0], [0], [1], [0, 0, 1, 1], [], []>} : vector<32x128xf32>, vector<128x128xf32>, vector<32x128xf32> -> vector<32x128xf32>
    %c0_54 = arith.constant 0 : index
    %c0_55 = arith.constant 0 : index
    %c0_56 = arith.constant 0 : index
    %65 = vector.load %arg13[%c0_54, %c0_55, %c0_56] : memref<2x1x128xf32, #tpu.memory_space<vmem>>, vector<1x1x128xf32>
    %66 = vector.shape_cast %65 : vector<1x1x128xf32> to vector<1x128xf32>
    %67 = vector.broadcast %66 : vector<1x128xf32> to vector<32x128xf32>
    %68 = arith.addf %64, %67 : vector<32x128xf32>
    %cst_57 = arith.constant 0.000000e+00 : f32
    %69 = vector.broadcast %cst_57 : f32 to vector<32x128xf32>
    %70 = arith.maximumf %68, %69 : vector<32x128xf32>
    %cst_58 = arith.constant dense<0.000000e+00> : vector<64x128xf32>
    %71 = tpu.matmul %16, %70, %cst_58 {dimension_numbers = #tpu.dot_dimension_numbers<[1], [0], [0], [1], [0, 0, 1, 1], [], []>} : vector<64x32xf32>, vector<32x128xf32>, vector<64x128xf32> -> vector<64x128xf32>
    %72 = vector.extract_strided_slice %71 {offsets = [32, 0], sizes = [32, 128], strides = [1, 1]} : vector<64x128xf32> to vector<32x128xf32>
    %73 = vector.extract_strided_slice %71 {offsets = [0, 0], sizes = [32, 128], strides = [1, 1]} : vector<64x128xf32> to vector<32x128xf32>
    %74 = tpu.concatenate %72, %70, %73 in 1 : vector<32x128xf32>, vector<32x128xf32>, vector<32x128xf32> -> vector<32x384xf32>
    %c0_59 = arith.constant 0 : index
    %c0_60 = arith.constant 0 : index
    %c0_61 = arith.constant 0 : index
    %75 = vector.load %arg12[%c0_59, %c0_60, %c0_61] : memref<2x384x32xf32, #tpu.memory_space<vmem>>, vector<1x384x32xf32>
    %76 = vector.shape_cast %75 : vector<1x384x32xf32> to vector<384x32xf32>
    %cst_62 = arith.constant dense<0.000000e+00> : vector<32x32xf32>
    %77 = tpu.matmul %74, %76, %cst_62 {dimension_numbers = #tpu.dot_dimension_numbers<[1], [0], [0], [1], [0, 0, 1, 1], [], []>} : vector<32x384xf32>, vector<384x32xf32>, vector<32x32xf32> -> vector<32x32xf32>
    %c0_63 = arith.constant 0 : index
    %c0_64 = arith.constant 0 : index
    %c0_65 = arith.constant 0 : index
    %78 = vector.load %arg14[%c0_63, %c0_64, %c0_65] : memref<2x1x32xf32, #tpu.memory_space<vmem>>, vector<1x1x32xf32>
    %79 = vector.shape_cast %78 : vector<1x1x32xf32> to vector<1x32xf32>
    %80 = vector.broadcast %79 : vector<1x32xf32> to vector<32x32xf32>
    %81 = arith.addf %77, %80 : vector<32x32xf32>
    %82 = vector.extract_strided_slice %49 {offsets = [0, 0], sizes = [32, 32], strides = [1, 1]} : vector<32x128xf32> to vector<32x32xf32>
    %83 = arith.mulf %81, %82 : vector<32x32xf32>
    %84 = vector.extract_strided_slice %42 {offsets = [0, 0], sizes = [32, 32], strides = [1, 1]} : vector<32x128xf32> to vector<32x32xf32>
    %85 = arith.addf %83, %84 : vector<32x32xf32>
    %cst_66 = arith.constant dense<0.000000e+00> : vector<32x256xf32>
    %86 = tpu.matmul %85, %22, %cst_66 {dimension_numbers = #tpu.dot_dimension_numbers<[1], [0], [0], [1], [0, 0, 1, 1], [], []>} : vector<32x32xf32>, vector<32x256xf32>, vector<32x256xf32> -> vector<32x256xf32>
    %87 = vector.extract_strided_slice %86 {offsets = [0, 0], sizes = [32, 128], strides = [1, 1]} : vector<32x256xf32> to vector<32x128xf32>
    %88 = arith.mulf %87, %1 : vector<32x128xf32>
    %89 = vector.extract_strided_slice %86 {offsets = [0, 128], sizes = [32, 128], strides = [1, 1]} : vector<32x256xf32> to vector<32x128xf32>
    %90 = arith.mulf %89, %28 : vector<32x128xf32>
    %91 = vector.broadcast %4 : vector<1x128xf32> to vector<32x128xf32>
    %92 = arith.mulf %91, %90 : vector<32x128xf32>
    %93 = arith.addf %88, %92 : vector<32x128xf32>
    %cst_67 = arith.constant dense<0.000000e+00> : vector<64x128xf32>
    %94 = tpu.matmul %12, %93, %cst_67 {dimension_numbers = #tpu.dot_dimension_numbers<[1], [0], [0], [1], [0, 0, 1, 1], [], []>} : vector<64x32xf32>, vector<32x128xf32>, vector<64x128xf32> -> vector<64x128xf32>
    %95 = vector.extract_strided_slice %94 {offsets = [0, 0], sizes = [32, 128], strides = [1, 1]} : vector<64x128xf32> to vector<32x128xf32>
    %96 = vector.extract_strided_slice %94 {offsets = [32, 0], sizes = [32, 128], strides = [1, 1]} : vector<64x128xf32> to vector<32x128xf32>
    %c64_i32_68 = arith.constant 64 : i32
    %97 = tpu.dynamic_rotate %96 by %c64_i32_68 dim 1 : vector<32x128xf32>, i32 -> vector<32x128xf32>
    %98 = vector.broadcast %4 : vector<1x128xf32> to vector<32x128xf32>
    %99 = arith.mulf %98, %97 : vector<32x128xf32>
    %100 = arith.addf %95, %99 : vector<32x128xf32>
    %cst_69 = arith.constant dense<0.000000e+00> : vector<32x128xf32>
    %101 = tpu.matmul %100, %18, %cst_69 {dimension_numbers = #tpu.dot_dimension_numbers<[1], [0], [0], [1], [0, 0, 1, 1], [], []>} : vector<32x128xf32>, vector<128x128xf32>, vector<32x128xf32> -> vector<32x128xf32>
    %102 = arith.subf %0, %0 : vector<32x128xf32>
    %103 = arith.mulf %2, %102 : vector<32x128xf32>
    %c0_70 = arith.constant 0 : index
    %104 = memref.load %arg15[%c0_70] : memref<2xf32, #tpu.memory_space<smem>>
    %105 = vector.broadcast %104 : f32 to vector<32x128xf32>
    %106 = arith.mulf %103, %105 : vector<32x128xf32>
    %107 = arith.subf %0, %106 : vector<32x128xf32>
    %108 = arith.subf %107, %101 : vector<32x128xf32>
    %cst_71 = arith.constant dense<0.000000e+00> : vector<64x128xf32>
    %109 = tpu.matmul %14, %108, %cst_71 {dimension_numbers = #tpu.dot_dimension_numbers<[1], [0], [0], [1], [0, 0, 1, 1], [], []>} : vector<64x32xf32>, vector<32x128xf32>, vector<64x128xf32> -> vector<64x128xf32>
    %110 = vector.extract_strided_slice %109 {offsets = [0, 0], sizes = [32, 128], strides = [1, 1]} : vector<64x128xf32> to vector<32x128xf32>
    %111 = vector.extract_strided_slice %109 {offsets = [32, 0], sizes = [32, 128], strides = [1, 1]} : vector<64x128xf32> to vector<32x128xf32>
    %c64_i32_72 = arith.constant 64 : i32
    %112 = tpu.dynamic_rotate %111 by %c64_i32_72 dim 1 : vector<32x128xf32>, i32 -> vector<32x128xf32>
    %113 = vector.broadcast %4 : vector<1x128xf32> to vector<32x128xf32>
    %114 = arith.mulf %113, %112 : vector<32x128xf32>
    %115 = arith.addf %110, %114 : vector<32x128xf32>
    %cst_73 = arith.constant dense<0.000000e+00> : vector<32x128xf32>
    %116 = tpu.matmul %115, %20, %cst_73 {dimension_numbers = #tpu.dot_dimension_numbers<[1], [0], [0], [1], [0, 0, 1, 1], [], []>} : vector<32x128xf32>, vector<128x128xf32>, vector<32x128xf32> -> vector<32x128xf32>
    %117 = arith.mulf %116, %1 : vector<32x128xf32>
    %118 = arith.mulf %116, %28 : vector<32x128xf32>
    %119 = tpu.concatenate %117, %118 in 1 : vector<32x128xf32>, vector<32x128xf32> -> vector<32x256xf32>
    %cst_74 = arith.constant dense<0.000000e+00> : vector<32x128xf32>
    %120 = tpu.matmul %119, %21, %cst_74 {dimension_numbers = #tpu.dot_dimension_numbers<[1], [0], [0], [1], [0, 0, 1, 1], [], []>} : vector<32x256xf32>, vector<256x128xf32>, vector<32x128xf32> -> vector<32x128xf32>
    %cst_75 = arith.constant dense<0.000000e+00> : vector<32x128xf32>
    %121 = tpu.matmul %23, %120, %cst_75 {dimension_numbers = #tpu.dot_dimension_numbers<[1], [0], [0], [1], [0, 0, 1, 1], [], []>} : vector<32x32xf32>, vector<32x128xf32>, vector<32x128xf32> -> vector<32x128xf32>
    %cst_76 = arith.constant dense<0.000000e+00> : vector<32x128xf32>
    %122 = tpu.matmul %121, %25, %cst_76 {dimension_numbers = #tpu.dot_dimension_numbers<[1], [0], [0], [1], [0, 0, 1, 1], [], []>} : vector<32x128xf32>, vector<128x128xf32>, vector<32x128xf32> -> vector<32x128xf32>
    %123 = arith.subf %120, %122 : vector<32x128xf32>
    %124 = arith.mulf %123, %123 : vector<32x128xf32>
    %cst_77 = arith.constant dense<0.000000e+00> : vector<32x128xf32>
    %125 = tpu.matmul %23, %124, %cst_77 {dimension_numbers = #tpu.dot_dimension_numbers<[1], [0], [0], [1], [0, 0, 1, 1], [], []>} : vector<32x32xf32>, vector<32x128xf32>, vector<32x128xf32> -> vector<32x128xf32>
    %cst_78 = arith.constant dense<0.000000e+00> : vector<32x128xf32>
    %126 = tpu.matmul %125, %27, %cst_78 {dimension_numbers = #tpu.dot_dimension_numbers<[1], [0], [0], [1], [0, 0, 1, 1], [], []>} : vector<32x128xf32>, vector<128x128xf32>, vector<32x128xf32> -> vector<32x128xf32>
    %127 = math.sqrt %126 : vector<32x128xf32>
    %cst_79 = arith.constant 9.99999997E-7 : f32
    %128 = vector.broadcast %cst_79 : f32 to vector<32x128xf32>
    %129 = arith.addf %127, %128 : vector<32x128xf32>
    %130 = arith.divf %123, %129 : vector<32x128xf32>
    %cst_80 = arith.constant dense<0.000000e+00> : vector<64x128xf32>
    %131 = tpu.matmul %16, %130, %cst_80 {dimension_numbers = #tpu.dot_dimension_numbers<[1], [0], [0], [1], [0, 0, 1, 1], [], []>} : vector<64x32xf32>, vector<32x128xf32>, vector<64x128xf32> -> vector<64x128xf32>
    %132 = vector.extract_strided_slice %131 {offsets = [32, 0], sizes = [32, 128], strides = [1, 1]} : vector<64x128xf32> to vector<32x128xf32>
    %133 = vector.broadcast %6 : vector<1x128xf32> to vector<32x128xf32>
    %134 = arith.mulf %133, %132 : vector<32x128xf32>
    %135 = vector.broadcast %8 : vector<1x128xf32> to vector<32x128xf32>
    %136 = arith.mulf %135, %130 : vector<32x128xf32>
    %137 = arith.addf %134, %136 : vector<32x128xf32>
    %138 = vector.extract_strided_slice %131 {offsets = [0, 0], sizes = [32, 128], strides = [1, 1]} : vector<64x128xf32> to vector<32x128xf32>
    %139 = vector.broadcast %10 : vector<1x128xf32> to vector<32x128xf32>
    %140 = arith.mulf %139, %138 : vector<32x128xf32>
    %141 = arith.addf %137, %140 : vector<32x128xf32>
    %c1_81 = arith.constant 1 : index
    %c0_82 = arith.constant 0 : index
    %c0_83 = arith.constant 0 : index
    %142 = vector.load %arg11[%c1_81, %c0_82, %c0_83] : memref<2x128x128xf32, #tpu.memory_space<vmem>>, vector<1x128x128xf32>
    %143 = vector.shape_cast %142 : vector<1x128x128xf32> to vector<128x128xf32>
    %cst_84 = arith.constant dense<0.000000e+00> : vector<32x128xf32>
    %144 = tpu.matmul %141, %143, %cst_84 {dimension_numbers = #tpu.dot_dimension_numbers<[1], [0], [0], [1], [0, 0, 1, 1], [], []>} : vector<32x128xf32>, vector<128x128xf32>, vector<32x128xf32> -> vector<32x128xf32>
    %c1_85 = arith.constant 1 : index
    %c0_86 = arith.constant 0 : index
    %c0_87 = arith.constant 0 : index
    %145 = vector.load %arg13[%c1_85, %c0_86, %c0_87] : memref<2x1x128xf32, #tpu.memory_space<vmem>>, vector<1x1x128xf32>
    %146 = vector.shape_cast %145 : vector<1x1x128xf32> to vector<1x128xf32>
    %147 = vector.broadcast %146 : vector<1x128xf32> to vector<32x128xf32>
    %148 = arith.addf %144, %147 : vector<32x128xf32>
    %cst_88 = arith.constant 0.000000e+00 : f32
    %149 = vector.broadcast %cst_88 : f32 to vector<32x128xf32>
    %150 = arith.maximumf %148, %149 : vector<32x128xf32>
    %cst_89 = arith.constant dense<0.000000e+00> : vector<64x128xf32>
    %151 = tpu.matmul %16, %150, %cst_89 {dimension_numbers = #tpu.dot_dimension_numbers<[1], [0], [0], [1], [0, 0, 1, 1], [], []>} : vector<64x32xf32>, vector<32x128xf32>, vector<64x128xf32> -> vector<64x128xf32>
    %152 = vector.extract_strided_slice %151 {offsets = [32, 0], sizes = [32, 128], strides = [1, 1]} : vector<64x128xf32> to vector<32x128xf32>
    %153 = vector.extract_strided_slice %151 {offsets = [0, 0], sizes = [32, 128], strides = [1, 1]} : vector<64x128xf32> to vector<32x128xf32>
    %154 = tpu.concatenate %152, %150, %153 in 1 : vector<32x128xf32>, vector<32x128xf32>, vector<32x128xf32> -> vector<32x384xf32>
    %c1_90 = arith.constant 1 : index
    %c0_91 = arith.constant 0 : index
    %c0_92 = arith.constant 0 : index
    %155 = vector.load %arg12[%c1_90, %c0_91, %c0_92] : memref<2x384x32xf32, #tpu.memory_space<vmem>>, vector<1x384x32xf32>
    %156 = vector.shape_cast %155 : vector<1x384x32xf32> to vector<384x32xf32>
    %cst_93 = arith.constant dense<0.000000e+00> : vector<32x32xf32>
    %157 = tpu.matmul %154, %156, %cst_93 {dimension_numbers = #tpu.dot_dimension_numbers<[1], [0], [0], [1], [0, 0, 1, 1], [], []>} : vector<32x384xf32>, vector<384x32xf32>, vector<32x32xf32> -> vector<32x32xf32>
    %c1_94 = arith.constant 1 : index
    %c0_95 = arith.constant 0 : index
    %c0_96 = arith.constant 0 : index
    %158 = vector.load %arg14[%c1_94, %c0_95, %c0_96] : memref<2x1x32xf32, #tpu.memory_space<vmem>>, vector<1x1x32xf32>
    %159 = vector.shape_cast %158 : vector<1x1x32xf32> to vector<1x32xf32>
    %160 = vector.broadcast %159 : vector<1x32xf32> to vector<32x32xf32>
    %161 = arith.addf %157, %160 : vector<32x32xf32>
    %162 = vector.extract_strided_slice %129 {offsets = [0, 0], sizes = [32, 32], strides = [1, 1]} : vector<32x128xf32> to vector<32x32xf32>
    %163 = arith.mulf %161, %162 : vector<32x32xf32>
    %164 = vector.extract_strided_slice %122 {offsets = [0, 0], sizes = [32, 32], strides = [1, 1]} : vector<32x128xf32> to vector<32x32xf32>
    %165 = arith.addf %163, %164 : vector<32x32xf32>
    %cst_97 = arith.constant dense<0.000000e+00> : vector<32x256xf32>
    %166 = tpu.matmul %165, %22, %cst_97 {dimension_numbers = #tpu.dot_dimension_numbers<[1], [0], [0], [1], [0, 0, 1, 1], [], []>} : vector<32x32xf32>, vector<32x256xf32>, vector<32x256xf32> -> vector<32x256xf32>
    %167 = vector.extract_strided_slice %166 {offsets = [0, 0], sizes = [32, 128], strides = [1, 1]} : vector<32x256xf32> to vector<32x128xf32>
    %168 = arith.mulf %167, %1 : vector<32x128xf32>
    %169 = vector.extract_strided_slice %166 {offsets = [0, 128], sizes = [32, 128], strides = [1, 1]} : vector<32x256xf32> to vector<32x128xf32>
    %170 = arith.mulf %169, %28 : vector<32x128xf32>
    %171 = vector.broadcast %4 : vector<1x128xf32> to vector<32x128xf32>
    %172 = arith.mulf %171, %170 : vector<32x128xf32>
    %173 = arith.addf %168, %172 : vector<32x128xf32>
    %cst_98 = arith.constant dense<0.000000e+00> : vector<64x128xf32>
    %174 = tpu.matmul %12, %173, %cst_98 {dimension_numbers = #tpu.dot_dimension_numbers<[1], [0], [0], [1], [0, 0, 1, 1], [], []>} : vector<64x32xf32>, vector<32x128xf32>, vector<64x128xf32> -> vector<64x128xf32>
    %175 = vector.extract_strided_slice %174 {offsets = [0, 0], sizes = [32, 128], strides = [1, 1]} : vector<64x128xf32> to vector<32x128xf32>
    %176 = vector.extract_strided_slice %174 {offsets = [32, 0], sizes = [32, 128], strides = [1, 1]} : vector<64x128xf32> to vector<32x128xf32>
    %c64_i32_99 = arith.constant 64 : i32
    %177 = tpu.dynamic_rotate %176 by %c64_i32_99 dim 1 : vector<32x128xf32>, i32 -> vector<32x128xf32>
    %178 = vector.broadcast %4 : vector<1x128xf32> to vector<32x128xf32>
    %179 = arith.mulf %178, %177 : vector<32x128xf32>
    %180 = arith.addf %175, %179 : vector<32x128xf32>
    %cst_100 = arith.constant dense<0.000000e+00> : vector<32x128xf32>
    %181 = tpu.matmul %180, %18, %cst_100 {dimension_numbers = #tpu.dot_dimension_numbers<[1], [0], [0], [1], [0, 0, 1, 1], [], []>} : vector<32x128xf32>, vector<128x128xf32>, vector<32x128xf32> -> vector<32x128xf32>
    %182 = arith.subf %108, %0 : vector<32x128xf32>
    %183 = arith.mulf %2, %182 : vector<32x128xf32>
    %c1_101 = arith.constant 1 : index
    %184 = memref.load %arg15[%c1_101] : memref<2xf32, #tpu.memory_space<smem>>
    %185 = vector.broadcast %184 : f32 to vector<32x128xf32>
    %186 = arith.mulf %183, %185 : vector<32x128xf32>
    %187 = arith.subf %108, %186 : vector<32x128xf32>
    %188 = arith.subf %187, %181 : vector<32x128xf32>
    %c0_102 = arith.constant 0 : index
    %c0_103 = arith.constant 0 : index
    %189 = vector.load %arg16[%c0_102, %c0_103] : memref<32x128xf32, #tpu.memory_space<vmem>>, vector<32x128xf32>
    tpu.vector_store %arg16[%c0_102, %c0_103], %188 {strides = array<i32>} : memref<32x128xf32, #tpu.memory_space<vmem>>, vector<32x128xf32>,
    %cst_104 = arith.constant dense<0.000000e+00> : vector<64x128xf32>
    %190 = tpu.matmul %14, %188, %cst_104 {dimension_numbers = #tpu.dot_dimension_numbers<[1], [0], [0], [1], [0, 0, 1, 1], [], []>} : vector<64x32xf32>, vector<32x128xf32>, vector<64x128xf32> -> vector<64x128xf32>
    %191 = vector.extract_strided_slice %190 {offsets = [0, 0], sizes = [32, 128], strides = [1, 1]} : vector<64x128xf32> to vector<32x128xf32>
    %192 = vector.extract_strided_slice %190 {offsets = [32, 0], sizes = [32, 128], strides = [1, 1]} : vector<64x128xf32> to vector<32x128xf32>
    %c64_i32_105 = arith.constant 64 : i32
    %193 = tpu.dynamic_rotate %192 by %c64_i32_105 dim 1 : vector<32x128xf32>, i32 -> vector<32x128xf32>
    %194 = vector.broadcast %4 : vector<1x128xf32> to vector<32x128xf32>
    %195 = arith.mulf %194, %193 : vector<32x128xf32>
    %196 = arith.addf %191, %195 : vector<32x128xf32>
    %cst_106 = arith.constant dense<0.000000e+00> : vector<32x128xf32>
    %197 = tpu.matmul %196, %20, %cst_106 {dimension_numbers = #tpu.dot_dimension_numbers<[1], [0], [0], [1], [0, 0, 1, 1], [], []>} : vector<32x128xf32>, vector<128x128xf32>, vector<32x128xf32> -> vector<32x128xf32>
    %198 = arith.mulf %197, %1 : vector<32x128xf32>
    %199 = arith.mulf %197, %28 : vector<32x128xf32>
    %200 = tpu.concatenate %198, %199 in 1 : vector<32x128xf32>, vector<32x128xf32> -> vector<32x256xf32>
    %cst_107 = arith.constant dense<0.000000e+00> : vector<32x128xf32>
    %201 = tpu.matmul %200, %21, %cst_107 {dimension_numbers = #tpu.dot_dimension_numbers<[1], [0], [0], [1], [0, 0, 1, 1], [], []>} : vector<32x256xf32>, vector<256x128xf32>, vector<32x128xf32> -> vector<32x128xf32>
    %c0_108 = arith.constant 0 : index
    %c0_109 = arith.constant 0 : index
    %202 = vector.load %arg17[%c0_108, %c0_109] : memref<32x128xf32, #tpu.memory_space<vmem>>, vector<32x128xf32>
    tpu.vector_store %arg17[%c0_108, %c0_109], %201 {strides = array<i32>} : memref<32x128xf32, #tpu.memory_space<vmem>>, vector<32x128xf32>,
    return
  }
  func.func @transform_0(%arg0: i32) -> (i32, i32) {
    %c0_i32 = arith.constant 0 : i32
    %c0_i32_0 = arith.constant 0 : i32
    return %arg0, %c0_i32 : i32, i32
  }
  func.func @transform_1(%arg0: i32) -> (i32, i32) {
    %c0_i32 = arith.constant 0 : i32
    %c0_i32_0 = arith.constant 0 : i32
    return %arg0, %c0_i32 : i32, i32
  }
  func.func @transform_2(%arg0: i32) -> (i32, i32) {
    %c0_i32 = arith.constant 0 : i32
    %c0_i32_0 = arith.constant 0 : i32
    %c0_i32_1 = arith.constant 0 : i32
    return %c0_i32, %c0_i32_0 : i32, i32
  }
  func.func @transform_3(%arg0: i32) -> (i32, i32, i32) {
    %c0_i32 = arith.constant 0 : i32
    %c0_i32_0 = arith.constant 0 : i32
    %c0_i32_1 = arith.constant 0 : i32
    %c0_i32_2 = arith.constant 0 : i32
    return %c0_i32, %c0_i32_0, %c0_i32_1 : i32, i32, i32
  }
  func.func @transform_4(%arg0: i32) -> (i32, i32, i32) {
    %c0_i32 = arith.constant 0 : i32
    %c0_i32_0 = arith.constant 0 : i32
    %c0_i32_1 = arith.constant 0 : i32
    %c0_i32_2 = arith.constant 0 : i32
    return %c0_i32, %c0_i32_0, %c0_i32_1 : i32, i32, i32
  }
  func.func @transform_5(%arg0: i32) -> (i32, i32, i32) {
    %c0_i32 = arith.constant 0 : i32
    %c0_i32_0 = arith.constant 0 : i32
    %c0_i32_1 = arith.constant 0 : i32
    %c0_i32_2 = arith.constant 0 : i32
    return %c0_i32, %c0_i32_0, %c0_i32_1 : i32, i32, i32
  }
  func.func @transform_6(%arg0: i32) -> (i32, i32) {
    %c0_i32 = arith.constant 0 : i32
    %c0_i32_0 = arith.constant 0 : i32
    %c0_i32_1 = arith.constant 0 : i32
    return %c0_i32, %c0_i32_0 : i32, i32
  }
  func.func @transform_7(%arg0: i32) -> (i32, i32) {
    %c0_i32 = arith.constant 0 : i32
    %c0_i32_0 = arith.constant 0 : i32
    %c0_i32_1 = arith.constant 0 : i32
    return %c0_i32, %c0_i32_0 : i32, i32
  }
  func.func @transform_8(%arg0: i32) -> (i32, i32) {
    %c0_i32 = arith.constant 0 : i32
    %c0_i32_0 = arith.constant 0 : i32
    %c0_i32_1 = arith.constant 0 : i32
    return %c0_i32, %c0_i32_0 : i32, i32
  }
  func.func @transform_9(%arg0: i32) -> (i32, i32, i32) {
    %c0_i32 = arith.constant 0 : i32
    %c0_i32_0 = arith.constant 0 : i32
    %c0_i32_1 = arith.constant 0 : i32
    %c0_i32_2 = arith.constant 0 : i32
    return %c0_i32, %c0_i32_0, %c0_i32_1 : i32, i32, i32
  }
  func.func @transform_10(%arg0: i32) -> (i32, i32, i32) {
    %c0_i32 = arith.constant 0 : i32
    %c0_i32_0 = arith.constant 0 : i32
    %c0_i32_1 = arith.constant 0 : i32
    %c0_i32_2 = arith.constant 0 : i32
    return %c0_i32, %c0_i32_0, %c0_i32_1 : i32, i32, i32
  }
  func.func @transform_11(%arg0: i32) -> (i32, i32, i32) {
    %c0_i32 = arith.constant 0 : i32
    %c0_i32_0 = arith.constant 0 : i32
    %c0_i32_1 = arith.constant 0 : i32
    %c0_i32_2 = arith.constant 0 : i32
    return %c0_i32, %c0_i32_0, %c0_i32_1 : i32, i32, i32
  }
  func.func @transform_12(%arg0: i32) -> (i32, i32, i32) {
    %c0_i32 = arith.constant 0 : i32
    %c0_i32_0 = arith.constant 0 : i32
    %c0_i32_1 = arith.constant 0 : i32
    %c0_i32_2 = arith.constant 0 : i32
    return %c0_i32, %c0_i32_0, %c0_i32_1 : i32, i32, i32
  }
  func.func @transform_13(%arg0: i32) -> (i32, i32, i32) {
    %c0_i32 = arith.constant 0 : i32
    %c0_i32_0 = arith.constant 0 : i32
    %c0_i32_1 = arith.constant 0 : i32
    %c0_i32_2 = arith.constant 0 : i32
    return %c0_i32, %c0_i32_0, %c0_i32_1 : i32, i32, i32
  }
  func.func @transform_14(%arg0: i32) -> i32 {
    %c0_i32 = arith.constant 0 : i32
    %c0_i32_0 = arith.constant 0 : i32
    return %c0_i32 : i32
  }
  func.func @transform_15(%arg0: i32) -> (i32, i32) {
    %c0_i32 = arith.constant 0 : i32
    %c0_i32_0 = arith.constant 0 : i32
    return %arg0, %c0_i32 : i32, i32
  }
  func.func @transform_16(%arg0: i32) -> (i32, i32) {
    %c0_i32 = arith.constant 0 : i32
    %c0_i32_0 = arith.constant 0 : i32
    return %arg0, %c0_i32 : i32, i32
  }
}

</mosaic_0001>

<bundles_post_ra>
// kernel: tpu_custom_call.1
= control target key start
LH: loop header
LB: loop body
LE: loop exit
PB: predicated region body
PF: predicated region fallthrough
CT: control target
= control target key end

     0   :  { %s8395_s0 = inlined_call_operand.hbm [shape: f32[32,128], index: 0, kind: input, shape index: {}]   ;;  %s8396_s1 = inlined_call_operand.hbm [shape: f32[32,128], index: 1, kind: input, shape index: {}]   ;;  %s8397_s2 = inlined_call_operand.hbm [shape: f32[32,128], index: 2, kind: input, shape index: {}]   ;;  %s8398_s3 = inlined_call_operand.vmem [shape: f32[4,1,128], index: 3, kind: input, shape index: {}]   ;;  %s8399_s4 = inlined_call_operand.vmem [shape: f32[3,64,32], index: 4, kind: input, shape index: {}]   ;;  %s8400_s5 = inlined_call_operand.vmem [shape: f32[2,128,128], index: 5, kind: input, shape index: {}]   ;;  %s8401_s6 = inlined_call_operand.vmem [shape: f32[256,128], index: 6, kind: input, shape index: {}]   ;;  %s8402_s7 = inlined_call_operand.vmem [shape: f32[32,256], index: 7, kind: input, shape index: {}]   ;;  %s8403_s8 = inlined_call_operand.hbm [shape: f32[32,32], index: 8, kind: input, shape index: {}]   ;;  %s8404_s9 = inlined_call_operand.vmem [shape: f32[2,128,128], index: 9, kind: input, shape index: {}]   ;;  %s8405_s10 = inlined_call_operand.vmem [shape: f32[2,128,128], index: 10, kind: input, shape index: {}]   ;;  %s8406_s11 = inlined_call_operand.vmem [shape: f32[2,384,32], index: 11, kind: input, shape index: {}]   ;;  %s8407_s12 = inlined_call_operand.vmem [shape: f32[2,1,128], index: 12, kind: input, shape index: {}]   ;;  %s8408_s13 = inlined_call_operand.vmem [shape: f32[2,1,32], index: 13, kind: input, shape index: {}]   ;;  %s8409_s14 = inlined_call_operand.vmem [shape: f32[2], index: 14, kind: input, shape index: {}]   ;;  %s8410_s15 = inlined_call_operand.hbm [shape: f32[32,128], index: 15, kind: output, shape index: {0}]   ;;  %s8411_s16 = inlined_call_operand.hbm [shape: f32[32,128], index: 16, kind: output, shape index: {1}]  }
   0x1   :  { %8493 = sst [smem:[#allocation60_spill]] %s8395_s0 }
   0x2   :  { %8494 = sst [smem:[#allocation61_spill]] %s8411_s16 }
   0x3   :  { %22 = vsyncpa [#allocation3], 0 }
   0x4   :  { %23 = vsyncpa [#allocation7], 0 }
   0x5   :  { %24 = vsyncpa [#allocation10], 0 }
   0x6   :  { %25 = vsyncpa [#allocation5], 0 }
   0x7   :  { %26 = vsyncpa [#allocation4], 0 }
   0x8   :  { %27 = vsyncpa [#allocation14], 0  ;;  %s6483_s21 = smov [#allocation6]   ;;  %s6484_s23 = smov [#allocation2]  }
   0x9   :  { %s45_s22 = sshll.u32 %s6483_s21, 4  ;;  %s33_s24 = sshll.u32 %s6484_s23, 4  ;;  %s46_s22 = int_to_ptr.vmem [resolvable:$true] %s45_s22  ;;  %s6579_s24 = int_to_ptr.vmem [resolvable:$true] %s33_s24 }
   0xa   :  { %s6327_s27 = scalar_lea.hbm %s8396_s1, 512 }
   0xb   :  { %p6328_p0 = scmp.ne.s32.totalorder %s8396_s1, %s6327_s27  ;;  %p6331_p1 = scmp.lt.u32.totalorder %s6327_s27, %s8396_s1 }
   0xd   :  { %p6333_p2 = pnand %p6331_p1, %p6328_p0 }
   0xf   :  { %6336 = shalt.err (!%p6333_p2)
}
  0x10   :  { %s6337_s17 = scalar_lea.vmem %s46_s22, 512  ;;  %p6342_p4 = scmp.lt.s32.totalorder %s46_s22, %s46_s22 }
  0x11   :  { %p6338_p3 = scmp.ne.s32.totalorder %s46_s22, %s6337_s17  ;;  %p6343_p5 = scmp.lt.s32.totalorder %s6337_s17, %s6337_s17 }
  0x13   :  { %p6344_p6 = por %p6343_p5, %p6342_p4 }
  0x15   :  { %p6345_p7 = pnand %p6344_p6, %p6338_p3 }
  0x17   :  { %6348 = shalt.err (!%p6345_p7)
}
  0x18   :  { %s6485_s18 = smov 128   ;;  %s6486_s19 = smov 8  }
  0x19   :  { %51 = dma.hbm_to_vmem [thread:$0]  %s8396_s1, 512, %s46_s22, [#allocation7], %s6485_s18, %s6485_s18, %s6486_s19  }
  0x1a   :  { %s8495_s26 = sld [smem:[#allocation60_spill]] }
  0x20   :  { %s6349_s27 = scalar_lea.hbm %s8495_s26, 512 }
  0x21   :  { %p6350_p8 = scmp.ne.s32.totalorder %s8495_s26, %s6349_s27  ;;  %p6353_p9 = scmp.lt.u32.totalorder %s6349_s27, %s8495_s26 }
  0x23   :  { %p6355_p10 = pnand %p6353_p9, %p6350_p8 }
  0x25   :  { %6358 = shalt.err (!%p6355_p10)
}
  0x26   :  { %s6359_s17 = scalar_lea.vmem %s6579_s24, 512  ;;  %p6364_p12 = scmp.lt.s32.totalorder %s6579_s24, %s6579_s24 }
  0x27   :  { %p6360_p11 = scmp.ne.s32.totalorder %s6579_s24, %s6359_s17  ;;  %p6365_p13 = scmp.lt.s32.totalorder %s6359_s17, %s6359_s17 }
  0x29   :  { %p6366_p0 = por %p6365_p13, %p6364_p12 }
  0x2b   :  { %p6367_p1 = pnand %p6366_p0, %p6360_p11 }
  0x2d   :  { %6370 = shalt.err (!%p6367_p1)
}
  0x2e   :  { %39 = dma.hbm_to_vmem [thread:$0]  %s8495_s26, 512, %s6579_s24, [#allocation3], %s6485_s18, %s6485_s18, %s6486_s19  }
  0x2f   :  { %s6487_s20 = smov [#allocation8]   ;;  %s6488_s23 = smov [#allocation9]  }
  0x30   :  { %s57_s21 = sshll.u32 %s6487_s20, 4  ;;  %s79_s25 = sshll.u32 %s6488_s23, 4  ;;  %s58_s21 = int_to_ptr.vmem [resolvable:$true] %s57_s21  ;;  %s6616_s25 = int_to_ptr.vmem [resolvable:$true] %s79_s25 }
  0x31   :  { %s6371_s29 = scalar_lea.hbm %s8397_s2, 512 }
  0x32   :  { %p6372_p2 = scmp.ne.s32.totalorder %s8397_s2, %s6371_s29  ;;  %p6375_p3 = scmp.lt.u32.totalorder %s6371_s29, %s8397_s2 }
  0x34   :  { %p6377_p4 = pnand %p6375_p3, %p6372_p2 }
  0x36   :  { %6380 = shalt.err (!%p6377_p4)
}
  0x37   :  { %s6381_s24 = scalar_lea.vmem %s58_s21, 512  ;;  %p6386_p6 = scmp.lt.s32.totalorder %s58_s21, %s58_s21 }
  0x38   :  { %p6382_p5 = scmp.ne.s32.totalorder %s58_s21, %s6381_s24  ;;  %p6387_p7 = scmp.lt.s32.totalorder %s6381_s24, %s6381_s24 }
  0x3a   :  { %p6388_p8 = por %p6387_p7, %p6386_p6 }
  0x3c   :  { %p6389_p9 = pnand %p6388_p8, %p6382_p5 }
  0x3e   :  { %6392 = shalt.err (!%p6389_p9)
}
  0x3f   :  { %63 = dma.hbm_to_vmem [thread:$0]  %s8397_s2, 512, %s58_s21, [#allocation7], %s6485_s18, %s6485_s18, %s6486_s19  }
  0x40   :  { %s6393_s16 = scalar_lea.hbm %s8403_s8, 512 }
  0x41   :  { %p6394_p10 = scmp.ne.s32.totalorder %s8403_s8, %s6393_s16  ;;  %p6397_p11 = scmp.lt.u32.totalorder %s6393_s16, %s8403_s8 }
  0x43   :  { %p6399_p12 = pnand %p6397_p11, %p6394_p10 }
  0x45   :  { %6402 = shalt.err (!%p6399_p12)
}
  0x46   :  { %s6403_s30 = scalar_lea.vmem %s6616_s25, 512  ;;  %p6408_p0 = scmp.lt.s32.totalorder %s6616_s25, %s6616_s25 }
  0x47   :  { %p6404_p13 = scmp.ne.s32.totalorder %s6616_s25, %s6403_s30  ;;  %p6409_p1 = scmp.lt.s32.totalorder %s6403_s30, %s6403_s30 }
  0x49   :  { %p6410_p2 = por %p6409_p1, %p6408_p0 }
  0x4b   :  { %p6411_p3 = pnand %p6410_p2, %p6404_p13 }
  0x4d   :  { %6414 = shalt.err (!%p6411_p3)
}
  0x4e   :  { %85 = dma.hbm_to_vmem [thread:$0]  %s8403_s8, 512, %s6616_s25, [#allocation10], %s6485_s18, %s6485_s18, %s6486_s19  }
  0x4f   :  { %s102_s24 = sshll.u32 %s8409_s14, 4  ;;  %s103_s24 = int_to_ptr.vmem [resolvable:$true] %s102_s24 }
  0x50   :  { %s6415_s26 = scalar_lea.vmem %s103_s24, 16  ;;  %p6420_p5 = scmp.lt.s32.totalorder %s103_s24, %s103_s24 }
  0x51   :  { %p6416_p4 = scmp.ne.s32.totalorder %s103_s24, %s6415_s26  ;;  %p6421_p6 = scmp.lt.s32.totalorder %s6415_s26, %s6415_s26 }
  0x53   :  { %p6422_p7 = por %p6421_p6, %p6420_p5 }
  0x55   :  { %p6423_p8 = pnand %p6422_p7, %p6416_p4 }
  0x57   :  { %6426 = shalt.err (!%p6423_p8)
}
  0x58   :  { %s6489_s1 = smov [#allocation11]  }
  0x59   :  { %105 = dma.vmem_to_smem %s103_s24, 16, %s6489_s1, [#allocation5]  }
  0x5a   :  { %6471 = dma.done.wait [#allocation3], 512  }
  0x5b   :  { %6472 = vsyncadd [#allocation3], 4294966784 }
  0x5c   :  { %6473 = dma.done.wait [#allocation7], 1024  }
  0x5d   :  { %6474 = vsyncadd [#allocation7], 4294966272 }
  0x5e   :  { %6475 = dma.done.wait [#allocation10], 512  }
  0x5f   :  { %6476 = vsyncadd [#allocation10], 4294966784 }
  0x60   :  { %6477 = dma.done.wait [#allocation5], 16  }
  0x61   :  { %6478 = vsyncadd [#allocation5], 4294967280 }
  0x62   :  { %121 = sfence }
  0x63   :  { %v122_v0 = vld [vmem:[#allocation2] sm:$0xff]  ;;  %v123_v1 = vld [vmem:[#allocation2 + $0x8] sm:$0xff]  ;;  %v124_v2 = vld [vmem:[#allocation2 + $0x10] sm:$0xff]  ;;  %vm285_vm0 = vcmask 261120   ;;  %s6490_s21 = smov 64   ;;  %s4168_s8 = sld [smem:[#allocation11 + $0x1]] }
  0x64   :  { %v5527_v3 = vpack.c.bf16 %v123_v1, %v122_v0  ;;  %v125_v4 = vld [vmem:[#allocation2 + $0x18] sm:$0xff]  ;;  %v3958_v5 = vld [vmem:[%s8399_s4 + $0x40] sm:$0xff]  ;;  %v3959_v7 = vld [vmem:[%s8399_s4 + $0x48] sm:$0xff] }
  0x65   :  { %v5531_v6 = vpack.c.bf16 %v125_v4, %v124_v2  ;;  %4805 = vmatprep.mubr.msk.f32.mxu1 %vm285_vm0, %v3958_v5  ;;  %v3960_v8 = vld [vmem:[%s8399_s4 + $0x50] sm:$0xff]  ;;  %v3961_v9 = vld [vmem:[%s8399_s4 + $0x58] sm:$0xff]  ;;  %v3962_v10 = vld [vmem:[%s8399_s4 + $0x60] sm:$0xff] }
  0x66   :  { %5528 = vmatprep.subr.bf16.mxu1 %v5527_v3  ;;  %v3963_v11 = vld [vmem:[%s8399_s4 + $0x68] sm:$0xff]  ;;  %v3964_v12 = vld [vmem:[%s8399_s4 + $0x70] sm:$0xff]  ;;  %v3965_v13 = vld [vmem:[%s8399_s4 + $0x78] sm:$0xff] }
  0x67   :  { %5530 = vmatpush3.bf16.msra.mxu1 %v5527_v3  ;;  %v3974_v14 = vld [vmem:[%s8400_s5 + $0x80] sm:$0xff]  ;;  %v3975_v15 = vld [vmem:[%s8400_s5 + $0x88] sm:$0xff]  ;;  %v3976_v16 = vld [vmem:[%s8400_s5 + $0x90] sm:$0xff] }
  0x68   :  { %5532 = vmatprep.subr.bf16.mxu1 %v5531_v6  ;;  %v6697_v17 = vpack.c.bf16 %v3975_v15, %v3974_v14  ;;  %v3977_v18 = vld [vmem:[%s8400_s5 + $0x98] sm:$0xff]  ;;  %v3978_v20 = vld [vmem:[%s8400_s5 + $0xa0] sm:$0xff]  ;;  %v3979_v21 = vld [vmem:[%s8400_s5 + $0xa8] sm:$0xff] }
  0x69   :  { %v6702_v19 = vpack.c.bf16 %v3977_v18, %v3976_v16  ;;  %v6713_v22 = vpack.c.bf16 %v3979_v21, %v3978_v20  ;;  %v3980_v23 = vld [vmem:[%s8400_s5 + $0xb0] sm:$0xff]  ;;  %v3981_v24 = vld [vmem:[%s8400_s5 + $0xb8] sm:$0xff]  ;;  %v3982_v26 = vld [vmem:[%s8400_s5 + $0xc0] sm:$0xff] }
  0x6a   :  { %8496 = vst [vmem:[#allocation21_spill] sm:$0xff] %v6697_v17  ;;  %v6723_v25 = vpack.c.bf16 %v3981_v24, %v3980_v23  ;;  %v3983_v27 = vld [vmem:[%s8400_s5 + $0xc8] sm:$0xff]  ;;  %v3984_v29 = vld [vmem:[%s8400_s5 + $0xd0] sm:$0xff]  ;;  %v3985_v30 = vld [vmem:[%s8400_s5 + $0xd8] sm:$0xff] }
  0x6b   :  { %5534 = vmatpush3.bf16.msra.mxu1 %v5531_v6  ;;  %8497 = vst [vmem:[#allocation22_spill] sm:$0xff] %v6702_v19  ;;  %8498 = vst [vmem:[#allocation23_spill] sm:$0xff] %v6713_v22  ;;  %v6733_v28 = vpack.c.bf16 %v3983_v27, %v3982_v26  ;;  %v6743_v31 = vpack.c.bf16 %v3985_v30, %v3984_v29  ;;  %v3986_v32 = vld [vmem:[%s8400_s5 + $0xe0] sm:$0xff]  ;;  %v3987_v33 = vld [vmem:[%s8400_s5 + $0xe8] sm:$0xff] }
  0x6c   :  { %5536 = vmatprep.subr.bf16.mxu1 %v6697_v17  ;;  %8499 = vst [vmem:[#allocation24_spill] sm:$0xff] %v6723_v25  ;;  %v6754_v34 = vpack.c.bf16 %v3987_v33, %v3986_v32  ;;  %v3988_v35 = vld [vmem:[%s8400_s5 + $0xf0] sm:$0xff]  ;;  %v3989_v36 = vld [vmem:[%s8400_s5 + $0xf8] sm:$0xff]  ;;  %v216_v44 = vld [vmem:[%s8401_s6 + $0x80] sm:$0xff] }
  0x6d   :  { %8500 = vst [vmem:[#allocation25_spill] sm:$0xff] %v6733_v28  ;;  %8501 = vst [vmem:[#allocation26_spill] sm:$0xff] %v6743_v31  ;;  %v6764_v37 = vpack.c.bf16 %v3989_v36, %v3988_v35  ;;  %v217_v45 = vld [vmem:[%s8401_s6 + $0x88] sm:$0xff]  ;;  %v200_v47 = vld [vmem:[%s8401_s6] sm:$0xff] }
  0x6e   :  { %4806 = vmatmul.mubr.msk.f32.vlgmr.msra.gmra.mrb[0].mxu1 %vm285_vm0, %v3959_v7  ;;  %8502 = vst [vmem:[#allocation27_spill] sm:$0xff] %v6754_v34  ;;  %v6783_v46 = vpack.c.bf16 %v217_v45, %v216_v44  ;;  %v201_v48 = vld [vmem:[%s8401_s6 + $0x8] sm:$0xff]  ;;  %v218_v49 = vld [vmem:[%s8401_s6 + $0x90] sm:$0xff]  ;;  %v219_v52 = vld [vmem:[%s8401_s6 + $0x98] sm:$0xff] }
  0x6f   :  { %4808 = vmatprep.mubr.msk.f32.mxu1 %vm285_vm0, %v3960_v8  ;;  %5538 = vmatpush3.bf16.msra.mxu1 %v6697_v17  ;;  %8503 = vst [vmem:[#allocation28_spill] sm:$0xff] %v6764_v37  ;;  %v6794_v51 = vpack.c.bf16 %v201_v48, %v200_v47  ;;  %v202_v53 = vld [vmem:[%s8401_s6 + $0x10] sm:$0xff]  ;;  %v203_v54 = vld [vmem:[%s8401_s6 + $0x18] sm:$0xff]  ;;  %v6806_v56 = vpack.c.bf16 %v219_v52, %v218_v49  ;;  %v220_v57 = vld [vmem:[%s8401_s6 + $0xa0] sm:$0xff] }
  0x70   :  { %5540 = vmatprep.subr.bf16.mxu1 %v6702_v19  ;;  %5568 = vmatprep.subr.bf16.mxu0 %v6783_v46  ;;  %v221_v58 = vld [vmem:[%s8401_s6 + $0xa8] sm:$0xff]  ;;  %v6816_v59 = vld [vmem:[#allocation6] sm:$0xff]  ;;  %v6819_v60 = vpack.c.bf16 %v203_v54, %v202_v53  ;;  %v222_v0 = vld [vmem:[%s8401_s6 + $0xb0] sm:$0xff] }
  0x71   :  { %5570 = vmatpush3.bf16.msra.mxu0 %v6794_v51  ;;  %v6822_v61 = vpack.c.bf16 %v221_v58, %v220_v57  ;;  %v204_v62 = vld [vmem:[%s8401_s6 + $0x20] sm:$0xff]  ;;  %v205_v63 = vld [vmem:[%s8401_s6 + $0x28] sm:$0xff]  ;;  %v223_v1 = vld [vmem:[%s8401_s6 + $0xb8] sm:$0xff] }
  0x72   :  { %4809 = vmatmul.mubr.msk.f32.gmra.mrb[2].mxu1 %vm285_vm0, %v3961_v9  ;;  %5572 = vmatprep.subr.bf16.mxu0 %v6806_v56  ;;  %v6839_v2 = vld [vmem:[#allocation6 + $0x8] sm:$0xff]  ;;  %v6841_v3 = vld [vmem:[#allocation6 + $0x10] sm:$0xff]  ;;  %v6844_v4 = vpack.c.bf16 %v205_v63, %v204_v62  ;;  %v6847_v5 = vpack.c.bf16 %v223_v1, %v222_v0  ;;  %v207_v7 = vld [vmem:[%s8401_s6 + $0x38] sm:$0xff] }
  0x73   :  { %4811 = vmatprep.mubr.msk.f32.mxu1 %vm285_vm0, %v3962_v10  ;;  %5542 = vmatpush3.bf16.msra.mxu1 %v6702_v19  ;;  %8504 = vst [vmem:[#allocation29_spill] sm:$0xff] %v6822_v61  ;;  %v206_v6 = vld [vmem:[%s8401_s6 + $0x30] sm:$0xff]  ;;  %v224_v8 = vld [vmem:[%s8401_s6 + $0xc0] sm:$0xff]  ;;  %v225_v9 = vld [vmem:[%s8401_s6 + $0xc8] sm:$0xff] }
  0x74   :  { %5544 = vmatprep.subr.bf16.mxu1 %v6713_v22  ;;  %8505 = vst [vmem:[#allocation30_spill] sm:$0xff] %v6844_v4  ;;  %8506 = vst [vmem:[#allocation31_spill] sm:$0xff] %v6847_v5  ;;  %v6865_v10 = vld [vmem:[#allocation6 + $0x18] sm:$0xff]  ;;  %v209_v14 = vld [vmem:[%s8401_s6 + $0x48] sm:$0xff] }
  0x75   :  { %5574 = vmatpush3.bf16.msra.mxu0 %v6819_v60  ;;  %v226_v15 = vld [vmem:[%s8401_s6 + $0xd0] sm:$0xff]  ;;  %v227_v16 = vld [vmem:[%s8401_s6 + $0xd8] sm:$0xff]  ;;  %v228_v24 = vld [vmem:[%s8401_s6 + $0xe0] sm:$0xff] }
  0x76   :  { %4812 = vmatmul.mubr.msk.f32.gmra.mrb[4].mxu1 %vm285_vm0, %v3963_v11  ;;  %5576 = vmatprep.subr.bf16.mxu0 %v6822_v61  ;;  %v6868_v11 = vpack.c.bf16 %v207_v7, %v206_v6  ;;  %v6891_v20 = vpack.c.bf16 %v227_v16, %v226_v15  ;;  %v210_v21 = vld [vmem:[%s8401_s6 + $0x50] sm:$0xff]  ;;  %v211_v23 = vld [vmem:[%s8401_s6 + $0x58] sm:$0xff]  ;;  %v229_v26 = vld [vmem:[%s8401_s6 + $0xe8] sm:$0xff] }
  0x77   :  { %4814 = vmatprep.mubr.msk.f32.mxu1 %vm285_vm0, %v3964_v12  ;;  %5546 = vmatpush3.bf16.msra.mxu1 %v6713_v22  ;;  %v6871_v12 = vpack.c.bf16 %v225_v9, %v224_v8  ;;  %v6906_v27 = vpack.c.bf16 %v211_v23, %v210_v21  ;;  %v6909_v29 = vpack.c.bf16 %v229_v26, %v228_v24  ;;  %v212_v30 = vld [vmem:[%s8401_s6 + $0x60] sm:$0xff]  ;;  %v213_v32 = vld [vmem:[%s8401_s6 + $0x68] sm:$0xff]  ;;  %v246_v26 = vld [vmem:[%s8404_s9 + $0x10] sm:$0xff] }
  0x78   :  { %5548 = vmatprep.subr.bf16.mxu1 %v6723_v25  ;;  %8507 = vst [vmem:[#allocation32_spill] sm:$0xff] %v6868_v11  ;;  %8510 = vst [vmem:[#allocation35_spill] sm:$0xff] %v6891_v20  ;;  %v6918_v33 = vpack.c.bf16 %v213_v32, %v212_v30  ;;  %v4014_v35 = vld [vmem:[%s8398_s3] ss:$0 sm:$0xff] }
  0x79   :  { %5578 = vmatpush3.bf16.msra.mxu0 %v6844_v4  ;;  %8508 = vst [vmem:[#allocation33_spill] sm:$0xff] %v6871_v12  ;;  %8511 = vst [vmem:[#allocation36_spill] sm:$0xff] %v6906_v27  ;;  %v6963_v24 = vld [vmem:[#allocation9] sm:$0xff] }
  0x7a   :  { %4815 = vmatmul.mubr.msk.f32.gmra.mrb[6].mxu1 %vm285_vm0, %v3965_v13  ;;  %5580 = vmatprep.subr.bf16.mxu0 %v6847_v5  ;;  %v208_v13 = vld [vmem:[%s8401_s6 + $0x40] sm:$0xff]  ;;  %8512 = vst [vmem:[#allocation37_spill] sm:$0xff] %v6909_v29  ;;  %8513 = vst [vmem:[#allocation38_spill] sm:$0xff] %v6918_v33 }
  0x7b   :  { %5550 = vmatpush3.bf16.msra.mxu1 %v6723_v25  ;;  %v6888_v18 = vpack.c.bf16 %v209_v14, %v208_v13 }
  0x7c   :  { %5552 = vmatprep.subr.bf16.mxu1 %v6733_v28 }
  0x7d   :  { %5582 = vmatpush3.bf16.msra.mxu0 %v6868_v11  ;;  %8509 = vst [vmem:[#allocation34_spill] sm:$0xff] %v6888_v18 }
  0x7e   :  { %5584 = vmatprep.subr.bf16.mxu0 %v6871_v12 }
  0x7f   :  { %5554 = vmatpush3.bf16.msra.mxu1 %v6733_v28 }
  0x80   :  { %5556 = vmatprep.subr.bf16.mxu1 %v6743_v31 }
  0x81   :  { %5586 = vmatpush3.bf16.msra.mxu0 %v6888_v18 }
  0x82   :  { %5588 = vmatprep.subr.bf16.mxu0 %v6891_v20 }
  0x83   :  { %5558 = vmatpush3.bf16.msra.mxu1 %v6743_v31 }
  0x84   :  { %5560 = vmatprep.subr.bf16.mxu1 %v6754_v34 }
  0x85   :  { %5590 = vmatpush3.bf16.msra.mxu0 %v6906_v27 }
  0x86   :  { %5592 = vmatprep.subr.bf16.mxu0 %v6909_v29 }
  0x87   :  { %5562 = vmatpush3.bf16.msra.mxu1 %v6754_v34 }
  0x88   :  { %5564 = vmatprep.subr.bf16.mxu1 %v6764_v37 }
  0x89   :  { %5594 = vmatpush3.bf16.msra.mxu0 %v6918_v33 }
  0x8b   :  { %5566 = vmatpush3.bf16.msra.mxu1 %v6764_v37 }
 0x141   :  { %v6766_v38 = vpop.f32.mrb[0].mxu1 }
 0x142   :  { %v6768_v39 = vpop.f32.mrb[1].mxu1 }
 0x145   :  { %v6772_v40 = vpop.f32.mrb[2].mxu1 }
 0x146   :  { %v6774_v41 = vpop.f32.mrb[3].mxu1 }
 0x149   :  { %v4813_v42 = vpop.f32.mrb[4].mxu1 }
 0x14a   :  { %v396_v43 = vpop.f32.mrb[5].mxu1 }
 0x14b   :  { %415 = vrot.lane.b32.xlu0 %v396_v43, %s6490_s21 }
 0x14d   :  { %v4816_v50 = vpop.f32.mrb[6].mxu1 }
 0x14e   :  { %v406_v55 = vpop.f32.mrb[7].mxu1 }
 0x14f   :  { %417 = vrot.lane.b32.xlu0 %v4813_v42, %s6490_s21  ;;  %419 = vrot.lane.b32.xlu1 %v406_v55, %s6490_s21  ;;  %v231_v55 = vld [vmem:[%s8401_s6 + $0xf8] sm:$0xff] }
 0x153   :  { %421 = vrot.lane.b32.xlu1 %v4816_v50, %s6490_s21  ;;  %277 = vrot.lane.b32.xlu0 %v6816_v59, %s6490_s21 }
 0x157   :  { %279 = vrot.lane.b32.xlu1 %v6839_v2, %s6490_s21  ;;  %281 = vrot.lane.b32.xlu0 %v6841_v3, %s6490_s21 }
 0x15b   :  { %283 = vrot.lane.b32.xlu1 %v6865_v10, %s6490_s21 }
 0x1bd   :  { %v416_v36 = vpop.permute.xlu0 %415 }
 0x1be   :  { %v429_v42 = vmul.f32 %v4014_v35, %v416_v36  ;;  %v249_v36 = vld [vmem:[%s8404_s9 + $0x28] sm:$0xff] }
 0x1c0   :  { %v433_v43 = vadd.f32 %v429_v42, %v6768_v39  ;;  %v230_v39 = vld [vmem:[%s8401_s6 + $0xf0] sm:$0xff] }
 0x1c1   :  { %v418_v44 = vpop.permute.xlu0 %417  ;;  %v420_v45 = vpop.permute.xlu1 %419  ;;  %v6935_v57 = vpack.c.bf16 %v231_v55, %v230_v39  ;;  %v257_v39 = vld [vmem:[%s8404_s9 + $0x68] sm:$0xff] }
 0x1c2   :  { %v430_v47 = vmul.f32 %v4014_v35, %v418_v44  ;;  %v431_v48 = vmul.f32 %v4014_v35, %v420_v45  ;;  %4849 = vmatprep.mubr.f32.mxu1 %v433_v43  ;;  %v250_v43 = vld [vmem:[%s8404_s9 + $0x30] sm:$0xff]  ;;  %v251_v44 = vld [vmem:[%s8404_s9 + $0x38] sm:$0xff] }
 0x1c3   :  { %8514 = vst [vmem:[#allocation39_spill] sm:$0xff] %v6935_v57  ;;  %5596 = vmatprep.subr.bf16.mxu0 %v6935_v57  ;;  %v7002_v45 = vpack.c.bf16 %v251_v44, %v250_v43 }
 0x1c4   :  { %v434_v49 = vadd.f32 %v6766_v38, %v430_v47  ;;  %v435_v50 = vadd.f32 %v431_v48, %v6774_v41  ;;  %v214_v38 = vld [vmem:[%s8401_s6 + $0x70] sm:$0xff]  ;;  %v215_v41 = vld [vmem:[%s8401_s6 + $0x78] sm:$0xff]  ;;  %v252_v47 = vld [vmem:[%s8404_s9 + $0x40] sm:$0xff] }
 0x1c5   :  { %v422_v52 = vpop.permute.xlu1 %421  ;;  %v6947_v58 = vpop.permute.xlu0 %277  ;;  %8519 = vst [vmem:[#allocation44_spill] sm:$0xff] %v7002_v45  ;;  %v253_v48 = vld [vmem:[%s8404_s9 + $0x48] sm:$0xff] }
 0x1c6   :  { %v432_v53 = vmul.f32 %v4014_v35, %v422_v52  ;;  %4850 = vmatmul.mubr.f32.vlgmr.msra.gmra.mrb[8].mxu1 %v434_v49  ;;  %v248_v35 = vld [vmem:[%s8404_s9 + $0x20] sm:$0xff]  ;;  %v7012_v49 = vpack.c.bf16 %v253_v48, %v252_v47  ;;  %v255_v52 = vld [vmem:[%s8404_s9 + $0x58] sm:$0xff] }
 0x1c7   :  { %4852 = vmatprep.mubr.f32.mxu1 %v435_v50  ;;  %v6992_v42 = vpack.c.bf16 %v249_v36, %v248_v35  ;;  %v254_v50 = vld [vmem:[%s8404_s9 + $0x50] sm:$0xff]  ;;  %v243_v36 = vld [vmem:[#allocation9 + $0x18] sm:$0xff] }
 0x1c8   :  { %v436_v54 = vadd.f32 %v6772_v40, %v432_v53  ;;  %v6943_v40 = vpack.c.bf16 %v215_v41, %v214_v38  ;;  %8520 = vst [vmem:[#allocation45_spill] sm:$0xff] %v7012_v49  ;;  %v7022_v53 = vpack.c.bf16 %v255_v52, %v254_v50  ;;  %v258_v38 = vld [vmem:[%s8404_s9 + $0x70] sm:$0xff]  ;;  %v259_v41 = vld [vmem:[%s8404_s9 + $0x78] sm:$0xff] }
 0x1c9   :  { %v6949_v63 = vpop.permute.xlu1 %279  ;;  %v6954_v9 = vpop.permute.xlu0 %281  ;;  %8518 = vst [vmem:[#allocation43_spill] sm:$0xff] %v6992_v42  ;;  %v242_v35 = vld [vmem:[#allocation9 + $0x10] sm:$0xff] }
 0x1ca   :  { %4853 = vmatmul.mubr.f32.gmra.mrb[10].mxu1 %v436_v54  ;;  %8515 = vst [vmem:[#allocation40_spill] sm:$0xff] %v6943_v40  ;;  %5598 = vmatpush3.bf16.msra.mxu0 %v6943_v40  ;;  %8521 = vst [vmem:[#allocation46_spill] sm:$0xff] %v7022_v53  ;;  %v256_v54 = vld [vmem:[%s8404_s9 + $0x60] sm:$0xff] }
 0x1cb   :  { %4863 = vmatprep.mubr.msk.f32.mxu1 %vm285_vm0, %v6963_v24  ;;  %v7032_v55 = vpack.c.bf16 %v257_v39, %v256_v54 }
 0x1cd   :  { %v6958_v16 = vpop.permute.xlu1 %283  ;;  %8522 = vst [vmem:[#allocation47_spill] sm:$0xff] %v7032_v55 }
 0x299   :  { %v4851_v62 = vpop.f32.mrb[8].mxu1 }
 0x29a   :  { %v503_v0 = vpop.f32.mrb[9].mxu1  ;;  %v527_v7 = vmul.f32 %v4851_v62, %v6949_v63  ;;  %v523_v14 = vmul.f32 %v4851_v62, %v6839_v2  ;;  %v244_v2 = vld [vmem:[%s8404_s9] sm:$0xff]  ;;  %v7042_v62 = vpack.c.bf16 %v259_v41, %v258_v38 }
 0x29b   :  { %v522_v1 = vmul.f32 %v503_v0, %v6816_v59  ;;  %v526_v6 = vmul.f32 %v503_v0, %v6947_v58 }
 0x29c   :  { %8523 = vst [vmem:[#allocation48_spill] sm:$0xff] %v7042_v62 }
 0x29d   :  { %v4854_v8 = vpop.f32.mrb[10].mxu1  ;;  %594 = vmatprep.mubr.f32.mxu0 %v526_v6 }
 0x29e   :  { %v513_v13 = vpop.f32.mrb[11].mxu1  ;;  %595 = vmatmul.mubr.f32.vlgmr.msra.gmra.mrb[0].mxu0 %v522_v1  ;;  %v529_v21 = vmul.f32 %v4854_v8, %v6958_v16  ;;  %v525_v23 = vmul.f32 %v4854_v8, %v6865_v10  ;;  %v247_v10 = vld [vmem:[%s8404_s9 + $0x18] sm:$0xff] }
 0x29f   :  { %599 = vmatprep.mubr.f32.mxu0 %v527_v7  ;;  %v528_v15 = vmul.f32 %v513_v13, %v6954_v9  ;;  %v524_v59 = vmul.f32 %v513_v13, %v6841_v3  ;;  %v245_v3 = vld [vmem:[%s8404_s9 + $0x8] sm:$0xff]  ;;  %v6981_v32 = vpack.c.bf16 %v247_v10, %v246_v26 }
 0x2a0   :  { %v6976_v30 = vpack.c.bf16 %v245_v3, %v244_v2  ;;  %v241_v10 = vld [vmem:[#allocation9 + $0x8] sm:$0xff] }
 0x2a1   :  { %8517 = vst [vmem:[#allocation42_spill] sm:$0xff] %v6981_v32 }
 0x2a2   :  { %600 = vmatmul.mubr.f32.gmra.mrb[2].mxu0 %v523_v14  ;;  %8516 = vst [vmem:[#allocation41_spill] sm:$0xff] %v6976_v30  ;;  %5608 = vmatprep.subr.bf16.mxu0 %v6976_v30 }
 0x2a3   :  { %604 = vmatprep.mubr.f32.mxu0 %v528_v15  ;;  %5610 = vmatpush3.bf16.msra.mxu0 %v6976_v30 }
 0x2a4   :  { %5612 = vmatprep.subr.bf16.mxu0 %v6981_v32 }
 0x2a6   :  { %605 = vmatmul.mubr.f32.gmra.mrb[4].mxu0 %v524_v59 }
 0x2a7   :  { %609 = vmatprep.mubr.f32.mxu0 %v529_v21  ;;  %5614 = vmatpush3.bf16.msra.mxu0 %v6981_v32 }
 0x2a8   :  { %5616 = vmatprep.subr.bf16.mxu0 %v6992_v42 }
 0x2aa   :  { %610 = vmatmul.mubr.f32.gmra.mrb[6].mxu0 %v525_v23 }
 0x2ab   :  { %5618 = vmatpush3.bf16.msra.mxu0 %v6992_v42 }
 0x2ac   :  { %5620 = vmatprep.subr.bf16.mxu0 %v7002_v45 }
 0x2af   :  { %5622 = vmatpush3.bf16.msra.mxu0 %v7002_v45 }
 0x2b0   :  { %5624 = vmatprep.subr.bf16.mxu0 %v7012_v49 }
 0x2b3   :  { %5626 = vmatpush3.bf16.msra.mxu0 %v7012_v49 }
 0x2b4   :  { %5628 = vmatprep.subr.bf16.mxu0 %v7022_v53 }
 0x2b7   :  { %5630 = vmatpush3.bf16.msra.mxu0 %v7022_v53 }
 0x2b8   :  { %5632 = vmatprep.subr.bf16.mxu0 %v7032_v55 }
 0x2bb   :  { %5634 = vmatpush3.bf16.msra.mxu0 %v7032_v55 }
 0x2bc   :  { %5636 = vmatprep.subr.bf16.mxu0 %v7042_v62 }
 0x2bf   :  { %5638 = vmatpush3.bf16.msra.mxu0 %v7042_v62 }
 0x371   :  { %v4241_v0 = vpop.f32.mrb[0].mxu0 }
 0x372   :  { %v4242_v1 = vpop.f32.mrb[1].mxu0 }
 0x373   :  { %v4243_v6 = vadd.f32 %v4242_v1, %v4241_v0 }
 0x375   :  { %v4244_v7 = vpop.f32.mrb[2].mxu0 }
 0x376   :  { %v4245_v8 = vpop.f32.mrb[3].mxu0 }
 0x377   :  { %v4246_v13 = vadd.f32 %v4245_v8, %v4244_v7 }
 0x379   :  { %v5599_v14 = vpack.c.bf16 %v4246_v13, %v4243_v6  ;;  %v4247_v15 = vpop.f32.mrb[4].mxu0 }
 0x37a   :  { %v4248_v59 = vpop.f32.mrb[5].mxu0 }
 0x37b   :  { %v4249_v21 = vadd.f32 %v4248_v59, %v4247_v15  ;;  %5600 = vmatprep.subr.bf16.mxu1 %v5599_v14 }
 0x37c   :  { %5602 = vmatpush3.bf16.msra.mxu1 %v5599_v14  ;;  %v3991_v14 = vld [vmem:[%s8404_s9 + $0x88] sm:$0xff] }
 0x37d   :  { %v4250_v23 = vpop.f32.mrb[6].mxu0 }
 0x37e   :  { %v4251_v2 = vpop.f32.mrb[7].mxu0 }
 0x37f   :  { %v4252_v3 = vadd.f32 %v4251_v2, %v4250_v23  ;;  %v3992_v23 = vld [vmem:[%s8404_s9 + $0x90] sm:$0xff]  ;;  %v3993_v2 = vld [vmem:[%s8404_s9 + $0x98] sm:$0xff] }
 0x381   :  { %v5603_v26 = vpack.c.bf16 %v4252_v3, %v4249_v21 }
 0x383   :  { %5604 = vmatprep.subr.bf16.mxu1 %v5603_v26 }
 0x384   :  { %5606 = vmatpush3.bf16.msra.mxu1 %v5603_v26  ;;  %v3994_v26 = vld [vmem:[%s8404_s9 + $0xa0] sm:$0xff] }
 0x387   :  { %4864 = vmatmul.mubr.msk.f32.vlgmr.msra.gmra.mrb[12].mxu1 %vm285_vm0, %v241_v10 }
 0x388   :  { %4866 = vmatprep.mubr.msk.f32.mxu1 %vm285_vm0, %v242_v35 }
 0x38b   :  { %4867 = vmatmul.mubr.msk.f32.gmra.mrb[14].mxu1 %vm285_vm0, %v243_v36 }
 0x38c   :  { %4915 = vmatprep.mubr.msk.f32.mxu1 %vm285_vm0, %v6963_v24 }
 0x45a   :  { %v4865_v43 = vpop.f32.mrb[12].mxu1 }
 0x45b   :  { %v693_v44 = vpop.f32.mrb[13].mxu1 }
 0x45c   :  { %4901 = vmatprep.mubr.f32.mxu0 %v693_v44 }
 0x45d   :  { %4902 = vmatmul.mubr.f32.vlgmr.msra.gmra.mrb[8].mxu0 %v4865_v43  ;;  %v3995_v43 = vld [vmem:[%s8404_s9 + $0xa8] sm:$0xff] }
 0x45e   :  { %v4868_v47 = vpop.f32.mrb[14].mxu1  ;;  %v7107_v44 = vpack.c.bf16 %v3995_v43, %v3994_v26 }
 0x45f   :  { %v703_v48 = vpop.f32.mrb[15].mxu1 }
 0x460   :  { %4904 = vmatprep.mubr.f32.mxu0 %v703_v48  ;;  %8526 = vst [vmem:[#allocation51_spill] sm:$0xff] %v7107_v44  ;;  %v3997_v48 = vld [vmem:[%s8404_s9 + $0xb8] sm:$0xff] }
 0x461   :  { %4905 = vmatmul.mubr.f32.gmra.mrb[10].mxu0 %v4868_v47  ;;  %v3996_v47 = vld [vmem:[%s8404_s9 + $0xb0] sm:$0xff] }
 0x530   :  { %v7052_v50 = vpop.f32.mrb[8].mxu0 }
 0x531   :  { %v7055_v52 = vsub.f32 %v4246_v13, %v7052_v50  ;;  %v7057_v54 = vpop.f32.mrb[9].mxu0  ;;  %v3990_v13 = vld [vmem:[%s8404_s9 + $0x80] sm:$0xff] }
 0x532   :  { %v7060_v39 = vsub.f32 %v4243_v6, %v7057_v54 }
 0x533   :  { %v802_v24 = vmul.f32 %v7055_v52, %v7055_v52 }
 0x534   :  { %v801_v38 = vmul.f32 %v7060_v39, %v7060_v39  ;;  %v7066_v41 = vpop.f32.mrb[10].mxu0 }
 0x535   :  { %v7069_v0 = vsub.f32 %v4252_v3, %v7066_v41  ;;  %v7071_v1 = vpop.f32.mrb[11].mxu0  ;;  %v7095_v3 = vpack.c.bf16 %v3993_v2, %v3992_v23  ;;  %v4005_v23 = vld [vmem:[%s8404_s9 + $0xf8] sm:$0xff] }
 0x536   :  { %v7074_v7 = vsub.f32 %v4249_v21, %v7071_v1  ;;  %v5639_v8 = vpack.c.bf16 %v802_v24, %v801_v38  ;;  %v7086_v21 = vpack.c.bf16 %v3991_v14, %v3990_v13  ;;  %v3999_v24 = vld [vmem:[%s8404_s9 + $0xc8] sm:$0xff]  ;;  %v4002_v13 = vld [vmem:[%s8404_s9 + $0xe0] sm:$0xff] }
 0x537   :  { %v804_v6 = vmul.f32 %v7069_v0, %v7069_v0  ;;  %8525 = vst [vmem:[#allocation50_spill] sm:$0xff] %v7095_v3  ;;  %v4003_v14 = vld [vmem:[%s8404_s9 + $0xe8] sm:$0xff] }
 0x538   :  { %v803_v15 = vmul.f32 %v7074_v7, %v7074_v7  ;;  %5640 = vmatprep.subr.bf16.mxu1 %v5639_v8  ;;  %8524 = vst [vmem:[#allocation49_spill] sm:$0xff] %v7086_v21 }
 0x539   :  { %5642 = vmatpush3.bf16.msra.mxu1 %v5639_v8  ;;  %v4001_v8 = vld [vmem:[%s8404_s9 + $0xd8] sm:$0xff] }
 0x53a   :  { %v5643_v59 = vpack.c.bf16 %v804_v6, %v803_v15  ;;  %v7148_v15 = vpack.c.bf16 %v4003_v14, %v4002_v13 }
 0x53c   :  { %5644 = vmatprep.subr.bf16.mxu1 %v5643_v59  ;;  %8530 = vst [vmem:[#allocation55_spill] sm:$0xff] %v7148_v15 }
 0x53d   :  { %5646 = vmatpush3.bf16.msra.mxu1 %v5643_v59  ;;  %v4004_v59 = vld [vmem:[%s8404_s9 + $0xf0] sm:$0xff] }
 0x53e   :  { %5648 = vmatprep.subr.bf16.mxu1 %v7086_v21  ;;  %v7158_v2 = vpack.c.bf16 %v4005_v23, %v4004_v59 }
 0x540   :  { %4916 = vmatmul.mubr.msk.f32.vlgmr.msra.gmra.mrb[16].mxu1 %vm285_vm0, %v241_v10  ;;  %v7118_v10 = vpack.c.bf16 %v3997_v48, %v3996_v47  ;;  %8531 = vst [vmem:[#allocation56_spill] sm:$0xff] %v7158_v2 }
 0x541   :  { %4918 = vmatprep.mubr.msk.f32.mxu1 %vm285_vm0, %v242_v35  ;;  %5650 = vmatpush3.bf16.msra.mxu1 %v7086_v21  ;;  %v3998_v35 = vld [vmem:[%s8404_s9 + $0xc0] sm:$0xff] }
 0x542   :  { %5652 = vmatprep.subr.bf16.mxu1 %v7095_v3  ;;  %8527 = vst [vmem:[#allocation52_spill] sm:$0xff] %v7118_v10  ;;  %v7128_v38 = vpack.c.bf16 %v3999_v24, %v3998_v35  ;;  %v3966_v35 = vld [vmem:[%s8399_s4 + $0x80] sm:$0xff] }
 0x543   :  { %4967 = vmatprep.mubr.msk.f32.mxu0 %vm285_vm0, %v3966_v35 }
 0x544   :  { %4919 = vmatmul.mubr.msk.f32.gmra.mrb[18].mxu1 %vm285_vm0, %v243_v36  ;;  %8528 = vst [vmem:[#allocation53_spill] sm:$0xff] %v7128_v38  ;;  %v4000_v36 = vld [vmem:[%s8404_s9 + $0xd0] sm:$0xff] }
 0x545   :  { %5654 = vmatpush3.bf16.msra.mxu1 %v7095_v3  ;;  %v7138_v6 = vpack.c.bf16 %v4001_v8, %v4000_v36 }
 0x546   :  { %5656 = vmatprep.subr.bf16.mxu1 %v7107_v44 }
 0x547   :  { %8529 = vst [vmem:[#allocation54_spill] sm:$0xff] %v7138_v6 }
 0x549   :  { %5658 = vmatpush3.bf16.msra.mxu1 %v7107_v44 }
 0x54a   :  { %5660 = vmatprep.subr.bf16.mxu1 %v7118_v10 }
 0x54d   :  { %5662 = vmatpush3.bf16.msra.mxu1 %v7118_v10 }
 0x54e   :  { %5664 = vmatprep.subr.bf16.mxu1 %v7128_v38 }
 0x551   :  { %5666 = vmatpush3.bf16.msra.mxu1 %v7128_v38 }
 0x552   :  { %5668 = vmatprep.subr.bf16.mxu1 %v7138_v6 }
 0x555   :  { %5670 = vmatpush3.bf16.msra.mxu1 %v7138_v6 }
 0x556   :  { %5672 = vmatprep.subr.bf16.mxu1 %v7148_v15 }
 0x559   :  { %5674 = vmatpush3.bf16.msra.mxu1 %v7148_v15 }
 0x55a   :  { %5676 = vmatprep.subr.bf16.mxu1 %v7158_v2 }
 0x55d   :  { %5678 = vmatpush3.bf16.msra.mxu1 %v7158_v2 }
 0x613   :  { %v4917_v26 = vpop.f32.mrb[16].mxu1 }
 0x614   :  { %v871_v43 = vpop.f32.mrb[17].mxu1 }
 0x615   :  { %4953 = vmatprep.mubr.f32.mxu1 %v871_v43 }
 0x616   :  { %4954 = vmatmul.mubr.f32.vlgmr.msra.gmra.mrb[20].mxu1 %v4917_v26 }
 0x617   :  { %v4920_v47 = vpop.f32.mrb[18].mxu1 }
 0x618   :  { %v881_v48 = vpop.f32.mrb[19].mxu1 }
 0x619   :  { %4956 = vmatprep.mubr.f32.mxu1 %v881_v48 }
 0x61a   :  { %4957 = vmatmul.mubr.f32.gmra.mrb[22].mxu1 %v4920_v47 }
 0x61b   :  { %5025 = vmatprep.mubr.msk.f32.mxu1 %vm285_vm0, %v3966_v35 }
 0x6e9   :  { %v4955_v24 = vpop.f32.mrb[20].mxu1 }
 0x6ea   :  { %6234 = vrsqrt.f32 %v4955_v24  ;;  %v956_v36 = vpop.f32.mrb[21].mxu1  ;;  %vm984_vm1 = vcmp.eq.f32.partialorder %v4955_v24, inf  ;;  %v987_v26 = vand.u32 2147483648, %v4955_v24  ;;  %vm986_vm2 = vcmp.eq.f32.partialorder %v4955_v24, 0.0 }
 0x6eb   :  { %6236 = vrsqrt.f32 %v956_v36  ;;  %vm977_vm3 = vcmp.eq.f32.partialorder %v956_v36, inf  ;;  %v980_v48 = vand.u32 2147483648, %v956_v36  ;;  %vm979_vm4 = vcmp.eq.f32.partialorder %v956_v36, 0.0 }
 0x6ed   :  { %v4958_v8 = vpop.f32.mrb[22].mxu1 }
 0x6ee   :  { %6238 = vrsqrt.f32 %v4958_v8  ;;  %v966_v13 = vpop.f32.mrb[23].mxu1  ;;  %vm998_vm5 = vcmp.eq.f32.partialorder %v4958_v8, inf  ;;  %vm1000_vm6 = vcmp.eq.f32.partialorder %v4958_v8, 0.0 }
 0x6ef   :  { %6240 = vrsqrt.f32 %v966_v13  ;;  %vm991_vm7 = vcmp.eq.f32.partialorder %v966_v13, inf  ;;  %vm993_vm8 = vcmp.eq.f32.partialorder %v966_v13, 0.0 }
 0x6f4   :  { %v6235_v14 = vpop.eup %6234 }
 0x6f5   :  { %v6237_v59 = vpop.eup %6236  ;;  %v983_v23 = vmul.f32 %v6235_v14, %v4955_v24  ;;  %v1001_v14 = vand.u32 2147483648, %v4958_v8 }
 0x6f6   :  { %v976_v43 = vmul.f32 %v6237_v59, %v956_v36  ;;  %v994_v59 = vand.u32 2147483648, %v966_v13 }
 0x6f7   :  { %v985_v47 = vsel %vm984_vm1, %v4955_v24, %v983_v23 }
 0x6f8   :  { %v6239_v2 = vpop.eup %6238  ;;  %v988_v35 = vsel %vm986_vm2, %v987_v26, %v985_v47  ;;  %v978_v15 = vsel %vm977_vm3, %v956_v36, %v976_v43 }
 0x6f9   :  { %v6241_v6 = vpop.eup %6240  ;;  %v7168_v38 = vadd.f32 1e-06, %v988_v35  ;;  %v981_v10 = vsel %vm979_vm4, %v980_v48, %v978_v15  ;;  %v997_v44 = vmul.f32 %v6239_v2, %v4958_v8  ;;  %v1182_v48 = vld [vmem:[%s8405_s10] sm:$0xff] }
 0x6fa   :  { %v7170_v3 = vadd.f32 1e-06, %v981_v10  ;;  %v990_v21 = vmul.f32 %v6241_v6, %v966_v13 }
 0x6fb   :  { %6242 = vrcp.f32 %v7168_v38  ;;  %v999_v24 = vsel %vm998_vm5, %v4958_v8, %v997_v44 }
 0x6fc   :  { %6244 = vrcp.f32 %v7170_v3  ;;  %v1002_v23 = vsel %vm1000_vm6, %v1001_v14, %v999_v24  ;;  %v992_v36 = vsel %vm991_vm7, %v966_v13, %v990_v21  ;;  %v1185_v24 = vld [vmem:[%s8405_s10 + $0x18] sm:$0xff] }
 0x6fd   :  { %v7174_v26 = vadd.f32 1e-06, %v1002_v23  ;;  %v995_v15 = vsel %vm993_vm8, %v994_v59, %v992_v36  ;;  %v7216_v59 = vld [vmem:[%s8399_s4 + $0x90] sm:$0xff]  ;;  %v1186_v36 = vld [vmem:[%s8405_s10 + $0x20] sm:$0xff] }
 0x6fe   :  { %v7176_v2 = vadd.f32 1e-06, %v995_v15  ;;  %v1187_v15 = vld [vmem:[%s8405_s10 + $0x28] sm:$0xff] }
 0x6ff   :  { %6246 = vrcp.f32 %v7174_v26 }
 0x700   :  { %6248 = vrcp.f32 %v7176_v2 }
 0x705   :  { %v6243_v10 = vpop.eup %6242 }
 0x706   :  { %v6245_v6 = vpop.eup %6244  ;;  %v7181_v44 = vmul.f32 %v6243_v10, %v7055_v52  ;;  %v1183_v52 = vld [vmem:[%s8405_s10 + $0x8] sm:$0xff]  ;;  %v7231_v10 = vld [vmem:[%s8399_s4 + $0x98] sm:$0xff] }
 0x707   :  { %v7184_v8 = vmul.f32 %v6245_v6, %v7060_v39  ;;  %v5687_v14 = vpack.c.bf16 %v1183_v52, %v1182_v48  ;;  %v7236_v6 = vld [vmem:[%s8399_s4 + $0xa0] sm:$0xff]  ;;  %v7251_v48 = vld [vmem:[%s8399_s4 + $0xa8] sm:$0xff]  ;;  %v7256_v52 = vld [vmem:[%s8399_s4 + $0xb0] sm:$0xff] }
 0x709   :  { %v6247_v43 = vpop.eup %6246  ;;  %v5679_v21 = vpack.c.bf16 %v7181_v44, %v7184_v8 }
 0x70a   :  { %v6249_v13 = vpop.eup %6248  ;;  %v7189_v47 = vmul.f32 %v6247_v43, %v7069_v0  ;;  %v1184_v0 = vld [vmem:[%s8405_s10 + $0x10] sm:$0xff]  ;;  %v5695_v43 = vpack.c.bf16 %v1187_v15, %v1186_v36  ;;  %v1193_v15 = vld [vmem:[%s8405_s10 + $0x58] sm:$0xff] }
 0x70b   :  { %5680 = vmatprep.subr.bf16.mxu0 %v5679_v21  ;;  %v7198_v39 = vmul.f32 %v6249_v13, %v7074_v7  ;;  %v7211_v7 = vld [vmem:[%s8399_s4 + $0x88] sm:$0xff]  ;;  %v5691_v23 = vpack.c.bf16 %v1185_v24, %v1184_v0  ;;  %v1189_v13 = vld [vmem:[%s8405_s10 + $0x38] sm:$0xff]  ;;  %v1190_v0 = vld [vmem:[%s8405_s10 + $0x40] sm:$0xff] }
 0x70c   :  { %5682 = vmatpush3.bf16.msra.mxu0 %v5679_v21  ;;  %v1188_v21 = vld [vmem:[%s8405_s10 + $0x30] sm:$0xff]  ;;  %v1191_v24 = vld [vmem:[%s8405_s10 + $0x48] sm:$0xff] }
 0x70d   :  { %v5683_v35 = vpack.c.bf16 %v7189_v47, %v7198_v39  ;;  %v1192_v36 = vld [vmem:[%s8405_s10 + $0x50] sm:$0xff] }
 0x70f   :  { %5684 = vmatprep.subr.bf16.mxu0 %v5683_v35 }
 0x710   :  { %5686 = vmatpush3.bf16.msra.mxu0 %v5683_v35  ;;  %v5699_v35 = vpack.c.bf16 %v1189_v13, %v1188_v21  ;;  %v1194_v21 = vld [vmem:[%s8405_s10 + $0x60] sm:$0xff]  ;;  %v1195_v13 = vld [vmem:[%s8405_s10 + $0x68] sm:$0xff] }
 0x711   :  { %5688 = vmatprep.subr.bf16.mxu0 %v5687_v14 }
 0x713   :  { %4968 = vmatmul.mubr.msk.f32.vlgmr.msra.gmra.mrb[12].mxu0 %vm285_vm0, %v7211_v7 }
 0x714   :  { %4970 = vmatprep.mubr.msk.f32.mxu0 %vm285_vm0, %v7216_v59  ;;  %5690 = vmatpush3.bf16.msra.mxu0 %v5687_v14  ;;  %v7265_v14 = vld [vmem:[%s8399_s4 + $0xb8] sm:$0xff] }
 0x715   :  { %5692 = vmatprep.subr.bf16.mxu0 %v5691_v23 }
 0x717   :  { %4971 = vmatmul.mubr.msk.f32.gmra.mrb[14].mxu0 %vm285_vm0, %v7231_v10 }
 0x718   :  { %4973 = vmatprep.mubr.msk.f32.mxu0 %vm285_vm0, %v7236_v6  ;;  %5694 = vmatpush3.bf16.msra.mxu0 %v5691_v23  ;;  %v5703_v23 = vpack.c.bf16 %v1191_v24, %v1190_v0  ;;  %v1196_v0 = vld [vmem:[%s8405_s10 + $0x70] sm:$0xff]  ;;  %v1197_v24 = vld [vmem:[%s8405_s10 + $0x78] sm:$0xff] }
 0x719   :  { %5696 = vmatprep.subr.bf16.mxu0 %v5695_v43 }
 0x71b   :  { %4974 = vmatmul.mubr.msk.f32.gmra.mrb[16].mxu0 %vm285_vm0, %v7251_v48 }
 0x71c   :  { %4976 = vmatprep.mubr.msk.f32.mxu0 %vm285_vm0, %v7256_v52  ;;  %5698 = vmatpush3.bf16.msra.mxu0 %v5695_v43  ;;  %v5707_v43 = vpack.c.bf16 %v1193_v15, %v1192_v36 }
 0x71d   :  { %5700 = vmatprep.subr.bf16.mxu0 %v5699_v35 }
 0x71f   :  { %4977 = vmatmul.mubr.msk.f32.gmra.mrb[18].mxu0 %vm285_vm0, %v7265_v14 }
 0x720   :  { %5702 = vmatpush3.bf16.msra.mxu0 %v5699_v35  ;;  %v5711_v35 = vpack.c.bf16 %v1195_v13, %v1194_v21  ;;  %v4031_v21 = vld [vmem:[%s8398_s3 + $0x1] ss:$0 sm:$0xff]  ;;  %v4032_v13 = vld [vmem:[%s8398_s3 + $0x2] ss:$0 sm:$0xff] }
 0x721   :  { %5704 = vmatprep.subr.bf16.mxu0 %v5703_v23  ;;  %v1160_v49 = vmul.f32 %v4032_v13, %v7184_v8  ;;  %v1163_v25 = vmul.f32 %v4032_v13, %v7189_v47  ;;  %v1162_v17 = vmul.f32 %v4032_v13, %v7198_v39  ;;  %v1442_v47 = vld [vmem:[%s8406_s11 + $0x158] sm:$0xff] }
 0x724   :  { %5706 = vmatpush3.bf16.msra.mxu0 %v5703_v23  ;;  %v5715_v23 = vpack.c.bf16 %v1197_v24, %v1196_v0  ;;  %v1161_v24 = vmul.f32 %v4032_v13, %v7181_v44  ;;  %v1445_v13 = vld [vmem:[%s8406_s11 + $0x170] sm:$0xff] }
 0x725   :  { %5708 = vmatprep.subr.bf16.mxu0 %v5707_v43 }
 0x728   :  { %5710 = vmatpush3.bf16.msra.mxu0 %v5707_v43 }
 0x729   :  { %5712 = vmatprep.subr.bf16.mxu0 %v5711_v35 }
 0x72c   :  { %5714 = vmatpush3.bf16.msra.mxu0 %v5711_v35  ;;  %v4033_v35 = vld [vmem:[%s8398_s3 + $0x3] ss:$0 sm:$0xff] }
 0x72d   :  { %5716 = vmatprep.subr.bf16.mxu0 %v5715_v23 }
 0x730   :  { %5718 = vmatpush3.bf16.msra.mxu0 %v5715_v23 }
 0x7e6   :  { %v4969_v36 = vpop.f32.mrb[12].mxu0 }
 0x7e7   :  { %v1105_v15 = vpop.f32.mrb[13].mxu0  ;;  %v1175_v45 = vmul.f32 %v4969_v36, %v4033_v35 }
 0x7e8   :  { %v1174_v32 = vmul.f32 %v4033_v35, %v1105_v15  ;;  %v1443_v15 = vld [vmem:[%s8406_s11 + $0x160] sm:$0xff] }
 0x7ea   :  { %v4972_v43 = vpop.f32.mrb[14].mxu0 }
 0x7eb   :  { %v1115_v62 = vpop.f32.mrb[15].mxu0  ;;  %v1177_v30 = vmul.f32 %v4972_v43, %v4033_v35  ;;  %v1444_v43 = vld [vmem:[%s8406_s11 + $0x168] sm:$0xff] }
 0x7ec   :  { %v1176_v40 = vmul.f32 %v4033_v35, %v1115_v62  ;;  %v1441_v62 = vld [vmem:[%s8406_s11 + $0x150] sm:$0xff]  ;;  %v1446_v35 = vld [vmem:[%s8406_s11 + $0x178] sm:$0xff] }
 0x7ed   :  { %v5779_v39 = vpack.c.bf16 %v1442_v47, %v1441_v62  ;;  %v1418_v62 = vld [vmem:[%s8406_s11 + $0x98] sm:$0xff] }
 0x7ee   :  { %v4975_v55 = vpop.f32.mrb[16].mxu0 }
 0x7ef   :  { %v1151_v0 = vmul.f32 %v4975_v55, %v4031_v21  ;;  %v1125_v23 = vpop.f32.mrb[17].mxu0 }
 0x7f0   :  { %v1150_v53 = vmul.f32 %v4031_v21, %v1125_v23 }
 0x7f1   :  { %v1165_v42 = vadd.f32 %v1161_v24, %v1151_v0  ;;  %v5787_v0 = vpack.c.bf16 %v1446_v35, %v1445_v13  ;;  %v4034_v24 = vld [vmem:[%s8407_s12] ss:$0 sm:$0xff]  ;;  %v1420_v13 = vld [vmem:[%s8406_s11 + $0xa8] sm:$0xff] }
 0x7f2   :  { %v1164_v37 = vadd.f32 %v1160_v49, %v1150_v53  ;;  %v4978_v34 = vpop.f32.mrb[18].mxu0  ;;  %v1440_v49 = vld [vmem:[%s8406_s11 + $0x148] sm:$0xff] }
 0x7f3   :  { %v1179_v31 = vadd.f32 %v1175_v45, %v1165_v42  ;;  %v1153_v28 = vmul.f32 %v4978_v34, %v4031_v21  ;;  %v1135_v22 = vpop.f32.mrb[19].mxu0  ;;  %v1431_v34 = vld [vmem:[%s8406_s11 + $0x100] sm:$0xff] }
 0x7f4   :  { %v1152_v19 = vmul.f32 %v4031_v21, %v1135_v22  ;;  %v1178_v55 = vadd.f32 %v1174_v32, %v1164_v37  ;;  %v1432_v22 = vld [vmem:[%s8406_s11 + $0x108] sm:$0xff]  ;;  %v1438_v32 = vld [vmem:[%s8406_s11 + $0x138] sm:$0xff]  ;;  %v1439_v45 = vld [vmem:[%s8406_s11 + $0x140] sm:$0xff]  ;;  %v5783_v21 = vpack.c.bf16 %v1444_v43, %v1443_v15 }
 0x7f5   :  { %v1167_v44 = vadd.f32 %v1163_v25, %v1153_v28  ;;  %v1433_v25 = vld [vmem:[%s8406_s11 + $0x110] sm:$0xff]  ;;  %v5759_v28 = vpack.c.bf16 %v1432_v22, %v1431_v34  ;;  %v1436_v37 = vld [vmem:[%s8406_s11 + $0x128] sm:$0xff]  ;;  %v5775_v53 = vpack.c.bf16 %v1440_v49, %v1439_v45  ;;  %v1399_v45 = vld [vmem:[%s8406_s11] sm:$0xff] }
 0x7f6   :  { %v1166_v23 = vadd.f32 %v1162_v17, %v1152_v19  ;;  %5011 = vmatprep.mubr.f32.mxu0 %v1178_v55  ;;  %v1434_v17 = vld [vmem:[%s8406_s11 + $0x118] sm:$0xff]  ;;  %v1400_v49 = vld [vmem:[%s8406_s11 + $0x8] sm:$0xff]  ;;  %v1401_v15 = vld [vmem:[%s8406_s11 + $0x10] sm:$0xff] }
 0x7f7   :  { %5012 = vmatmul.mubr.f32.vlgmr.msra.gmra.mrb[20].mxu0 %v1179_v31  ;;  %v1181_v8 = vadd.f32 %v1177_v30, %v1167_v44  ;;  %v5763_v19 = vpack.c.bf16 %v1434_v17, %v1433_v25  ;;  %v1435_v31 = vld [vmem:[%s8406_s11 + $0x120] sm:$0xff]  ;;  %5760 = vmatprep.subr.bf16.mxu0 %v5759_v28  ;;  %v1437_v30 = vld [vmem:[%s8406_s11 + $0x130] sm:$0xff]  ;;  %v5729_v47 = vpack.c.bf16 %v1400_v49, %v1399_v45  ;;  %v1402_v43 = vld [vmem:[%s8406_s11 + $0x18] sm:$0xff] }
 0x7f8   :  { %v1180_v36 = vadd.f32 %v1176_v40, %v1166_v23  ;;  %5762 = vmatpush3.bf16.msra.mxu0 %v5759_v28  ;;  %v5767_v40 = vpack.c.bf16 %v1436_v37, %v1435_v31  ;;  %v5771_v42 = vpack.c.bf16 %v1438_v32, %v1437_v30  ;;  %v1415_v37 = vld [vmem:[%s8406_s11 + $0x80] sm:$0xff]  ;;  %v5733_v35 = vpack.c.bf16 %v1402_v43, %v1401_v15  ;;  %v1409_v49 = vld [vmem:[%s8406_s11 + $0x50] sm:$0xff]  ;;  %v1412_v15 = vld [vmem:[%s8406_s11 + $0x68] sm:$0xff] }
 0x7f9   :  { %5764 = vmatprep.subr.bf16.mxu0 %v5763_v19 }
 0x7fa   :  { %5014 = vmatprep.mubr.f32.mxu0 %v1180_v36 }
 0x7fb   :  { %5015 = vmatmul.mubr.f32.gmra.mrb[22].mxu0 %v1181_v8 }
 0x7fc   :  { %5766 = vmatpush3.bf16.msra.mxu0 %v5763_v19 }
 0x7fd   :  { %5768 = vmatprep.subr.bf16.mxu0 %v5767_v40 }
 0x800   :  { %5770 = vmatpush3.bf16.msra.mxu0 %v5767_v40  ;;  %v1416_v40 = vld [vmem:[%s8406_s11 + $0x88] sm:$0xff] }
 0x801   :  { %5772 = vmatprep.subr.bf16.mxu0 %v5771_v42 }
 0x804   :  { %5774 = vmatpush3.bf16.msra.mxu0 %v5771_v42  ;;  %v5727_v42 = vpack.c.bf16 %v1416_v40, %v1415_v37  ;;  %v1407_v40 = vld [vmem:[%s8406_s11 + $0x40] sm:$0xff] }
 0x805   :  { %5776 = vmatprep.subr.bf16.mxu0 %v5775_v53 }
 0x808   :  { %5778 = vmatpush3.bf16.msra.mxu0 %v5775_v53  ;;  %v1417_v53 = vld [vmem:[%s8406_s11 + $0x90] sm:$0xff] }
 0x809   :  { %5780 = vmatprep.subr.bf16.mxu0 %v5779_v39 }
 0x80c   :  { %5782 = vmatpush3.bf16.msra.mxu0 %v5779_v39  ;;  %v5731_v39 = vpack.c.bf16 %v1418_v62, %v1417_v53  ;;  %v1410_v53 = vld [vmem:[%s8406_s11 + $0x58] sm:$0xff] }
 0x80d   :  { %5784 = vmatprep.subr.bf16.mxu0 %v5783_v21  ;;  %v5749_v62 = vpack.c.bf16 %v1410_v53, %v1409_v49 }
 0x810   :  { %5786 = vmatpush3.bf16.msra.mxu0 %v5783_v21  ;;  %v1419_v21 = vld [vmem:[%s8406_s11 + $0xa0] sm:$0xff] }
 0x811   :  { %5788 = vmatprep.subr.bf16.mxu0 %v5787_v0 }
 0x814   :  { %5790 = vmatpush3.bf16.msra.mxu0 %v5787_v0  ;;  %v5735_v0 = vpack.c.bf16 %v1420_v13, %v1419_v21  ;;  %v1429_v21 = vld [vmem:[%s8406_s11 + $0xf0] sm:$0xff]  ;;  %v1430_v13 = vld [vmem:[%s8406_s11 + $0xf8] sm:$0xff] }
 0x8ca   :  { %v5013_v55 = vpop.f32.mrb[20].mxu0 }
 0x8cb   :  { %v7357_v44 = vadd.f32 %v5013_v55, %v4034_v24  ;;  %v1271_v23 = vpop.f32.mrb[21].mxu0  ;;  %v1404_v55 = vld [vmem:[%s8406_s11 + $0x28] sm:$0xff] }
 0x8cc   :  { %v1272_v8 = vadd.f32 %v4034_v24, %v1271_v23  ;;  %v1421_v23 = vld [vmem:[%s8406_s11 + $0xb0] sm:$0xff] }
 0x8cd   :  { %v1291_v36 = vmax.f32 %v7357_v44, 0.0  ;;  %v235_v44 = vld [vmem:[%s8402_s7 + $0x18] sm:$0xff] }
 0x8ce   :  { %v1290_v34 = vmax.f32 %v1272_v8, 0.0  ;;  %v5016_v22 = vpop.f32.mrb[22].mxu0 }
 0x8cf   :  { %v7360_v25 = vadd.f32 %v5016_v22, %v4034_v24  ;;  %v1281_v28 = vpop.f32.mrb[23].mxu0  ;;  %v1405_v22 = vld [vmem:[%s8406_s11 + $0x30] sm:$0xff] }
 0x8d0   :  { %v5719_v17 = vpack.c.bf16 %v1291_v36, %v1290_v34  ;;  %v7364_v19 = vadd.f32 %v4034_v24, %v1281_v28  ;;  %v1403_v24 = vld [vmem:[%s8406_s11 + $0x20] sm:$0xff]  ;;  %v1406_v28 = vld [vmem:[%s8406_s11 + $0x38] sm:$0xff] }
 0x8d1   :  { %v1293_v31 = vmax.f32 %v7360_v25, 0.0  ;;  %v234_v25 = vld [vmem:[%s8402_s7 + $0x10] sm:$0xff] }
 0x8d2   :  { %v1292_v30 = vmax.f32 %v7364_v19, 0.0  ;;  %5720 = vmatprep.subr.bf16.mxu1 %v5719_v17  ;;  %v232_v19 = vld [vmem:[%s8402_s7] sm:$0xff] }
 0x8d3   :  { %5722 = vmatpush3.bf16.msra.mxu1 %v5719_v17  ;;  %v1423_v17 = vld [vmem:[%s8406_s11 + $0xc0] sm:$0xff] }
 0x8d4   :  { %v5723_v32 = vpack.c.bf16 %v1293_v31, %v1292_v30 }
 0x8d6   :  { %5724 = vmatprep.subr.bf16.mxu1 %v5723_v32 }
 0x8d7   :  { %5726 = vmatpush3.bf16.msra.mxu1 %v5723_v32  ;;  %v1408_v32 = vld [vmem:[%s8406_s11 + $0x48] sm:$0xff] }
 0x8d8   :  { %5728 = vmatprep.subr.bf16.mxu1 %v5727_v42  ;;  %v1425_v42 = vld [vmem:[%s8406_s11 + $0xd0] sm:$0xff] }
 0x8da   :  { %5026 = vmatmul.mubr.msk.f32.vlgmr.msra.gmra.mrb[24].mxu1 %vm285_vm0, %v7211_v7  ;;  %v1422_v7 = vld [vmem:[%s8406_s11 + $0xb8] sm:$0xff] }
 0x8db   :  { %5028 = vmatprep.mubr.msk.f32.mxu1 %vm285_vm0, %v7216_v59  ;;  %5730 = vmatpush3.bf16.msra.mxu1 %v5729_v47  ;;  %v5737_v59 = vpack.c.bf16 %v1404_v55, %v1403_v24  ;;  %v5739_v8 = vpack.c.bf16 %v1422_v7, %v1421_v23  ;;  %v1414_v24 = vld [vmem:[%s8406_s11 + $0x78] sm:$0xff] }
 0x8dc   :  { %5732 = vmatprep.subr.bf16.mxu1 %v5731_v39  ;;  %v1411_v39 = vld [vmem:[%s8406_s11 + $0x60] sm:$0xff] }
 0x8dd   :  { %v5753_v43 = vpack.c.bf16 %v1412_v15, %v1411_v39 }
 0x8de   :  { %5029 = vmatmul.mubr.msk.f32.gmra.mrb[26].mxu1 %vm285_vm0, %v7231_v10  ;;  %v1424_v10 = vld [vmem:[%s8406_s11 + $0xc8] sm:$0xff] }
 0x8df   :  { %5031 = vmatprep.mubr.msk.f32.mxu1 %vm285_vm0, %v7236_v6  ;;  %5734 = vmatpush3.bf16.msra.mxu1 %v5733_v35  ;;  %v5741_v6 = vpack.c.bf16 %v1406_v28, %v1405_v22  ;;  %v5743_v37 = vpack.c.bf16 %v1424_v10, %v1423_v17  ;;  %v5755_v35 = vpack.c.bf16 %v1430_v13, %v1429_v21 }
 0x8e0   :  { %5736 = vmatprep.subr.bf16.mxu1 %v5735_v0  ;;  %v1413_v0 = vld [vmem:[%s8406_s11 + $0x70] sm:$0xff] }
 0x8e1   :  { %v5757_v55 = vpack.c.bf16 %v1414_v24, %v1413_v0 }
 0x8e2   :  { %5032 = vmatmul.mubr.msk.f32.gmra.mrb[28].mxu1 %vm285_vm0, %v7251_v48  ;;  %v1426_v48 = vld [vmem:[%s8406_s11 + $0xd8] sm:$0xff] }
 0x8e3   :  { %5034 = vmatprep.mubr.msk.f32.mxu1 %vm285_vm0, %v7256_v52  ;;  %5738 = vmatpush3.bf16.msra.mxu1 %v5737_v59  ;;  %v5745_v52 = vpack.c.bf16 %v1408_v32, %v1407_v40  ;;  %v5747_v45 = vpack.c.bf16 %v1426_v48, %v1425_v42  ;;  %v236_v32 = vld [vmem:[%s8402_s7 + $0x20] sm:$0xff]  ;;  %v238_v42 = vld [vmem:[%s8402_s7 + $0x30] sm:$0xff] }
 0x8e4   :  { %5740 = vmatprep.subr.bf16.mxu1 %v5739_v8  ;;  %v7520_v48 = vpack.c.bf16 %v238_v42, %v236_v32  ;;  %v7548_v42 = vld [vmem:[#allocation6] sm:$0xff] }
 0x8e6   :  { %5035 = vmatmul.mubr.msk.f32.gmra.mrb[30].mxu1 %vm285_vm0, %v7265_v14  ;;  %v1427_v14 = vld [vmem:[%s8406_s11 + $0xe0] sm:$0xff] }
 0x8e7   :  { %1518 = vmatprep.mubr.f32.mxu1 %v1290_v34  ;;  %5742 = vmatpush3.bf16.msra.mxu1 %v5741_v6  ;;  %v1428_v34 = vld [vmem:[%s8406_s11 + $0xe8] sm:$0xff] }
 0x8e8   :  { %5744 = vmatprep.subr.bf16.mxu1 %v5743_v37  ;;  %v5751_v47 = vpack.c.bf16 %v1428_v34, %v1427_v14  ;;  %v233_v6 = vld [vmem:[%s8402_s7 + $0x8] sm:$0xff]  ;;  %v239_v37 = vld [vmem:[%s8402_s7 + $0x38] sm:$0xff]  ;;  %v4043_v34 = vld [vmem:[%s8408_s13] ss:$0 sm:$0xff] }
 0x8eb   :  { %5746 = vmatpush3.bf16.msra.mxu1 %v5745_v52  ;;  %v8464_v52 = vmov 0.0  }
 0x8ec   :  { %5748 = vmatprep.subr.bf16.mxu1 %v5747_v45 }
 0x8ef   :  { %5750 = vmatpush3.bf16.msra.mxu1 %v5749_v62 }
 0x8f0   :  { %5752 = vmatprep.subr.bf16.mxu1 %v5751_v47 }
 0x8f3   :  { %5754 = vmatpush3.bf16.msra.mxu1 %v5753_v43 }
 0x8f4   :  { %5756 = vmatprep.subr.bf16.mxu1 %v5755_v35 }
 0x8f7   :  { %5758 = vmatpush3.bf16.msra.mxu1 %v5757_v55 }
 0x9ad   :  { %v5027_v23 = vpop.f32.mrb[24].mxu1 }
 0x9ae   :  { %v1360_v7 = vpop.f32.mrb[25].mxu1 }
 0x9af   :  { %5069 = vmatprep.mubr.f32.mxu0 %v1360_v7 }
 0x9b0   :  { %5070 = vmatmul.mubr.f32.vlgmr.msra.gmra.mrb[24].mxu0 %v5027_v23 }
 0x9b1   :  { %v5030_v59 = vpop.f32.mrb[26].mxu1 }
 0x9b2   :  { %v1370_v8 = vpop.f32.mrb[27].mxu1 }
 0x9b3   :  { %5072 = vmatprep.mubr.f32.mxu0 %v1370_v8 }
 0x9b4   :  { %5073 = vmatmul.mubr.f32.gmra.mrb[26].mxu0 %v5030_v59 }
 0x9b5   :  { %v5033_v22 = vpop.f32.mrb[28].mxu1 }
 0x9b6   :  { %v1380_v28 = vpop.f32.mrb[29].mxu1 }
 0x9b7   :  { %1519 = vmatmul.mubr.f32.vlgmr.msra.gmra.mrb[32].mxu1 %v1380_v28 }
 0x9b8   :  { %1523 = vmatprep.mubr.f32.mxu1 %v1291_v36  ;;  %v7494_v36 = vpack.c.bf16 %v235_v44, %v233_v6 }
 0x9b9   :  { %v5036_v17 = vpop.f32.mrb[30].mxu1 }
 0x9ba   :  { %v1390_v10 = vpop.f32.mrb[31].mxu1  ;;  %5792 = vmatprep.subr.bf16.mxu1 %v7494_v36 }
 0x9bb   :  { %1524 = vmatmul.mubr.f32.gmra.mrb[34].mxu1 %v5033_v22 }
 0x9bc   :  { %1528 = vmatprep.mubr.f32.mxu1 %v1292_v30  ;;  %v237_v30 = vld [vmem:[%s8402_s7 + $0x28] sm:$0xff] }
 0x9bd   :  { %v7512_v40 = vpack.c.bf16 %v239_v37, %v237_v30 }
 0x9bf   :  { %1529 = vmatmul.mubr.f32.gmra.mrb[36].mxu1 %v1390_v10 }
 0x9c0   :  { %1533 = vmatprep.mubr.f32.mxu1 %v1293_v31  ;;  %v7502_v31 = vpack.c.bf16 %v234_v25, %v232_v19 }
 0x9c2   :  { %5794 = vmatpush1.bf16.msra.mxu1 %v7502_v31 }
 0x9c3   :  { %1534 = vmatmul.mubr.f32.gmra.mrb[38].mxu1 %v5036_v17  ;;  %5796 = vmatprep.subr.bf16.mxu1 %v7512_v40 }
 0x9c4   :  { %1708 = vmatprep.mubr.f32.mxu1 %v8464_v52 }
 0x9c6   :  { %5798 = vmatpush1.bf16.msra.mxu1 %v7520_v48 }
 0xa83   :  { %v5071_v45 = vpop.f32.mrb[24].mxu0 }
 0xa84   :  { %v1605_v49 = vpop.f32.mrb[25].mxu0 }
 0xa87   :  { %v5074_v53 = vpop.f32.mrb[26].mxu0 }
 0xa88   :  { %v1615_v62 = vpop.f32.mrb[27].mxu0 }
 0xa8a   :  { %v4385_v14 = vpop.f32.mrb[32].mxu1 }
 0xa8b   :  { %v4386_v47 = vpop.f32.mrb[33].mxu1 }
 0xa8c   :  { %v4387_v39 = vadd.f32 %v4386_v47, %v4385_v14 }
 0xa8e   :  { %v1521_v15 = vadd.f32 %v4387_v39, %v4043_v34  ;;  %v4388_v43 = vpop.f32.mrb[34].mxu1 }
 0xa8f   :  { %v4389_v21 = vpop.f32.mrb[35].mxu1 }
 0xa90   :  { %v1606_v13 = vadd.f32 %v1605_v49, %v1521_v15  ;;  %v4390_v35 = vadd.f32 %v4389_v21, %v4388_v43 }
 0xa92   :  { %v1624_v0 = vmul.f32 %v1606_v13, %v7170_v3  ;;  %v1526_v24 = vadd.f32 %v4390_v35, %v4043_v34  ;;  %v4391_v55 = vpop.f32.mrb[36].mxu1  ;;  %v7563_v35 = vld [vmem:[#allocation6 + $0x10] sm:$0xff] }
 0xa93   :  { %v4392_v23 = vpop.f32.mrb[37].mxu1 }
 0xa94   :  { %v1628_v7 = vadd.f32 %v1624_v0, %v7057_v54  ;;  %v1611_v59 = vadd.f32 %v5071_v45, %v1526_v24  ;;  %v4393_v8 = vadd.f32 %v4392_v23, %v4391_v55 }
 0xa96   :  { %v1625_v22 = vmul.f32 %v1611_v59, %v7168_v38  ;;  %v1531_v28 = vadd.f32 %v4393_v8, %v4043_v34  ;;  %v4394_v17 = vpop.f32.mrb[38].mxu1  ;;  %4044 = vmatmul.mubr.msk.f32.vlgmr.msra.gmra.mrb[40].mxu1 %vm285_vm0, %v1628_v7 }
 0xa97   :  { %v4395_v10 = vpop.f32.mrb[39].mxu1  ;;  %1714 = vmatprep.mubr.f32.mxu1 %v8464_v52 }
 0xa98   :  { %v1616_v6 = vadd.f32 %v1615_v62, %v1531_v28  ;;  %v4396_v44 = vadd.f32 %v4395_v10, %v4394_v17  ;;  %v1629_v3 = vadd.f32 %v7052_v50, %v1625_v22  ;;  %v141_v50 = vld [vmem:[%s8399_s4] sm:$0xff]  ;;  %v7568_v22 = vld [vmem:[#allocation6 + $0x18] sm:$0xff] }
 0xa99   :  { %5083 = vmatprep.mubr.msk.f32.mxu0 %vm285_vm0, %v141_v50  ;;  %v167_v50 = vld [vmem:[%s8400_s5] sm:$0xff] }
 0xa9a   :  { %v1626_v19 = vmul.f32 %v1616_v6, %v7176_v2  ;;  %v1536_v25 = vadd.f32 %v4396_v44, %v4043_v34  ;;  %4045 = vmatmul.mubr.msk.f32.gmra.mrb[42].mxu1 %vm285_vm0, %v1629_v3  ;;  %v7558_v34 = vld [vmem:[#allocation6 + $0x8] sm:$0xff]  ;;  %v143_v3 = vld [vmem:[%s8399_s4 + $0x10] sm:$0xff] }
 0xa9b   :  { %1720 = vmatprep.mubr.f32.mxu1 %v8464_v52  ;;  %v142_v44 = vld [vmem:[%s8399_s4 + $0x8] sm:$0xff] }
 0xa9c   :  { %v1621_v54 = vadd.f32 %v5074_v53, %v1536_v25  ;;  %v1630_v38 = vadd.f32 %v1626_v19, %v7071_v1  ;;  %v144_v19 = vld [vmem:[%s8399_s4 + $0x18] sm:$0xff]  ;;  %v145_v25 = vld [vmem:[%s8399_s4 + $0x20] sm:$0xff] }
 0xa9e   :  { %v1627_v30 = vmul.f32 %v1621_v54, %v7174_v26  ;;  %4046 = vmatmul.mubr.msk.f32.gmra.mrb[44].mxu1 %vm285_vm0, %v1630_v38  ;;  %v146_v54 = vld [vmem:[%s8399_s4 + $0x28] sm:$0xff]  ;;  %v147_v38 = vld [vmem:[%s8399_s4 + $0x30] sm:$0xff] }
 0xa9f   :  { %1726 = vmatprep.mubr.f32.mxu1 %v8464_v52 }
 0xaa0   :  { %v1631_v37 = vadd.f32 %v7066_v41, %v1627_v30  ;;  %v7554_v41 = vld [vmem:[%s8398_s3] ss:$0 sm:$0xff]  ;;  %v148_v30 = vld [vmem:[%s8399_s4 + $0x38] sm:$0xff] }
 0xaa2   :  { %4047 = vmatmul.mubr.msk.f32.gmra.mrb[46].mxu1 %vm285_vm0, %v1631_v37  ;;  %v6271_v37 = vld [vmem:[%s8399_s4 + $0x40] sm:$0xff] }
 0xb69   :  { %v1710_v2 = vpop.f32.mrb[40].mxu1 }
 0xb6a   :  { %v1712_v32 = vpop.f32.mrb[41].mxu1  ;;  %v1733_v26 = vmul.f32 %v7548_v42, %v1710_v2  ;;  %v168_v2 = vld [vmem:[%s8400_s5 + $0x8] sm:$0xff] }
 0xb6b   :  { %v1737_v1 = vmul.f32 %v1712_v32, %v6947_v58  ;;  %v169_v32 = vld [vmem:[%s8400_s5 + $0x10] sm:$0xff] }
 0xb6d   :  { %v1741_v45 = vmul.f32 %v7554_v41, %v1737_v1  ;;  %v1716_v49 = vpop.f32.mrb[42].mxu1  ;;  %v7613_v1 = vpack.c.bf16 %v168_v2, %v167_v50 }
 0xb6e   :  { %v1718_v53 = vpop.f32.mrb[43].mxu1  ;;  %v1734_v47 = vmul.f32 %v7558_v34, %v1716_v49  ;;  %v171_v49 = vld [vmem:[%s8400_s5 + $0x20] sm:$0xff] }
 0xb6f   :  { %v1745_v62 = vadd.f32 %v1741_v45, %v1733_v26  ;;  %v1738_v14 = vmul.f32 %v1718_v53, %v6949_v63  ;;  %v170_v26 = vld [vmem:[%s8400_s5 + $0x18] sm:$0xff]  ;;  %v172_v53 = vld [vmem:[%s8400_s5 + $0x28] sm:$0xff]  ;;  %5808 = vmatprep.subr.bf16.mxu1 %v7613_v1 }
 0xb70   :  { %v7618_v45 = vpack.c.bf16 %v170_v26, %v169_v32  ;;  %5810 = vmatpush3.bf16.msra.mxu1 %v7613_v1 }
 0xb71   :  { %v1742_v39 = vmul.f32 %v7554_v41, %v1738_v14  ;;  %v1722_v15 = vpop.f32.mrb[44].mxu1  ;;  %v173_v14 = vld [vmem:[%s8400_s5 + $0x30] sm:$0xff] }
 0xb72   :  { %v1724_v43 = vpop.f32.mrb[45].mxu1  ;;  %v1735_v0 = vmul.f32 %v7563_v35, %v1722_v15  ;;  %5812 = vmatprep.subr.bf16.mxu1 %v7618_v45  ;;  %v175_v15 = vld [vmem:[%s8400_s5 + $0x40] sm:$0xff] }
 0xb73   :  { %v1746_v21 = vadd.f32 %v1742_v39, %v1734_v47  ;;  %v1739_v13 = vmul.f32 %v1724_v43, %v6954_v9  ;;  %v174_v47 = vld [vmem:[%s8400_s5 + $0x38] sm:$0xff]  ;;  %v176_v43 = vld [vmem:[%s8400_s5 + $0x48] sm:$0xff] }
 0xb74   :  { %5814 = vmatpush3.bf16.msra.mxu1 %v7618_v45  ;;  %v7639_v39 = vpack.c.bf16 %v174_v47, %v173_v14 }
 0xb75   :  { %v1743_v24 = vmul.f32 %v7554_v41, %v1739_v13  ;;  %v1728_v55 = vpop.f32.mrb[46].mxu1  ;;  %v5799_v23 = vpack.c.bf16 %v1746_v21, %v1745_v62  ;;  %v7629_v62 = vpack.c.bf16 %v172_v53, %v171_v49  ;;  %v7649_v21 = vpack.c.bf16 %v176_v43, %v175_v15  ;;  %v177_v13 = vld [vmem:[%s8400_s5 + $0x50] sm:$0xff]  ;;  %v8532_v43 = vld [vmem:[#allocation40_spill] sm:$0xff] }
 0xb76   :  { %v1730_v7 = vpop.f32.mrb[47].mxu1  ;;  %v1736_v28 = vmul.f32 %v7568_v22, %v1728_v55  ;;  %v179_v55 = vld [vmem:[%s8400_s5 + $0x60] sm:$0xff] }
 0xb77   :  { %v1747_v59 = vadd.f32 %v1743_v24, %v1735_v0  ;;  %v1740_v8 = vmul.f32 %v1730_v7, %v6958_v16  ;;  %5800 = vmatprep.subr.bf16.mxu0 %v5799_v23  ;;  %5816 = vmatprep.subr.bf16.mxu1 %v7629_v62  ;;  %v178_v0 = vld [vmem:[%s8400_s5 + $0x58] sm:$0xff] }
 0xb78   :  { %5802 = vmatpush3.bf16.msra.mxu0 %v5799_v23  ;;  %5818 = vmatpush3.bf16.msra.mxu1 %v7629_v62  ;;  %v7659_v24 = vpack.c.bf16 %v178_v0, %v177_v13  ;;  %v180_v23 = vld [vmem:[%s8400_s5 + $0x68] sm:$0xff]  ;;  %v8533_v13 = vld [vmem:[#allocation41_spill] sm:$0xff] }
 0xb79   :  { %v1744_v17 = vmul.f32 %v7554_v41, %v1740_v8  ;;  %5820 = vmatprep.subr.bf16.mxu1 %v7639_v39  ;;  %v7669_v7 = vpack.c.bf16 %v180_v23, %v179_v55  ;;  %v182_v8 = vld [vmem:[%s8400_s5 + $0x78] sm:$0xff]  ;;  %v6272_v0 = vld [vmem:[#allocation2 + $0x8] sm:$0xff] }
 0xb7a   :  { %v1980_v55 = vsub.f32 %v6272_v0, %v6272_v0  ;;  %v131_v23 = vld [vmem:[#allocation8 + $0x8] sm:$0xff] }
 0xb7b   :  { %v1748_v10 = vadd.f32 %v1744_v17, %v1736_v28 }
 0xb7c   :  { %5822 = vmatpush3.bf16.msra.mxu1 %v7639_v39 }
 0xb7d   :  { %v5803_v6 = vpack.c.bf16 %v1748_v10, %v1747_v59  ;;  %5824 = vmatprep.subr.bf16.mxu1 %v7649_v21  ;;  %v181_v59 = vld [vmem:[%s8400_s5 + $0x70] sm:$0xff]  ;;  %s1987_s5 = sld [smem:[#allocation11]] }
 0xb7e   :  { %v7680_v28 = vpack.c.bf16 %v182_v8, %v181_v59  ;;  %v6273_v59 = vld [vmem:[#allocation2] sm:$0xff] }
 0xb7f   :  { %5804 = vmatprep.subr.bf16.mxu0 %v5803_v6  ;;  %v1979_v8 = vsub.f32 %v6273_v59, %v6273_v59 }
 0xb80   :  { %5806 = vmatpush3.bf16.msra.mxu0 %v5803_v6  ;;  %5826 = vmatpush3.bf16.msra.mxu1 %v7649_v21 }
 0xb81   :  { %5828 = vmatprep.subr.bf16.mxu1 %v7659_v24 }
 0xb83   :  { %5084 = vmatmul.mubr.msk.f32.vlgmr.msra.gmra.mrb[28].mxu0 %vm285_vm0, %v142_v44 }
 0xb84   :  { %5086 = vmatprep.mubr.msk.f32.mxu0 %vm285_vm0, %v143_v3  ;;  %5830 = vmatpush3.bf16.msra.mxu1 %v7659_v24 }
 0xb85   :  { %5832 = vmatprep.subr.bf16.mxu1 %v7669_v7 }
 0xb87   :  { %5087 = vmatmul.mubr.msk.f32.gmra.mrb[30].mxu0 %vm285_vm0, %v144_v19 }
 0xb88   :  { %5089 = vmatprep.mubr.msk.f32.mxu0 %vm285_vm0, %v145_v25  ;;  %5834 = vmatpush3.bf16.msra.mxu1 %v7669_v7 }
 0xb89   :  { %5836 = vmatprep.subr.bf16.mxu1 %v7680_v28 }
 0xb8b   :  { %5090 = vmatmul.mubr.msk.f32.gmra.mrb[32].mxu0 %vm285_vm0, %v146_v54 }
 0xb8c   :  { %5092 = vmatprep.mubr.msk.f32.mxu0 %vm285_vm0, %v147_v38  ;;  %5838 = vmatpush3.bf16.msra.mxu1 %v7680_v28 }
 0xb8d   :  { %5880 = vmatprep.subr.bf16.mxu1 %v6783_v46 }
 0xb8f   :  { %5093 = vmatmul.mubr.msk.f32.gmra.mrb[34].mxu0 %vm285_vm0, %v148_v30 }
 0xb90   :  { %5141 = vmatprep.mubr.msk.f32.mxu0 %vm285_vm0, %v6271_v37 }
 0xc56   :  { %v5085_v17 = vpop.f32.mrb[28].mxu0 }
 0xc57   :  { %v1839_v10 = vpop.f32.mrb[29].mxu0 }
 0xc5a   :  { %v5088_v6 = vpop.f32.mrb[30].mxu0 }
 0xc5b   :  { %v1849_v44 = vpop.f32.mrb[31].mxu0 }
 0xc5e   :  { %v5091_v3 = vpop.f32.mrb[32].mxu0 }
 0xc5f   :  { %1880 = vrot.lane.b32.xlu1 %v5091_v3, %s6490_s21  ;;  %v1859_v19 = vpop.f32.mrb[33].mxu0  ;;  %v1988_v3 = vstv %s1987_s5 }
 0xc60   :  { %1878 = vrot.lane.b32.xlu0 %v1859_v19, %s6490_s21 }
 0xc62   :  { %v5094_v25 = vpop.f32.mrb[34].mxu0 }
 0xc63   :  { %1884 = vrot.lane.b32.xlu1 %v5094_v25, %s6490_s21  ;;  %v1869_v54 = vpop.f32.mrb[35].mxu0  ;;  %v133_v25 = vld [vmem:[#allocation8 + $0x18] sm:$0xff] }
 0xc64   :  { %1882 = vrot.lane.b32.xlu0 %v1869_v54, %s6490_s21  ;;  %v6275_v54 = vld [vmem:[#allocation2 + $0x10] sm:$0xff] }
 0xcd1   :  { %v1881_v38 = vpop.permute.xlu1 %1880 }
 0xcd2   :  { %v1887_v30 = vmul.f32 %v7554_v41, %v1881_v38  ;;  %v1879_v37 = vpop.permute.xlu0 %1878  ;;  %v1981_v38 = vsub.f32 %v6275_v54, %v6275_v54 }
 0xcd3   :  { %v1886_v50 = vmul.f32 %v7554_v41, %v1879_v37 }
 0xcd4   :  { %v1891_v26 = vadd.f32 %v5085_v17, %v1887_v30  ;;  %v130_v17 = vld [vmem:[#allocation8] sm:$0xff]  ;;  %v132_v30 = vld [vmem:[#allocation8 + $0x10] sm:$0xff] }
 0xcd5   :  { %v1890_v2 = vadd.f32 %v1886_v50, %v1839_v10  ;;  %v1885_v32 = vpop.permute.xlu1 %1884  ;;  %v1984_v10 = vmul.f32 %v1980_v55, %v131_v23  ;;  %v1983_v19 = vmul.f32 %v1979_v8, %v130_v17 }
 0xcd6   :  { %v1889_v49 = vmul.f32 %v7554_v41, %v1885_v32  ;;  %v1883_v53 = vpop.permute.xlu0 %1882  ;;  %v1985_v32 = vmul.f32 %v1981_v38, %v132_v30  ;;  %v8540_v38 = vld [vmem:[#allocation23_spill] sm:$0xff]  ;;  %v6280_v30 = vld [vmem:[%s8399_s4 + $0x68] sm:$0xff] }
 0xcd7   :  { %v1888_v14 = vmul.f32 %v7554_v41, %v1883_v53  ;;  %5127 = vmatprep.mubr.f32.mxu1 %v1890_v2  ;;  %v1990_v37 = vmul.f32 %v1988_v3, %v1984_v10  ;;  %v1989_v2 = vmul.f32 %v1988_v3, %v1983_v19 }
 0xcd8   :  { %5128 = vmatmul.mubr.f32.vlgmr.msra.gmra.mrb[48].mxu1 %v1891_v26  ;;  %v1893_v15 = vadd.f32 %v5088_v6, %v1889_v49  ;;  %v6274_v6 = vld [vmem:[#allocation2 + $0x18] sm:$0xff] }
 0xcd9   :  { %v1892_v47 = vadd.f32 %v1888_v14, %v1849_v44  ;;  %5882 = vmatpush3.bf16.msra.mxu1 %v6794_v51  ;;  %v1982_v44 = vsub.f32 %v6274_v6, %v6274_v6  ;;  %v1994_v26 = vsub.f32 %v6272_v0, %v1990_v37  ;;  %v1993_v53 = vsub.f32 %v6273_v59, %v1989_v2  ;;  %v8538_v59 = vld [vmem:[#allocation21_spill] sm:$0xff]  ;;  %v6281_v37 = vld [vmem:[%s8399_s4 + $0x70] sm:$0xff]  ;;  %v6282_v2 = vld [vmem:[%s8399_s4 + $0x78] sm:$0xff] }
 0xcda   :  { %5884 = vmatprep.subr.bf16.mxu1 %v6806_v56  ;;  %v1991_v14 = vmul.f32 %v1988_v3, %v1985_v32  ;;  %v8542_v32 = vld [vmem:[#allocation25_spill] sm:$0xff] }
 0xcdb   :  { %5130 = vmatprep.mubr.f32.mxu1 %v1892_v47  ;;  %v1986_v50 = vmul.f32 %v1982_v44, %v133_v25  ;;  %v6278_v25 = vld [vmem:[%s8399_s4 + $0x58] sm:$0xff] }
 0xcdc   :  { %5131 = vmatmul.mubr.f32.gmra.mrb[50].mxu1 %v1893_v15  ;;  %v1995_v8 = vsub.f32 %v6275_v54, %v1991_v14  ;;  %v6279_v54 = vld [vmem:[%s8399_s4 + $0x60] sm:$0xff] }
 0xcdd   :  { %5886 = vmatpush3.bf16.msra.mxu1 %v6819_v60  ;;  %v1992_v49 = vmul.f32 %v1988_v3, %v1986_v50  ;;  %v6277_v3 = vld [vmem:[%s8399_s4 + $0x50] sm:$0xff]  ;;  %v8541_v50 = vld [vmem:[#allocation24_spill] sm:$0xff] }
 0xcde   :  { %5888 = vmatprep.subr.bf16.mxu1 %v6822_v61 }
 0xcdf   :  { %v1996_v23 = vsub.f32 %v6274_v6, %v1992_v49  ;;  %v6276_v6 = vld [vmem:[%s8399_s4 + $0x48] sm:$0xff]  ;;  %v8544_v49 = vld [vmem:[#allocation27_spill] sm:$0xff] }
 0xce1   :  { %5890 = vmatpush3.bf16.msra.mxu1 %v6844_v4 }
 0xce2   :  { %5892 = vmatprep.subr.bf16.mxu1 %v6847_v5 }
 0xce5   :  { %5894 = vmatpush3.bf16.msra.mxu1 %v6868_v11 }
 0xce6   :  { %5896 = vmatprep.subr.bf16.mxu1 %v6871_v12 }
 0xce9   :  { %5898 = vmatpush3.bf16.msra.mxu1 %v6888_v18 }
 0xcea   :  { %5900 = vmatprep.subr.bf16.mxu1 %v6891_v20 }
 0xced   :  { %5902 = vmatpush3.bf16.msra.mxu1 %v6906_v27 }
 0xcee   :  { %5904 = vmatprep.subr.bf16.mxu1 %v6909_v29 }
 0xcf1   :  { %5906 = vmatpush3.bf16.msra.mxu1 %v6918_v33 }
 0xcf2   :  { %5908 = vmatprep.subr.bf16.mxu1 %v6935_v57 }
 0xcf5   :  { %5910 = vmatpush3.bf16.msra.mxu1 %v8532_v43 }
 0xcf6   :  { %5920 = vmatprep.subr.bf16.mxu1 %v8533_v13 }
 0xdab   :  { %v5129_v47 = vpop.f32.mrb[48].mxu1 }
 0xdac   :  { %v7709_v15 = vsub.f32 %v1994_v26, %v5129_v47  ;;  %v1960_v55 = vpop.f32.mrb[49].mxu1  ;;  %v8543_v26 = vld [vmem:[#allocation26_spill] sm:$0xff] }
 0xdad   :  { %v7711_v52 = vsub.f32 %v1993_v53, %v1960_v55  ;;  %v8545_v53 = vld [vmem:[#allocation28_spill] sm:$0xff] }
 0xdae   :  { %8534 = vst [vmem:[#allocation41_spill] sm:$0xff] %v7709_v15 }
 0xdaf   :  { %8535 = vst [vmem:[#allocation57_spill] sm:$0xff] %v7711_v52  ;;  %v5132_v17 = vpop.f32.mrb[50].mxu1  ;;  %v5839_v43 = vpack.c.bf16 %v7709_v15, %v7711_v52 }
 0xdb0   :  { %v7715_v10 = vsub.f32 %v1996_v23, %v5132_v17  ;;  %v1970_v44 = vpop.f32.mrb[51].mxu1 }
 0xdb1   :  { %v7717_v19 = vsub.f32 %v1995_v8, %v1970_v44  ;;  %5840 = vmatprep.subr.bf16.mxu0 %v5839_v43 }
 0xdb2   :  { %8536 = vst [vmem:[#allocation58_spill] sm:$0xff] %v7715_v10  ;;  %5842 = vmatpush3.bf16.msra.mxu0 %v5839_v43  ;;  %v8539_v43 = vld [vmem:[#allocation22_spill] sm:$0xff] }
 0xdb3   :  { %8537 = vst [vmem:[#allocation59_spill] sm:$0xff] %v7717_v19  ;;  %v5843_v0 = vpack.c.bf16 %v7715_v10, %v7717_v19 }
 0xdb5   :  { %5844 = vmatprep.subr.bf16.mxu0 %v5843_v0 }
 0xdb6   :  { %5846 = vmatpush3.bf16.msra.mxu0 %v5843_v0 }
 0xdb7   :  { %5848 = vmatprep.subr.bf16.mxu0 %v8538_v59 }
 0xdb9   :  { %5142 = vmatmul.mubr.msk.f32.vlgmr.msra.gmra.mrb[36].mxu0 %vm285_vm0, %v6276_v6 }
 0xdba   :  { %5144 = vmatprep.mubr.msk.f32.mxu0 %vm285_vm0, %v6277_v3  ;;  %5850 = vmatpush3.bf16.msra.mxu0 %v8538_v59 }
 0xdbb   :  { %5852 = vmatprep.subr.bf16.mxu0 %v8539_v43 }
 0xdbd   :  { %5145 = vmatmul.mubr.msk.f32.gmra.mrb[38].mxu0 %vm285_vm0, %v6278_v25 }
 0xdbe   :  { %5147 = vmatprep.mubr.msk.f32.mxu0 %vm285_vm0, %v6279_v54  ;;  %5854 = vmatpush3.bf16.msra.mxu0 %v8539_v43 }
 0xdbf   :  { %5856 = vmatprep.subr.bf16.mxu0 %v8540_v38 }
 0xdc1   :  { %5148 = vmatmul.mubr.msk.f32.gmra.mrb[40].mxu0 %vm285_vm0, %v6280_v30 }
 0xdc2   :  { %5150 = vmatprep.mubr.msk.f32.mxu0 %vm285_vm0, %v6281_v37  ;;  %5858 = vmatpush3.bf16.msra.mxu0 %v8540_v38 }
 0xdc3   :  { %5860 = vmatprep.subr.bf16.mxu0 %v8541_v50 }
 0xdc5   :  { %5151 = vmatmul.mubr.msk.f32.gmra.mrb[42].mxu0 %vm285_vm0, %v6282_v2 }
 0xdc6   :  { %5862 = vmatpush3.bf16.msra.mxu0 %v8541_v50 }
 0xdc7   :  { %5864 = vmatprep.subr.bf16.mxu0 %v8542_v32 }
 0xdca   :  { %5866 = vmatpush3.bf16.msra.mxu0 %v8542_v32 }
 0xdcb   :  { %5868 = vmatprep.subr.bf16.mxu0 %v8543_v26 }
 0xdce   :  { %5870 = vmatpush3.bf16.msra.mxu0 %v8543_v26 }
 0xdcf   :  { %5872 = vmatprep.subr.bf16.mxu0 %v8544_v49 }
 0xdd2   :  { %5874 = vmatpush3.bf16.msra.mxu0 %v8544_v49 }
 0xdd3   :  { %5876 = vmatprep.subr.bf16.mxu0 %v8545_v53 }
 0xdd6   :  { %5878 = vmatpush3.bf16.msra.mxu0 %v8545_v53 }
 0xe8c   :  { %v5143_v14 = vpop.f32.mrb[36].mxu0 }
 0xe8d   :  { %v2067_v47 = vpop.f32.mrb[37].mxu0 }
 0xe90   :  { %v5146_v55 = vpop.f32.mrb[38].mxu0 }
 0xe91   :  { %v2077_v23 = vpop.f32.mrb[39].mxu0 }
 0xe94   :  { %v5149_v8 = vpop.f32.mrb[40].mxu0 }
 0xe95   :  { %2108 = vrot.lane.b32.xlu1 %v5149_v8, %s6490_s21  ;;  %v2087_v17 = vpop.f32.mrb[41].mxu0 }
 0xe96   :  { %2106 = vrot.lane.b32.xlu0 %v2087_v17, %s6490_s21 }
 0xe98   :  { %v5152_v44 = vpop.f32.mrb[42].mxu0 }
 0xe99   :  { %2112 = vrot.lane.b32.xlu1 %v5152_v44, %s6490_s21  ;;  %v2097_v0 = vpop.f32.mrb[43].mxu0 }
 0xe9a   :  { %2110 = vrot.lane.b32.xlu0 %v2097_v0, %s6490_s21  ;;  %v6283_v0 = vld [vmem:[#allocation9] sm:$0xff] }
 0xf07   :  { %v2109_v6 = vpop.permute.xlu1 %2108 }
 0xf08   :  { %v2115_v3 = vmul.f32 %v7554_v41, %v2109_v6  ;;  %v2107_v25 = vpop.permute.xlu0 %2106 }
 0xf09   :  { %v2114_v54 = vmul.f32 %v7554_v41, %v2107_v25 }
 0xf0a   :  { %v2119_v2 = vadd.f32 %v5143_v14, %v2115_v3 }
 0xf0b   :  { %v2118_v30 = vadd.f32 %v2114_v54, %v2067_v47  ;;  %v2113_v37 = vpop.permute.xlu1 %2112  ;;  %v8549_v54 = vld [vmem:[#allocation45_spill] sm:$0xff] }
 0xf0c   :  { %v2117_v8 = vmul.f32 %v7554_v41, %v2113_v37  ;;  %v2111_v53 = vpop.permute.xlu0 %2110  ;;  %v8552_v37 = vld [vmem:[#allocation48_spill] sm:$0xff] }
 0xf0d   :  { %v2116_v17 = vmul.f32 %v7554_v41, %v2111_v53  ;;  %5185 = vmatprep.mubr.f32.mxu0 %v2118_v30  ;;  %v8546_v53 = vld [vmem:[#allocation42_spill] sm:$0xff]  ;;  %v8551_v30 = vld [vmem:[#allocation47_spill] sm:$0xff] }
 0xf0e   :  { %5186 = vmatmul.mubr.f32.vlgmr.msra.gmra.mrb[44].mxu0 %v2119_v2  ;;  %v2121_v49 = vadd.f32 %v5146_v55, %v2117_v8 }
 0xf0f   :  { %v2120_v44 = vadd.f32 %v2116_v17, %v2077_v23 }
 0xf11   :  { %5188 = vmatprep.mubr.f32.mxu0 %v2120_v44 }
 0xf12   :  { %5189 = vmatmul.mubr.f32.gmra.mrb[46].mxu0 %v2121_v49 }
 0xf13   :  { %5199 = vmatprep.mubr.msk.f32.mxu0 %vm285_vm0, %v6283_v0 }
 0xfe1   :  { %v5187_v6 = vpop.f32.mrb[44].mxu0 }
 0xfe2   :  { %v2188_v26 = vpop.f32.mrb[45].mxu0  ;;  %v2212_v3 = vmul.f32 %v5187_v6, %v6949_v63  ;;  %v2208_v49 = vmul.f32 %v7558_v34, %v5187_v6 }
 0xfe3   :  { %v2207_v47 = vmul.f32 %v7548_v42, %v2188_v26  ;;  %v2211_v14 = vmul.f32 %v2188_v26, %v6947_v58  ;;  %v8547_v26 = vld [vmem:[#allocation43_spill] sm:$0xff] }
 0xfe5   :  { %v5190_v25 = vpop.f32.mrb[46].mxu0  ;;  %2279 = vmatprep.mubr.f32.mxu1 %v2211_v14 }
 0xfe6   :  { %v2198_v41 = vpop.f32.mrb[47].mxu0  ;;  %2280 = vmatmul.mubr.f32.vlgmr.msra.gmra.mrb[52].mxu1 %v2207_v47  ;;  %v2214_v23 = vmul.f32 %v5190_v25, %v6958_v16  ;;  %v2210_v34 = vmul.f32 %v7568_v22, %v5190_v25 }
 0xfe7   :  { %2284 = vmatprep.mubr.f32.mxu1 %v2212_v3  ;;  %5922 = vmatpush3.bf16.msra.mxu1 %v8533_v13  ;;  %v2213_v55 = vmul.f32 %v2198_v41, %v6954_v9  ;;  %v2209_v42 = vmul.f32 %v7563_v35, %v2198_v41  ;;  %v8548_v13 = vld [vmem:[#allocation44_spill] sm:$0xff]  ;;  %v8550_v35 = vld [vmem:[#allocation46_spill] sm:$0xff] }
 0xfe8   :  { %5924 = vmatprep.subr.bf16.mxu1 %v8546_v53 }
 0xfea   :  { %2285 = vmatmul.mubr.f32.gmra.mrb[54].mxu1 %v2208_v49 }
 0xfeb   :  { %2289 = vmatprep.mubr.f32.mxu1 %v2213_v55  ;;  %5926 = vmatpush3.bf16.msra.mxu1 %v8546_v53 }
 0xfec   :  { %5928 = vmatprep.subr.bf16.mxu1 %v8547_v26 }
 0xfee   :  { %2290 = vmatmul.mubr.f32.gmra.mrb[56].mxu1 %v2209_v42  ;;  %v6284_v42 = vld [vmem:[#allocation9 + $0x8] sm:$0xff] }
 0xfef   :  { %2294 = vmatprep.mubr.f32.mxu1 %v2214_v23  ;;  %5930 = vmatpush3.bf16.msra.mxu1 %v8547_v26  ;;  %v6285_v26 = vld [vmem:[#allocation9 + $0x10] sm:$0xff]  ;;  %v6286_v23 = vld [vmem:[#allocation9 + $0x18] sm:$0xff] }
 0xff0   :  { %5932 = vmatprep.subr.bf16.mxu1 %v8548_v13 }
 0xff2   :  { %2295 = vmatmul.mubr.f32.gmra.mrb[58].mxu1 %v2210_v34 }
 0xff3   :  { %5934 = vmatpush3.bf16.msra.mxu1 %v8548_v13 }
 0xff4   :  { %5936 = vmatprep.subr.bf16.mxu1 %v8549_v54 }
 0xff7   :  { %5938 = vmatpush3.bf16.msra.mxu1 %v8549_v54 }
 0xff8   :  { %5940 = vmatprep.subr.bf16.mxu1 %v8550_v35 }
 0xffb   :  { %5942 = vmatpush3.bf16.msra.mxu1 %v8550_v35 }
 0xffc   :  { %5944 = vmatprep.subr.bf16.mxu1 %v8551_v30 }
 0xfff   :  { %5946 = vmatpush3.bf16.msra.mxu1 %v8551_v30  ;;  %v6287_v30 = vld [vmem:[%s8399_s4 + $0x80] sm:$0xff] }
0x1000   :  { %5948 = vmatprep.subr.bf16.mxu1 %v8552_v37 }
0x1003   :  { %5950 = vmatpush3.bf16.msra.mxu1 %v8552_v37 }
0x10b9   :  { %v4513_v22 = vpop.f32.mrb[52].mxu1 }
0x10ba   :  { %v4514_v2 = vpop.f32.mrb[53].mxu1 }
0x10bb   :  { %v4515_v8 = vadd.f32 %v4514_v2, %v4513_v22 }
0x10bd   :  { %v4516_v17 = vpop.f32.mrb[54].mxu1 }
0x10be   :  { %v4517_v44 = vpop.f32.mrb[55].mxu1 }
0x10bf   :  { %v4518_v6 = vadd.f32 %v4517_v44, %v4516_v17 }
0x10c1   :  { %v5911_v47 = vpack.c.bf16 %v4518_v6, %v4515_v8  ;;  %v4519_v14 = vpop.f32.mrb[56].mxu1 }
0x10c2   :  { %v4520_v3 = vpop.f32.mrb[57].mxu1 }
0x10c3   :  { %v4521_v25 = vadd.f32 %v4520_v3, %v4519_v14  ;;  %5912 = vmatprep.subr.bf16.mxu0 %v5911_v47 }
0x10c4   :  { %5914 = vmatpush3.bf16.msra.mxu0 %v5911_v47 }
0x10c5   :  { %v4522_v41 = vpop.f32.mrb[58].mxu1 }
0x10c6   :  { %v4523_v49 = vpop.f32.mrb[59].mxu1 }
0x10c7   :  { %v4524_v53 = vadd.f32 %v4523_v49, %v4522_v41 }
0x10c9   :  { %v5915_v55 = vpack.c.bf16 %v4524_v53, %v4521_v25 }
0x10cb   :  { %5916 = vmatprep.subr.bf16.mxu0 %v5915_v55 }
0x10cc   :  { %5918 = vmatpush3.bf16.msra.mxu0 %v5915_v55 }
0x10cf   :  { %5200 = vmatmul.mubr.msk.f32.vlgmr.msra.gmra.mrb[48].mxu0 %vm285_vm0, %v6284_v42 }
0x10d0   :  { %5202 = vmatprep.mubr.msk.f32.mxu0 %vm285_vm0, %v6285_v26 }
0x10d3   :  { %5203 = vmatmul.mubr.msk.f32.gmra.mrb[50].mxu0 %vm285_vm0, %v6286_v23 }
0x10d4   :  { %5251 = vmatprep.mubr.msk.f32.mxu0 %vm285_vm0, %v6283_v0 }
0x11a2   :  { %v5201_v34 = vpop.f32.mrb[48].mxu0 }
0x11a3   :  { %v2366_v13 = vpop.f32.mrb[49].mxu0 }
0x11a4   :  { %5237 = vmatprep.mubr.f32.mxu1 %v2366_v13  ;;  %v8556_v13 = vld [vmem:[#allocation52_spill] sm:$0xff] }
0x11a5   :  { %5238 = vmatmul.mubr.f32.vlgmr.msra.gmra.mrb[60].mxu1 %v5201_v34  ;;  %v8553_v34 = vld [vmem:[#allocation49_spill] sm:$0xff] }
0x11a6   :  { %v5204_v54 = vpop.f32.mrb[50].mxu0 }
0x11a7   :  { %v2376_v35 = vpop.f32.mrb[51].mxu0 }
0x11a8   :  { %5240 = vmatprep.mubr.f32.mxu1 %v2376_v35 }
0x11a9   :  { %5241 = vmatmul.mubr.f32.gmra.mrb[62].mxu1 %v5204_v54  ;;  %v8557_v54 = vld [vmem:[#allocation53_spill] sm:$0xff] }
0x11aa   :  { %5303 = vmatprep.mubr.msk.f32.mxu1 %vm285_vm0, %v6287_v30 }
0x1278   :  { %v7805_v37 = vpop.f32.mrb[60].mxu1 }
0x1279   :  { %v7808_v22 = vsub.f32 %v4518_v6, %v7805_v37  ;;  %v7810_v0 = vpop.f32.mrb[61].mxu1 }
0x127a   :  { %v7813_v2 = vsub.f32 %v4515_v8, %v7810_v0 }
0x127b   :  { %v2475_v17 = vmul.f32 %v7808_v22, %v7808_v22 }
0x127c   :  { %v2474_v44 = vmul.f32 %v7813_v2, %v7813_v2  ;;  %v7819_v47 = vpop.f32.mrb[62].mxu1 }
0x127d   :  { %v7822_v14 = vsub.f32 %v4524_v53, %v7819_v47  ;;  %v7824_v3 = vpop.f32.mrb[63].mxu1  ;;  %v8555_v53 = vld [vmem:[#allocation51_spill] sm:$0xff] }
0x127e   :  { %v7827_v6 = vsub.f32 %v4521_v25, %v7824_v3  ;;  %v5951_v41 = vpack.c.bf16 %v2475_v17, %v2474_v44  ;;  %v8554_v25 = vld [vmem:[#allocation50_spill] sm:$0xff] }
0x127f   :  { %v2477_v8 = vmul.f32 %v7822_v14, %v7822_v14 }
0x1280   :  { %v2476_v49 = vmul.f32 %v7827_v6, %v7827_v6  ;;  %5952 = vmatprep.subr.bf16.mxu0 %v5951_v41 }
0x1281   :  { %5954 = vmatpush3.bf16.msra.mxu0 %v5951_v41 }
0x1282   :  { %v5955_v55 = vpack.c.bf16 %v2477_v8, %v2476_v49 }
0x1284   :  { %5956 = vmatprep.subr.bf16.mxu0 %v5955_v55 }
0x1285   :  { %5958 = vmatpush3.bf16.msra.mxu0 %v5955_v55 }
0x1286   :  { %5960 = vmatprep.subr.bf16.mxu0 %v8553_v34 }
0x1288   :  { %5252 = vmatmul.mubr.msk.f32.vlgmr.msra.gmra.mrb[52].mxu0 %vm285_vm0, %v6284_v42  ;;  %v8558_v42 = vld [vmem:[#allocation54_spill] sm:$0xff] }
0x1289   :  { %5254 = vmatprep.mubr.msk.f32.mxu0 %vm285_vm0, %v6285_v26  ;;  %5962 = vmatpush3.bf16.msra.mxu0 %v8553_v34  ;;  %v8559_v26 = vld [vmem:[#allocation55_spill] sm:$0xff] }
0x128a   :  { %5964 = vmatprep.subr.bf16.mxu0 %v8554_v25 }
0x128c   :  { %5255 = vmatmul.mubr.msk.f32.gmra.mrb[54].mxu0 %vm285_vm0, %v6286_v23  ;;  %v8560_v23 = vld [vmem:[#allocation56_spill] sm:$0xff] }
0x128d   :  { %5966 = vmatpush3.bf16.msra.mxu0 %v8554_v25 }
0x128e   :  { %5968 = vmatprep.subr.bf16.mxu0 %v8555_v53 }
0x1291   :  { %5970 = vmatpush3.bf16.msra.mxu0 %v8555_v53 }
0x1292   :  { %5972 = vmatprep.subr.bf16.mxu0 %v8556_v13 }
0x1295   :  { %5974 = vmatpush3.bf16.msra.mxu0 %v8556_v13 }
0x1296   :  { %5976 = vmatprep.subr.bf16.mxu0 %v8557_v54 }
0x1299   :  { %5978 = vmatpush3.bf16.msra.mxu0 %v8557_v54 }
0x129a   :  { %5980 = vmatprep.subr.bf16.mxu0 %v8558_v42 }
0x129d   :  { %5982 = vmatpush3.bf16.msra.mxu0 %v8558_v42 }
0x129e   :  { %5984 = vmatprep.subr.bf16.mxu0 %v8559_v26 }
0x12a1   :  { %5986 = vmatpush3.bf16.msra.mxu0 %v8559_v26 }
0x12a2   :  { %5988 = vmatprep.subr.bf16.mxu0 %v8560_v23 }
0x12a5   :  { %5990 = vmatpush3.bf16.msra.mxu0 %v8560_v23 }
0x135b   :  { %v5253_v35 = vpop.f32.mrb[52].mxu0 }
0x135c   :  { %v2544_v17 = vpop.f32.mrb[53].mxu0 }
0x135d   :  { %5289 = vmatprep.mubr.f32.mxu0 %v2544_v17 }
0x135e   :  { %5290 = vmatmul.mubr.f32.vlgmr.msra.gmra.mrb[56].mxu0 %v5253_v35 }
0x135f   :  { %v5256_v44 = vpop.f32.mrb[54].mxu0 }
0x1360   :  { %v2554_v41 = vpop.f32.mrb[55].mxu0 }
0x1361   :  { %5292 = vmatprep.mubr.f32.mxu0 %v2554_v41 }
0x1362   :  { %5293 = vmatmul.mubr.f32.gmra.mrb[58].mxu0 %v5256_v44 }
0x1363   :  { %5361 = vmatprep.mubr.msk.f32.mxu0 %vm285_vm0, %v6287_v30 }
0x1431   :  { %v5291_v8 = vpop.f32.mrb[56].mxu0 }
0x1432   :  { %6250 = vrsqrt.f32 %v5291_v8  ;;  %v2629_v49 = vpop.f32.mrb[57].mxu0  ;;  %vm2657_vm9 = vcmp.eq.f32.partialorder %v5291_v8, inf  ;;  %v2660_v54 = vand.u32 2147483648, %v5291_v8  ;;  %vm2659_vm10 = vcmp.eq.f32.partialorder %v5291_v8, 0.0 }
0x1433   :  { %6252 = vrsqrt.f32 %v2629_v49  ;;  %vm2650_vm11 = vcmp.eq.f32.partialorder %v2629_v49, inf  ;;  %v2653_v23 = vand.u32 2147483648, %v2629_v49  ;;  %vm2652_vm12 = vcmp.eq.f32.partialorder %v2629_v49, 0.0 }
0x1435   :  { %v5294_v55 = vpop.f32.mrb[58].mxu0 }
0x1436   :  { %6254 = vrsqrt.f32 %v5294_v55  ;;  %v2639_v34 = vpop.f32.mrb[59].mxu0  ;;  %vm2671_vm13 = vcmp.eq.f32.partialorder %v5294_v55, inf  ;;  %vm2673_vm14 = vcmp.eq.f32.partialorder %v5294_v55, 0.0 }
0x1437   :  { %6256 = vrsqrt.f32 %v2639_v34  ;;  %vm2664_vm15 = vcmp.eq.f32.partialorder %v2639_v34, inf  ;;  %vm2666_vm1 = vcmp.eq.f32.partialorder %v2639_v34, 0.0 }
0x143c   :  { %v6251_v25 = vpop.eup %6250 }
0x143d   :  { %v6253_v53 = vpop.eup %6252  ;;  %v2656_v13 = vmul.f32 %v6251_v25, %v5291_v8  ;;  %v2674_v25 = vand.u32 2147483648, %v5294_v55 }
0x143e   :  { %v2649_v42 = vmul.f32 %v6253_v53, %v2629_v49  ;;  %v2667_v53 = vand.u32 2147483648, %v2639_v34 }
0x143f   :  { %v2658_v26 = vsel %vm2657_vm9, %v5291_v8, %v2656_v13 }
0x1440   :  { %v6255_v35 = vpop.eup %6254  ;;  %v2661_v30 = vsel %vm2659_vm10, %v2660_v54, %v2658_v26  ;;  %v2651_v17 = vsel %vm2650_vm11, %v2629_v49, %v2649_v42 }
0x1441   :  { %v6257_v44 = vpop.eup %6256  ;;  %v7853_v41 = vadd.f32 1e-06, %v2661_v30  ;;  %v2654_v32 = vsel %vm2652_vm12, %v2653_v23, %v2651_v17  ;;  %v2670_v50 = vmul.f32 %v6255_v35, %v5294_v55  ;;  %v4080_v17 = vld [vmem:[%s8405_s10 + $0x80] sm:$0xff] }
0x1442   :  { %v7855_v38 = vadd.f32 1e-06, %v2654_v32  ;;  %v2663_v43 = vmul.f32 %v6257_v44, %v2639_v34 }
0x1443   :  { %6258 = vrcp.f32 %v7853_v41  ;;  %v2672_v8 = vsel %vm2671_vm13, %v5294_v55, %v2670_v50 }
0x1444   :  { %6260 = vrcp.f32 %v7855_v38  ;;  %v2675_v13 = vsel %vm2673_vm14, %v2674_v25, %v2672_v8  ;;  %v2665_v49 = vsel %vm2664_vm15, %v2639_v34, %v2663_v43  ;;  %v4083_v8 = vld [vmem:[%s8405_s10 + $0x98] sm:$0xff] }
0x1445   :  { %v7859_v54 = vadd.f32 1e-06, %v2675_v13  ;;  %v2668_v42 = vsel %vm2666_vm1, %v2667_v53, %v2665_v49  ;;  %v4085_v13 = vld [vmem:[%s8405_s10 + $0xa8] sm:$0xff] }
0x1446   :  { %v7861_v26 = vadd.f32 1e-06, %v2668_v42  ;;  %v7902_v49 = vld [vmem:[%s8399_s4 + $0x88] sm:$0xff]  ;;  %v7909_v42 = vld [vmem:[%s8399_s4 + $0x90] sm:$0xff] }
0x1447   :  { %6262 = vrcp.f32 %v7859_v54 }
0x1448   :  { %6264 = vrcp.f32 %v7861_v26 }
0x144d   :  { %v6259_v32 = vpop.eup %6258 }
0x144e   :  { %v6261_v23 = vpop.eup %6260  ;;  %v7866_v50 = vmul.f32 %v6259_v32, %v7808_v22  ;;  %v4081_v22 = vld [vmem:[%s8405_s10 + $0x88] sm:$0xff] }
0x144f   :  { %v7869_v55 = vmul.f32 %v6261_v23, %v7813_v2  ;;  %v5999_v25 = vpack.c.bf16 %v4081_v22, %v4080_v17  ;;  %v4086_v23 = vld [vmem:[%s8405_s10 + $0xb0] sm:$0xff]  ;;  %v7936_v22 = vld [vmem:[%s8399_s4 + $0xa8] sm:$0xff] }
0x1451   :  { %v6263_v35 = vpop.eup %6262  ;;  %v5991_v43 = vpack.c.bf16 %v7866_v50, %v7869_v55 }
0x1452   :  { %v6265_v34 = vpop.eup %6264  ;;  %v7874_v30 = vmul.f32 %v6263_v35, %v7822_v14  ;;  %v4082_v14 = vld [vmem:[%s8405_s10 + $0x90] sm:$0xff]  ;;  %v4087_v35 = vld [vmem:[%s8405_s10 + $0xb8] sm:$0xff] }
0x1453   :  { %5992 = vmatprep.subr.bf16.mxu1 %v5991_v43  ;;  %v7883_v2 = vmul.f32 %v6265_v34, %v7827_v6  ;;  %v6003_v53 = vpack.c.bf16 %v4083_v8, %v4082_v14  ;;  %v4084_v6 = vld [vmem:[%s8405_s10 + $0xa0] sm:$0xff]  ;;  %v6011_v17 = vpack.c.bf16 %v4087_v35, %v4086_v23  ;;  %v4089_v8 = vld [vmem:[%s8405_s10 + $0xc8] sm:$0xff] }
0x1454   :  { %5994 = vmatpush3.bf16.msra.mxu1 %v5991_v43  ;;  %v6007_v32 = vpack.c.bf16 %v4085_v13, %v4084_v6  ;;  %v7922_v43 = vld [vmem:[%s8399_s4 + $0x98] sm:$0xff]  ;;  %v7929_v34 = vld [vmem:[%s8399_s4 + $0xa0] sm:$0xff]  ;;  %v4090_v6 = vld [vmem:[%s8405_s10 + $0xd0] sm:$0xff] }
0x1455   :  { %v5995_v44 = vpack.c.bf16 %v7874_v30, %v7883_v2  ;;  %v4088_v14 = vld [vmem:[%s8405_s10 + $0xc0] sm:$0xff]  ;;  %v4091_v13 = vld [vmem:[%s8405_s10 + $0xd8] sm:$0xff]  ;;  %v4093_v35 = vld [vmem:[%s8405_s10 + $0xe8] sm:$0xff] }
0x1456   :  { %v4092_v23 = vld [vmem:[%s8405_s10 + $0xe0] sm:$0xff] }
0x1457   :  { %5996 = vmatprep.subr.bf16.mxu1 %v5995_v44 }
0x1458   :  { %5998 = vmatpush3.bf16.msra.mxu1 %v5995_v44  ;;  %v7943_v44 = vld [vmem:[%s8399_s4 + $0xb0] sm:$0xff] }
0x1459   :  { %6000 = vmatprep.subr.bf16.mxu1 %v5999_v25 }
0x145b   :  { %5304 = vmatmul.mubr.msk.f32.vlgmr.msra.gmra.mrb[64].mxu1 %vm285_vm0, %v7902_v49 }
0x145c   :  { %5306 = vmatprep.mubr.msk.f32.mxu1 %vm285_vm0, %v7909_v42  ;;  %6002 = vmatpush3.bf16.msra.mxu1 %v5999_v25  ;;  %v7950_v25 = vld [vmem:[%s8399_s4 + $0xb8] sm:$0xff] }
0x145d   :  { %6004 = vmatprep.subr.bf16.mxu1 %v6003_v53 }
0x145f   :  { %5307 = vmatmul.mubr.msk.f32.gmra.mrb[66].mxu1 %vm285_vm0, %v7922_v43 }
0x1460   :  { %5309 = vmatprep.mubr.msk.f32.mxu1 %vm285_vm0, %v7929_v34  ;;  %6006 = vmatpush3.bf16.msra.mxu1 %v6003_v53  ;;  %v6015_v53 = vpack.c.bf16 %v4089_v8, %v4088_v14  ;;  %v4094_v14 = vld [vmem:[%s8405_s10 + $0xf0] sm:$0xff]  ;;  %v4095_v8 = vld [vmem:[%s8405_s10 + $0xf8] sm:$0xff] }
0x1461   :  { %6008 = vmatprep.subr.bf16.mxu1 %v6007_v32 }
0x1463   :  { %5310 = vmatmul.mubr.msk.f32.gmra.mrb[68].mxu1 %vm285_vm0, %v7936_v22 }
0x1464   :  { %5312 = vmatprep.mubr.msk.f32.mxu1 %vm285_vm0, %v7943_v44  ;;  %6010 = vmatpush3.bf16.msra.mxu1 %v6007_v32  ;;  %v6019_v32 = vpack.c.bf16 %v4091_v13, %v4090_v6 }
0x1465   :  { %6012 = vmatprep.subr.bf16.mxu1 %v6011_v17 }
0x1467   :  { %5313 = vmatmul.mubr.msk.f32.gmra.mrb[70].mxu1 %vm285_vm0, %v7950_v25 }
0x1468   :  { %6014 = vmatpush3.bf16.msra.mxu1 %v6011_v17  ;;  %v6023_v17 = vpack.c.bf16 %v4093_v35, %v4092_v23  ;;  %v6295_v23 = vld [vmem:[%s8398_s3 + $0x1] ss:$0 sm:$0xff] }
0x1469   :  { %6016 = vmatprep.subr.bf16.mxu1 %v6015_v53 }
0x146c   :  { %6018 = vmatpush3.bf16.msra.mxu1 %v6015_v53  ;;  %v6027_v53 = vpack.c.bf16 %v4095_v8, %v4094_v14 }
0x146d   :  { %6020 = vmatprep.subr.bf16.mxu1 %v6019_v32 }
0x1470   :  { %6022 = vmatpush3.bf16.msra.mxu1 %v6019_v32 }
0x1471   :  { %6024 = vmatprep.subr.bf16.mxu1 %v6023_v17 }
0x1474   :  { %6026 = vmatpush3.bf16.msra.mxu1 %v6023_v17  ;;  %v6296_v17 = vld [vmem:[%s8398_s3 + $0x2] ss:$0 sm:$0xff] }
0x1475   :  { %6028 = vmatprep.subr.bf16.mxu1 %v6027_v53  ;;  %v2798_v10 = vmul.f32 %v6296_v17, %v7866_v50  ;;  %v2797_v8 = vmul.f32 %v6296_v17, %v7869_v55  ;;  %v2800_v18 = vmul.f32 %v6296_v17, %v7874_v30  ;;  %v2799_v50 = vmul.f32 %v6296_v17, %v7883_v2  ;;  %v4147_v30 = vld [vmem:[%s8406_s11 + $0x2c8] sm:$0xff] }
0x1476   :  { %v4151_v17 = vld [vmem:[%s8406_s11 + $0x2e8] sm:$0xff] }
0x1478   :  { %6030 = vmatpush3.bf16.msra.mxu1 %v6027_v53  ;;  %v6297_v53 = vld [vmem:[%s8398_s3 + $0x3] ss:$0 sm:$0xff] }
0x152e   :  { %v5305_v6 = vpop.f32.mrb[64].mxu1 }
0x152f   :  { %v2754_v13 = vpop.f32.mrb[65].mxu1  ;;  %v2806_v15 = vmul.f32 %v6297_v53, %v5305_v6 }
0x1530   :  { %v2805_v33 = vmul.f32 %v6297_v53, %v2754_v13  ;;  %v4148_v13 = vld [vmem:[%s8406_s11 + $0x2d0] sm:$0xff] }
0x1532   :  { %v5308_v32 = vpop.f32.mrb[66].mxu1 }
0x1533   :  { %v2764_v59 = vpop.f32.mrb[67].mxu1  ;;  %v2808_v5 = vmul.f32 %v6297_v53, %v5308_v32  ;;  %v4149_v32 = vld [vmem:[%s8406_s11 + $0x2d8] sm:$0xff] }
0x1534   :  { %v2807_v4 = vmul.f32 %v6297_v53, %v2764_v59  ;;  %v4146_v59 = vld [vmem:[%s8406_s11 + $0x2c0] sm:$0xff]  ;;  %v4153_v53 = vld [vmem:[%s8406_s11 + $0x2f8] sm:$0xff] }
0x1535   :  { %v6087_v2 = vpack.c.bf16 %v4147_v30, %v4146_v59  ;;  %v4106_v30 = vld [vmem:[%s8406_s11 + $0x180] sm:$0xff] }
0x1536   :  { %v5311_v19 = vpop.f32.mrb[68].mxu1 }
0x1537   :  { %v2794_v35 = vmul.f32 %v6295_v23, %v5311_v19  ;;  %v2774_v52 = vpop.f32.mrb[69].mxu1 }
0x1538   :  { %v2793_v14 = vmul.f32 %v6295_v23, %v2774_v52 }
0x1539   :  { %v2802_v57 = vadd.f32 %v2798_v10, %v2794_v35  ;;  %v4150_v35 = vld [vmem:[%s8406_s11 + $0x2e0] sm:$0xff] }
0x153a   :  { %v2801_v29 = vadd.f32 %v2797_v8, %v2793_v14  ;;  %v5314_v27 = vpop.f32.mrb[70].mxu1  ;;  %v6095_v14 = vpack.c.bf16 %v4151_v17, %v4150_v35  ;;  %v4152_v8 = vld [vmem:[%s8406_s11 + $0x2f0] sm:$0xff] }
0x153b   :  { %v2810_v19 = vadd.f32 %v2806_v15, %v2802_v57  ;;  %v2796_v20 = vmul.f32 %v6295_v23, %v5314_v27  ;;  %v2784_v12 = vpop.f32.mrb[71].mxu1  ;;  %v4138_v27 = vld [vmem:[%s8406_s11 + $0x280] sm:$0xff]  ;;  %v4145_v57 = vld [vmem:[%s8406_s11 + $0x2b8] sm:$0xff]  ;;  %v4108_v17 = vld [vmem:[%s8406_s11 + $0x190] sm:$0xff] }
0x153c   :  { %v2795_v11 = vmul.f32 %v6295_v23, %v2784_v12  ;;  %v2809_v52 = vadd.f32 %v2805_v33, %v2801_v29  ;;  %v4139_v12 = vld [vmem:[%s8406_s11 + $0x288] sm:$0xff]  ;;  %v4144_v33 = vld [vmem:[%s8406_s11 + $0x2b0] sm:$0xff]  ;;  %v6091_v23 = vpack.c.bf16 %v4149_v32, %v4148_v13  ;;  %v4125_v32 = vld [vmem:[%s8406_s11 + $0x218] sm:$0xff] }
0x153d   :  { %v2804_v55 = vadd.f32 %v2800_v18, %v2796_v20  ;;  %v4140_v18 = vld [vmem:[%s8406_s11 + $0x290] sm:$0xff]  ;;  %v6071_v20 = vpack.c.bf16 %v4139_v12, %v4138_v27  ;;  %v6083_v15 = vpack.c.bf16 %v4145_v57, %v4144_v33  ;;  %v4123_v33 = vld [vmem:[%s8406_s11 + $0x208] sm:$0xff] }
0x153e   :  { %v2803_v61 = vadd.f32 %v2799_v50, %v2795_v11  ;;  %5347 = vmatprep.mubr.f32.mxu1 %v2809_v52  ;;  %v4143_v11 = vld [vmem:[%s8406_s11 + $0x2a8] sm:$0xff]  ;;  %v4097_v50 = vld [vmem:[%s8407_s12 + $0x1] ss:$0 sm:$0xff]  ;;  %v4124_v13 = vld [vmem:[%s8406_s11 + $0x210] sm:$0xff] }
0x153f   :  { %5348 = vmatmul.mubr.f32.vlgmr.msra.gmra.mrb[72].mxu1 %v2810_v19  ;;  %v2812_v6 = vadd.f32 %v2808_v5, %v2804_v55  ;;  %v4141_v5 = vld [vmem:[%s8406_s11 + $0x298] sm:$0xff]  ;;  %6072 = vmatprep.subr.bf16.mxu1 %v6071_v20  ;;  %v6099_v19 = vpack.c.bf16 %v4153_v53, %v4152_v8  ;;  %v6043_v35 = vpack.c.bf16 %v4125_v32, %v4124_v13  ;;  %v4126_v8 = vld [vmem:[%s8406_s11 + $0x220] sm:$0xff]  ;;  %v4127_v53 = vld [vmem:[%s8406_s11 + $0x228] sm:$0xff] }
0x1540   :  { %v2811_v10 = vadd.f32 %v2807_v4, %v2803_v61  ;;  %v6075_v61 = vpack.c.bf16 %v4141_v5, %v4140_v18  ;;  %v4142_v4 = vld [vmem:[%s8406_s11 + $0x2a0] sm:$0xff]  ;;  %6074 = vmatpush3.bf16.msra.mxu1 %v6071_v20  ;;  %v4116_v13 = vld [vmem:[%s8406_s11 + $0x1d0] sm:$0xff]  ;;  %v4117_v32 = vld [vmem:[%s8406_s11 + $0x1d8] sm:$0xff] }
0x1541   :  { %v6079_v29 = vpack.c.bf16 %v4143_v11, %v4142_v4 }
0x1542   :  { %5350 = vmatprep.mubr.f32.mxu1 %v2811_v10  ;;  %6076 = vmatprep.subr.bf16.mxu1 %v6075_v61 }
0x1543   :  { %5351 = vmatmul.mubr.f32.gmra.mrb[74].mxu1 %v2812_v6 }
0x1544   :  { %6078 = vmatpush3.bf16.msra.mxu1 %v6075_v61 }
0x1545   :  { %6080 = vmatprep.subr.bf16.mxu1 %v6079_v29 }
0x1548   :  { %6082 = vmatpush3.bf16.msra.mxu1 %v6079_v29  ;;  %v4122_v29 = vld [vmem:[%s8406_s11 + $0x200] sm:$0xff] }
0x1549   :  { %6084 = vmatprep.subr.bf16.mxu1 %v6083_v15  ;;  %v6039_v59 = vpack.c.bf16 %v4123_v33, %v4122_v29  ;;  %v4130_v29 = vld [vmem:[%s8406_s11 + $0x240] sm:$0xff] }
0x154c   :  { %6086 = vmatpush3.bf16.msra.mxu1 %v6083_v15 }
0x154d   :  { %6088 = vmatprep.subr.bf16.mxu1 %v6087_v2 }
0x1550   :  { %6090 = vmatpush3.bf16.msra.mxu1 %v6087_v2  ;;  %v4107_v2 = vld [vmem:[%s8406_s11 + $0x188] sm:$0xff] }
0x1551   :  { %6092 = vmatprep.subr.bf16.mxu1 %v6091_v23 }
0x1554   :  { %6094 = vmatpush3.bf16.msra.mxu1 %v6091_v23  ;;  %v6041_v23 = vpack.c.bf16 %v4107_v2, %v4106_v30  ;;  %v4132_v30 = vld [vmem:[%s8406_s11 + $0x250] sm:$0xff] }
0x1555   :  { %6096 = vmatprep.subr.bf16.mxu1 %v6095_v14 }
0x1558   :  { %6098 = vmatpush3.bf16.msra.mxu1 %v6095_v14  ;;  %v4109_v14 = vld [vmem:[%s8406_s11 + $0x198] sm:$0xff] }
0x1559   :  { %6100 = vmatprep.subr.bf16.mxu1 %v6099_v19 }
0x155c   :  { %6102 = vmatpush3.bf16.msra.mxu1 %v6099_v19  ;;  %v6045_v19 = vpack.c.bf16 %v4109_v14, %v4108_v17  ;;  %v4118_v17 = vld [vmem:[%s8406_s11 + $0x1e0] sm:$0xff]  ;;  %v4119_v14 = vld [vmem:[%s8406_s11 + $0x1e8] sm:$0xff] }
0x1612   :  { %v5349_v52 = vpop.f32.mrb[72].mxu1 }
0x1613   :  { %v8042_v55 = vadd.f32 %v5349_v52, %v4097_v50  ;;  %v2904_v6 = vpop.f32.mrb[73].mxu1  ;;  %v4110_v52 = vld [vmem:[%s8406_s11 + $0x1a0] sm:$0xff] }
0x1614   :  { %v2905_v10 = vadd.f32 %v4097_v50, %v2904_v6  ;;  %v4111_v6 = vld [vmem:[%s8406_s11 + $0x1a8] sm:$0xff] }
0x1615   :  { %v2924_v27 = vmax.f32 %v8042_v55, 0.0  ;;  %v8561_v55 = vmov 0.0  }
0x1616   :  { %v2923_v12 = vmax.f32 %v2905_v10, 0.0  ;;  %v5352_v18 = vpop.f32.mrb[74].mxu1  ;;  %v4128_v10 = vld [vmem:[%s8406_s11 + $0x230] sm:$0xff] }
0x1617   :  { %v8045_v20 = vadd.f32 %v5352_v18, %v4097_v50  ;;  %v2914_v5 = vpop.f32.mrb[75].mxu1 }
0x1618   :  { %v6031_v61 = vpack.c.bf16 %v2924_v27, %v2923_v12  ;;  %v8049_v4 = vadd.f32 %v4097_v50, %v2914_v5  ;;  %v6047_v50 = vpack.c.bf16 %v4127_v53, %v4126_v8  ;;  %v4112_v5 = vld [vmem:[%s8406_s11 + $0x1b0] sm:$0xff]  ;;  %v6065_v8 = vpack.c.bf16 %v4119_v14, %v4118_v17 }
0x1619   :  { %v2926_v11 = vmax.f32 %v8045_v20, 0.0  ;;  %v4136_v53 = vld [vmem:[%s8406_s11 + $0x270] sm:$0xff] }
0x161a   :  { %v2925_v57 = vmax.f32 %v8049_v4, 0.0  ;;  %6032 = vmatprep.subr.bf16.mxu0 %v6031_v61  ;;  %v4155_v4 = vld [vmem:[%s8408_s13 + $0x1] ss:$0 sm:$0xff] }
0x161b   :  { %6034 = vmatpush3.bf16.msra.mxu0 %v6031_v61  ;;  %v4113_v61 = vld [vmem:[%s8406_s11 + $0x1b8] sm:$0xff] }
0x161c   :  { %v6035_v15 = vpack.c.bf16 %v2926_v11, %v2925_v57 }
0x161e   :  { %6036 = vmatprep.subr.bf16.mxu0 %v6035_v15 }
0x161f   :  { %6038 = vmatpush3.bf16.msra.mxu0 %v6035_v15  ;;  %v4114_v15 = vld [vmem:[%s8406_s11 + $0x1c0] sm:$0xff] }
0x1620   :  { %6040 = vmatprep.subr.bf16.mxu0 %v6039_v59  ;;  %v4115_v59 = vld [vmem:[%s8406_s11 + $0x1c8] sm:$0xff] }
0x1622   :  { %5362 = vmatmul.mubr.msk.f32.vlgmr.msra.gmra.mrb[60].mxu0 %vm285_vm0, %v7902_v49  ;;  %v4129_v49 = vld [vmem:[%s8406_s11 + $0x238] sm:$0xff] }
0x1623   :  { %5364 = vmatprep.mubr.msk.f32.mxu0 %vm285_vm0, %v7909_v42  ;;  %6042 = vmatpush3.bf16.msra.mxu0 %v6041_v23  ;;  %v6049_v42 = vpack.c.bf16 %v4111_v6, %v4110_v52  ;;  %v6051_v18 = vpack.c.bf16 %v4129_v49, %v4128_v10  ;;  %v6061_v23 = vpack.c.bf16 %v4117_v32, %v4116_v13  ;;  %v4120_v52 = vld [vmem:[%s8406_s11 + $0x1f0] sm:$0xff]  ;;  %v4121_v6 = vld [vmem:[%s8406_s11 + $0x1f8] sm:$0xff] }
0x1624   :  { %6044 = vmatprep.subr.bf16.mxu0 %v6043_v35  ;;  %v6069_v10 = vpack.c.bf16 %v4121_v6, %v4120_v52 }
0x1626   :  { %5365 = vmatmul.mubr.msk.f32.gmra.mrb[62].mxu0 %vm285_vm0, %v7922_v43  ;;  %v4131_v43 = vld [vmem:[%s8406_s11 + $0x248] sm:$0xff] }
0x1627   :  { %5367 = vmatprep.mubr.msk.f32.mxu0 %vm285_vm0, %v7929_v34  ;;  %6046 = vmatpush3.bf16.msra.mxu0 %v6045_v19  ;;  %v6053_v34 = vpack.c.bf16 %v4113_v61, %v4112_v5  ;;  %v6055_v33 = vpack.c.bf16 %v4131_v43, %v4130_v29  ;;  %v4137_v19 = vld [vmem:[%s8406_s11 + $0x278] sm:$0xff]  ;;  %v6298_v29 = vld [vmem:[%s8399_s4] sm:$0xff] }
0x1628   :  { %6048 = vmatprep.subr.bf16.mxu0 %v6047_v50  ;;  %v6067_v50 = vpack.c.bf16 %v4137_v19, %v4136_v53 }
0x162a   :  { %5368 = vmatmul.mubr.msk.f32.gmra.mrb[64].mxu0 %vm285_vm0, %v7936_v22  ;;  %v4133_v22 = vld [vmem:[%s8406_s11 + $0x258] sm:$0xff] }
0x162b   :  { %5370 = vmatprep.mubr.msk.f32.mxu0 %vm285_vm0, %v7943_v44  ;;  %6050 = vmatpush3.bf16.msra.mxu0 %v6049_v42  ;;  %v6057_v44 = vpack.c.bf16 %v4115_v59, %v4114_v15  ;;  %v6059_v2 = vpack.c.bf16 %v4133_v22, %v4132_v30 }
0x162c   :  { %6052 = vmatprep.subr.bf16.mxu0 %v6051_v18 }
0x162e   :  { %5371 = vmatmul.mubr.msk.f32.gmra.mrb[66].mxu0 %vm285_vm0, %v7950_v25  ;;  %v4134_v25 = vld [vmem:[%s8406_s11 + $0x260] sm:$0xff] }
0x162f   :  { %3153 = vmatprep.mubr.f32.mxu0 %v2923_v12  ;;  %6054 = vmatpush3.bf16.msra.mxu0 %v6053_v34  ;;  %v4135_v12 = vld [vmem:[%s8406_s11 + $0x268] sm:$0xff] }
0x1630   :  { %6056 = vmatprep.subr.bf16.mxu0 %v6055_v33  ;;  %v6063_v35 = vpack.c.bf16 %v4135_v12, %v4134_v25 }
0x1633   :  { %6058 = vmatpush3.bf16.msra.mxu0 %v6057_v44 }
0x1634   :  { %6060 = vmatprep.subr.bf16.mxu0 %v6059_v2 }
0x1637   :  { %6062 = vmatpush3.bf16.msra.mxu0 %v6061_v23 }
0x1638   :  { %6064 = vmatprep.subr.bf16.mxu0 %v6063_v35 }
0x163b   :  { %6066 = vmatpush3.bf16.msra.mxu0 %v6065_v8 }
0x163c   :  { %6068 = vmatprep.subr.bf16.mxu0 %v6067_v50 }
0x163f   :  { %6070 = vmatpush3.bf16.msra.mxu0 %v6069_v10 }
0x1640   :  { %6104 = vmatprep.subr.bf16.mxu0 %v7494_v36 }
0x16f5   :  { %v5363_v49 = vpop.f32.mrb[60].mxu0 }
0x16f6   :  { %v2993_v42 = vpop.f32.mrb[61].mxu0 }
0x16f7   :  { %5405 = vmatprep.mubr.f32.mxu1 %v2993_v42 }
0x16f8   :  { %5406 = vmatmul.mubr.f32.vlgmr.msra.gmra.mrb[76].mxu1 %v5363_v49 }
0x16f9   :  { %v5366_v18 = vpop.f32.mrb[62].mxu0 }
0x16fa   :  { %v3003_v5 = vpop.f32.mrb[63].mxu0 }
0x16fb   :  { %5408 = vmatprep.mubr.f32.mxu1 %v3003_v5 }
0x16fc   :  { %5409 = vmatmul.mubr.f32.gmra.mrb[78].mxu1 %v5366_v18 }
0x16fd   :  { %v5369_v61 = vpop.f32.mrb[64].mxu0  ;;  %5419 = vmatprep.mubr.msk.f32.mxu1 %vm285_vm0, %v6298_v29 }
0x16fe   :  { %v3013_v43 = vpop.f32.mrb[65].mxu0 }
0x16ff   :  { %3154 = vmatmul.mubr.f32.vlgmr.msra.gmra.mrb[68].mxu0 %v3013_v43 }
0x1700   :  { %3158 = vmatprep.mubr.f32.mxu0 %v2924_v27  ;;  %6106 = vmatpush1.bf16.msra.mxu0 %v7502_v31 }
0x1701   :  { %v5372_v36 = vpop.f32.mrb[66].mxu0  ;;  %6108 = vmatprep.subr.bf16.mxu0 %v7512_v40 }
0x1702   :  { %v3023_v34 = vpop.f32.mrb[67].mxu0 }
0x1703   :  { %3159 = vmatmul.mubr.f32.gmra.mrb[70].mxu0 %v5369_v61  ;;  %v8233_v61 = vld [vmem:[#allocation6 + $0x10] sm:$0xff] }
0x1704   :  { %3163 = vmatprep.mubr.f32.mxu0 %v2925_v57  ;;  %6110 = vmatpush1.bf16.msra.mxu0 %v7520_v48 }
0x1705   :  { %6120 = vmatprep.subr.bf16.mxu0 %v7613_v1 }
0x1707   :  { %3164 = vmatmul.mubr.f32.gmra.mrb[72].mxu0 %v3023_v34 }
0x1708   :  { %3168 = vmatprep.mubr.f32.mxu0 %v2926_v11 }
0x170b   :  { %3169 = vmatmul.mubr.f32.gmra.mrb[74].mxu0 %v5372_v36 }
0x170c   :  { %3343 = vmatprep.mubr.f32.mxu0 %v8561_v55 }
0x17cb   :  { %v5407_v31 = vpop.f32.mrb[76].mxu1 }
0x17cc   :  { %v3240_v27 = vpop.f32.mrb[77].mxu1 }
0x17cf   :  { %v5410_v33 = vpop.f32.mrb[78].mxu1 }
0x17d0   :  { %v3250_v40 = vpop.f32.mrb[79].mxu1 }
0x17d2   :  { %v4657_v15 = vpop.f32.mrb[68].mxu0 }
0x17d3   :  { %v4658_v57 = vpop.f32.mrb[69].mxu0 }
0x17d4   :  { %v4659_v48 = vadd.f32 %v4658_v57, %v4657_v15 }
0x17d6   :  { %v3156_v59 = vadd.f32 %v4659_v48, %v4155_v4  ;;  %v4660_v30 = vpop.f32.mrb[70].mxu0  ;;  %v6304_v48 = vld [vmem:[%s8399_s4 + $0x8] sm:$0xff] }
0x17d7   :  { %v4661_v22 = vpop.f32.mrb[71].mxu0 }
0x17d8   :  { %v3241_v44 = vadd.f32 %v3240_v27, %v3156_v59  ;;  %v4662_v20 = vadd.f32 %v4661_v22, %v4660_v30  ;;  %v6305_v59 = vld [vmem:[%s8399_s4 + $0x10] sm:$0xff]  ;;  %v6306_v30 = vld [vmem:[%s8399_s4 + $0x18] sm:$0xff]  ;;  %v6307_v22 = vld [vmem:[%s8399_s4 + $0x20] sm:$0xff] }
0x17da   :  { %v3259_v11 = vmul.f32 %v3241_v44, %v7855_v38  ;;  %v3161_v2 = vadd.f32 %v4662_v20, %v4155_v4  ;;  %v4663_v13 = vpop.f32.mrb[72].mxu0  ;;  %v6308_v44 = vld [vmem:[%s8399_s4 + $0x28] sm:$0xff]  ;;  %v6309_v20 = vld [vmem:[%s8399_s4 + $0x30] sm:$0xff] }
0x17db   :  { %v4664_v32 = vpop.f32.mrb[73].mxu0 }
0x17dc   :  { %v3263_v23 = vadd.f32 %v3259_v11, %v7810_v0  ;;  %v3246_v25 = vadd.f32 %v5407_v31, %v3161_v2  ;;  %v4665_v12 = vadd.f32 %v4664_v32, %v4663_v13  ;;  %v6310_v11 = vld [vmem:[%s8399_s4 + $0x38] sm:$0xff]  ;;  %v6311_v2 = vld [vmem:[%s8399_s4 + $0x40] sm:$0xff] }
0x17de   :  { %v3260_v35 = vmul.f32 %v3246_v25, %v7853_v41  ;;  %v3166_v17 = vadd.f32 %v4665_v12, %v4155_v4  ;;  %v4666_v14 = vpop.f32.mrb[74].mxu0  ;;  %4156 = vmatmul.mubr.msk.f32.vlgmr.msra.gmra.mrb[76].mxu0 %vm285_vm0, %v3263_v23 }
0x17df   :  { %v4667_v8 = vpop.f32.mrb[75].mxu0  ;;  %3349 = vmatprep.mubr.f32.mxu0 %v8561_v55  ;;  %6122 = vmatpush3.bf16.msra.mxu0 %v7613_v1 }
0x17e0   :  { %v3251_v53 = vadd.f32 %v3250_v40, %v3166_v17  ;;  %v4668_v38 = vadd.f32 %v4667_v8, %v4666_v14  ;;  %v3264_v19 = vadd.f32 %v7805_v37, %v3260_v35  ;;  %6124 = vmatprep.subr.bf16.mxu0 %v7618_v45 }
0x17e2   :  { %v3261_v0 = vmul.f32 %v3251_v53, %v7861_v26  ;;  %v3171_v50 = vadd.f32 %v4668_v38, %v4155_v4  ;;  %4157 = vmatmul.mubr.msk.f32.gmra.mrb[78].mxu0 %vm285_vm0, %v3264_v19  ;;  %v8228_v26 = vld [vmem:[#allocation6 + $0x8] sm:$0xff] }
0x17e3   :  { %3355 = vmatprep.mubr.f32.mxu0 %v8561_v55  ;;  %6126 = vmatpush3.bf16.msra.mxu0 %v7618_v45 }
0x17e4   :  { %v3256_v41 = vadd.f32 %v5410_v33, %v3171_v50  ;;  %v3265_v52 = vadd.f32 %v3261_v0, %v7824_v3  ;;  %6128 = vmatprep.subr.bf16.mxu0 %v7629_v62  ;;  %v8238_v33 = vld [vmem:[#allocation6 + $0x18] sm:$0xff] }
0x17e6   :  { %v3262_v1 = vmul.f32 %v3256_v41, %v7859_v54  ;;  %4158 = vmatmul.mubr.msk.f32.gmra.mrb[80].mxu0 %vm285_vm0, %v3265_v52 }
0x17e7   :  { %3361 = vmatprep.mubr.f32.mxu0 %v8561_v55  ;;  %6130 = vmatpush3.bf16.msra.mxu0 %v7629_v62 }
0x17e8   :  { %v3266_v37 = vadd.f32 %v7819_v47, %v3262_v1  ;;  %6132 = vmatprep.subr.bf16.mxu0 %v7639_v39  ;;  %v8218_v47 = vld [vmem:[#allocation6] sm:$0xff] }
0x17ea   :  { %4159 = vmatmul.mubr.msk.f32.gmra.mrb[82].mxu0 %vm285_vm0, %v3266_v37 }
0x17eb   :  { %6134 = vmatpush3.bf16.msra.mxu0 %v7639_v39 }
0x17ec   :  { %6136 = vmatprep.subr.bf16.mxu0 %v7649_v21 }
0x17ef   :  { %6138 = vmatpush3.bf16.msra.mxu0 %v7649_v21 }
0x17f0   :  { %6140 = vmatprep.subr.bf16.mxu0 %v7659_v24 }
0x17f3   :  { %6142 = vmatpush3.bf16.msra.mxu0 %v7659_v24  ;;  %v8224_v24 = vld [vmem:[%s8398_s3] ss:$0 sm:$0xff] }
0x17f4   :  { %6144 = vmatprep.subr.bf16.mxu0 %v7669_v7 }
0x17f7   :  { %6146 = vmatpush3.bf16.msra.mxu0 %v7669_v7 }
0x17f8   :  { %6148 = vmatprep.subr.bf16.mxu0 %v7680_v28 }
0x17fb   :  { %6150 = vmatpush3.bf16.msra.mxu0 %v7680_v28 }
0x17fc   :  { %6192 = vmatprep.subr.bf16.mxu0 %v6783_v46 }
0x18b1   :  { %v3345_v45 = vpop.f32.mrb[76].mxu0 }
0x18b2   :  { %v3347_v62 = vpop.f32.mrb[77].mxu0  ;;  %v3368_v21 = vmul.f32 %v8218_v47, %v3345_v45 }
0x18b3   :  { %v3372_v39 = vmul.f32 %v3347_v62, %v6947_v58 }
0x18b5   :  { %v3376_v7 = vmul.f32 %v8224_v24, %v3372_v39  ;;  %v3351_v3 = vpop.f32.mrb[78].mxu0  ;;  %v8562_v39 = vld [vmem:[#allocation29_spill] sm:$0xff] }
0x18b6   :  { %v3353_v54 = vpop.f32.mrb[79].mxu0  ;;  %v3369_v6 = vmul.f32 %v8228_v26, %v3351_v3  ;;  %v8565_v3 = vld [vmem:[#allocation32_spill] sm:$0xff] }
0x18b7   :  { %v3380_v28 = vadd.f32 %v3376_v7, %v3368_v21  ;;  %v3373_v46 = vmul.f32 %v3353_v54, %v6949_v63  ;;  %v8563_v21 = vld [vmem:[#allocation30_spill] sm:$0xff]  ;;  %v8564_v7 = vld [vmem:[#allocation31_spill] sm:$0xff]  ;;  %v8566_v54 = vld [vmem:[#allocation33_spill] sm:$0xff] }
0x18b9   :  { %v3377_v10 = vmul.f32 %v8224_v24, %v3373_v46  ;;  %v3357_v49 = vpop.f32.mrb[80].mxu0  ;;  %v8569_v46 = vld [vmem:[#allocation36_spill] sm:$0xff] }
0x18ba   :  { %v3359_v42 = vpop.f32.mrb[81].mxu0  ;;  %v3370_v29 = vmul.f32 %v8233_v61, %v3357_v49  ;;  %v6312_v49 = vld [vmem:[#allocation2 + $0x8] sm:$0xff] }
0x18bb   :  { %v3381_v18 = vadd.f32 %v3377_v10, %v3369_v6  ;;  %v3374_v5 = vmul.f32 %v3359_v42, %v6954_v9  ;;  %v8571_v6 = vld [vmem:[#allocation38_spill] sm:$0xff]  ;;  %v8573_v10 = vld [vmem:[#allocation40_spill] sm:$0xff]  ;;  %v8574_v42 = vld [vmem:[#allocation41_spill] sm:$0xff] }
0x18bd   :  { %v3378_v43 = vmul.f32 %v8224_v24, %v3374_v5  ;;  %v3363_v36 = vpop.f32.mrb[82].mxu0  ;;  %v6111_v34 = vpack.c.bf16 %v3381_v18, %v3380_v28  ;;  %v8567_v28 = vld [vmem:[#allocation34_spill] sm:$0xff]  ;;  %v3591_v18 = vsub.f32 %v8574_v42, %v6312_v49  ;;  %v6313_v5 = vld [vmem:[#allocation2] sm:$0xff] }
0x18be   :  { %v3365_v55 = vpop.f32.mrb[83].mxu0  ;;  %v3371_v40 = vmul.f32 %v8238_v33, %v3363_v36  ;;  %v6314_v36 = vld [vmem:[#allocation2 + $0x18] sm:$0xff] }
0x18bf   :  { %v3382_v31 = vadd.f32 %v3378_v43, %v3370_v29  ;;  %v3375_v27 = vmul.f32 %v3365_v55, %v6958_v16  ;;  %6112 = vmatprep.subr.bf16.mxu1 %v6111_v34  ;;  %v8575_v29 = vld [vmem:[#allocation57_spill] sm:$0xff] }
0x18c0   :  { %6114 = vmatpush3.bf16.msra.mxu1 %v6111_v34  ;;  %v3590_v43 = vsub.f32 %v8575_v29, %v6313_v5  ;;  %v8576_v34 = vld [vmem:[#allocation58_spill] sm:$0xff] }
0x18c1   :  { %v3379_v15 = vmul.f32 %v8224_v24, %v3375_v27  ;;  %v3593_v55 = vsub.f32 %v8576_v34, %v6314_v36 }
0x18c3   :  { %v3383_v4 = vadd.f32 %v3379_v15, %v3371_v40  ;;  %v6316_v40 = vld [vmem:[#allocation2 + $0x10] sm:$0xff] }
0x18c4   :  { %v8577_v15 = vld [vmem:[#allocation59_spill] sm:$0xff] }
0x18c5   :  { %v6115_v57 = vpack.c.bf16 %v3383_v4, %v3382_v31  ;;  %v6315_v31 = vld [vmem:[#allocation8 + $0x8] sm:$0xff]  ;;  %v3592_v4 = vsub.f32 %v8577_v15, %v6316_v40 }
0x18c6   :  { %v3595_v27 = vmul.f32 %v6315_v31, %v3591_v18 }
0x18c7   :  { %6116 = vmatprep.subr.bf16.mxu1 %v6115_v57 }
0x18c8   :  { %6118 = vmatpush3.bf16.msra.mxu1 %v6115_v57  ;;  %v3599_v57 = vstv %s4168_s8 }
0x18cb   :  { %5420 = vmatmul.mubr.msk.f32.vlgmr.msra.gmra.mrb[80].mxu1 %vm285_vm0, %v6304_v48  ;;  %v6317_v48 = vld [vmem:[#allocation8] sm:$0xff] }
0x18cc   :  { %5422 = vmatprep.mubr.msk.f32.mxu1 %vm285_vm0, %v6305_v59  ;;  %v3594_v59 = vmul.f32 %v6317_v48, %v3590_v43 }
0x18cf   :  { %5423 = vmatmul.mubr.msk.f32.gmra.mrb[82].mxu1 %vm285_vm0, %v6306_v30  ;;  %v3601_v30 = vmul.f32 %v3599_v57, %v3595_v27 }
0x18d0   :  { %5425 = vmatprep.mubr.msk.f32.mxu1 %vm285_vm0, %v6307_v22  ;;  %v6318_v22 = vld [vmem:[#allocation8 + $0x18] sm:$0xff] }
0x18d3   :  { %5426 = vmatmul.mubr.msk.f32.gmra.mrb[84].mxu1 %vm285_vm0, %v6308_v44  ;;  %v3597_v44 = vmul.f32 %v6318_v22, %v3593_v55 }
0x18d4   :  { %5428 = vmatprep.mubr.msk.f32.mxu1 %vm285_vm0, %v6309_v20  ;;  %v3600_v20 = vmul.f32 %v3599_v57, %v3594_v59 }
0x18d7   :  { %5429 = vmatmul.mubr.msk.f32.gmra.mrb[86].mxu1 %vm285_vm0, %v6310_v11  ;;  %v6319_v11 = vld [vmem:[#allocation8 + $0x10] sm:$0xff] }
0x18d8   :  { %5477 = vmatprep.mubr.msk.f32.mxu1 %vm285_vm0, %v6311_v2  ;;  %v3596_v2 = vmul.f32 %v6319_v11, %v3592_v4 }
0x199e   :  { %v5421_v13 = vpop.f32.mrb[80].mxu1 }
0x199f   :  { %v3450_v32 = vpop.f32.mrb[81].mxu1 }
0x19a2   :  { %v5424_v23 = vpop.f32.mrb[82].mxu1 }
0x19a3   :  { %v3460_v25 = vpop.f32.mrb[83].mxu1 }
0x19a6   :  { %v5427_v12 = vpop.f32.mrb[84].mxu1 }
0x19a7   :  { %3491 = vrot.lane.b32.xlu1 %v5427_v12, %s6490_s21  ;;  %v3470_v35 = vpop.f32.mrb[85].mxu1  ;;  %v3602_v12 = vmul.f32 %v3599_v57, %v3596_v2 }
0x19a8   :  { %3489 = vrot.lane.b32.xlu0 %v3470_v35, %s6490_s21 }
0x19aa   :  { %v5430_v17 = vpop.f32.mrb[86].mxu1 }
0x19ab   :  { %3495 = vrot.lane.b32.xlu1 %v5430_v17, %s6490_s21  ;;  %v3480_v14 = vpop.f32.mrb[87].mxu1 }
0x19ac   :  { %3493 = vrot.lane.b32.xlu0 %v3480_v14, %s6490_s21 }
0x1a19   :  { %v3492_v8 = vpop.permute.xlu1 %3491 }
0x1a1a   :  { %v3498_v53 = vmul.f32 %v8224_v24, %v3492_v8  ;;  %v3490_v38 = vpop.permute.xlu0 %3489 }
0x1a1b   :  { %v3497_v19 = vmul.f32 %v8224_v24, %v3490_v38 }
0x1a1c   :  { %v3502_v41 = vadd.f32 %v5421_v13, %v3498_v53  ;;  %v3605_v13 = vsub.f32 %v8574_v42, %v3601_v30 }
0x1a1d   :  { %v3501_v0 = vadd.f32 %v3497_v19, %v3450_v32  ;;  %v3496_v50 = vpop.permute.xlu1 %3495  ;;  %v3603_v32 = vmul.f32 %v3599_v57, %v3597_v44  ;;  %v3606_v19 = vsub.f32 %v8577_v15, %v3602_v12 }
0x1a1e   :  { %v3500_v52 = vmul.f32 %v8224_v24, %v3496_v50  ;;  %v3494_v1 = vpop.permute.xlu0 %3493 }
0x1a1f   :  { %v3499_v37 = vmul.f32 %v8224_v24, %v3494_v1  ;;  %5463 = vmatprep.mubr.f32.mxu0 %v3501_v0  ;;  %v3607_v8 = vsub.f32 %v8576_v34, %v3603_v32  ;;  %v8578_v1 = vld [vmem:[#allocation21_spill] sm:$0xff] }
0x1a20   :  { %5464 = vmatmul.mubr.f32.vlgmr.msra.gmra.mrb[84].mxu0 %v3502_v41  ;;  %v3504_v62 = vadd.f32 %v5424_v23, %v3500_v52 }
0x1a21   :  { %v3503_v45 = vadd.f32 %v3499_v37, %v3460_v25  ;;  %6194 = vmatpush3.bf16.msra.mxu0 %v6794_v51  ;;  %v8568_v51 = vld [vmem:[#allocation35_spill] sm:$0xff]  ;;  %v3604_v25 = vsub.f32 %v8575_v29, %v3600_v20  ;;  %v6320_v37 = vld [vmem:[%s8399_s4 + $0x48] sm:$0xff] }
0x1a22   :  { %6196 = vmatprep.subr.bf16.mxu0 %v6806_v56  ;;  %v8570_v56 = vld [vmem:[#allocation37_spill] sm:$0xff] }
0x1a23   :  { %5466 = vmatprep.mubr.f32.mxu0 %v3503_v45  ;;  %v6321_v45 = vld [vmem:[%s8399_s4 + $0x50] sm:$0xff] }
0x1a24   :  { %5467 = vmatmul.mubr.f32.gmra.mrb[86].mxu0 %v3504_v62  ;;  %v8579_v62 = vld [vmem:[#allocation22_spill] sm:$0xff] }
0x1a25   :  { %6198 = vmatpush3.bf16.msra.mxu0 %v6819_v60  ;;  %v8572_v60 = vld [vmem:[#allocation39_spill] sm:$0xff] }
0x1a26   :  { %6200 = vmatprep.subr.bf16.mxu0 %v8562_v39  ;;  %v6322_v39 = vld [vmem:[%s8399_s4 + $0x58] sm:$0xff] }
0x1a29   :  { %6202 = vmatpush3.bf16.msra.mxu0 %v8563_v21  ;;  %v6323_v21 = vld [vmem:[%s8399_s4 + $0x60] sm:$0xff] }
0x1a2a   :  { %6204 = vmatprep.subr.bf16.mxu0 %v8564_v7  ;;  %v8580_v7 = vld [vmem:[#allocation23_spill] sm:$0xff] }
0x1a2d   :  { %6206 = vmatpush3.bf16.msra.mxu0 %v8565_v3  ;;  %v6324_v3 = vld [vmem:[%s8399_s4 + $0x68] sm:$0xff] }
0x1a2e   :  { %6208 = vmatprep.subr.bf16.mxu0 %v8566_v54  ;;  %v6325_v54 = vld [vmem:[%s8399_s4 + $0x70] sm:$0xff] }
0x1a31   :  { %6210 = vmatpush3.bf16.msra.mxu0 %v8567_v28  ;;  %v8581_v28 = vld [vmem:[#allocation24_spill] sm:$0xff] }
0x1a32   :  { %6212 = vmatprep.subr.bf16.mxu0 %v8568_v51  ;;  %v6326_v51 = vld [vmem:[%s8399_s4 + $0x78] sm:$0xff]  ;;  %s6492_s4 = smov [#allocation12]  }
0x1a35   :  { %6214 = vmatpush3.bf16.msra.mxu0 %v8569_v46  ;;  %v8582_v46 = vld [vmem:[#allocation25_spill] sm:$0xff] }
0x1a36   :  { %6216 = vmatprep.subr.bf16.mxu0 %v8570_v56  ;;  %v8583_v56 = vld [vmem:[#allocation26_spill] sm:$0xff] }
0x1a39   :  { %6218 = vmatpush3.bf16.msra.mxu0 %v8571_v6  ;;  %v8584_v6 = vld [vmem:[#allocation27_spill] sm:$0xff] }
0x1a3a   :  { %6220 = vmatprep.subr.bf16.mxu0 %v8572_v60  ;;  %v8585_v60 = vld [vmem:[#allocation28_spill] sm:$0xff] }
0x1a3d   :  { %6222 = vmatpush3.bf16.msra.mxu0 %v8573_v10 }
0x1af3   :  { %v5465_v23 = vpop.f32.mrb[84].mxu0 }
0x1af4   :  { %v3609_v35 = vsub.f32 %v3605_v13, %v5465_v23  ;;  %v3571_v17 = vpop.f32.mrb[85].mxu0 }
0x1af5   :  { %v3608_v14 = vsub.f32 %v3604_v25, %v3571_v17 }
0x1af6   :  { %3613 = vst [vmem:[#allocation12 + $0x8] sm:$0xff] %v3609_v35 }
0x1af7   :  { %3612 = vst [vmem:[#allocation12] sm:$0xff] %v3608_v14  ;;  %v6151_v53 = vpack.c.bf16 %v3609_v35, %v3608_v14  ;;  %v5468_v38 = vpop.f32.mrb[86].mxu0 }
0x1af8   :  { %v3611_v0 = vsub.f32 %v3607_v8, %v5468_v38  ;;  %v3581_v50 = vpop.f32.mrb[87].mxu0 }
0x1af9   :  { %v3610_v41 = vsub.f32 %v3606_v19, %v3581_v50  ;;  %6152 = vmatprep.subr.bf16.mxu1 %v6151_v53 }
0x1afa   :  { %3615 = vst [vmem:[#allocation12 + $0x18] sm:$0xff] %v3611_v0  ;;  %6154 = vmatpush3.bf16.msra.mxu1 %v6151_v53 }
0x1afb   :  { %3614 = vst [vmem:[#allocation12 + $0x10] sm:$0xff] %v3610_v41  ;;  %v6155_v52 = vpack.c.bf16 %v3611_v0, %v3610_v41 }
0x1afd   :  { %6156 = vmatprep.subr.bf16.mxu1 %v6155_v52 }
0x1afe   :  { %6158 = vmatpush3.bf16.msra.mxu1 %v6155_v52 }
0x1aff   :  { %6160 = vmatprep.subr.bf16.mxu1 %v8578_v1 }
0x1b01   :  { %5478 = vmatmul.mubr.msk.f32.vlgmr.msra.gmra.mrb[88].mxu1 %vm285_vm0, %v6320_v37 }
0x1b02   :  { %5480 = vmatprep.mubr.msk.f32.mxu1 %vm285_vm0, %v6321_v45  ;;  %6162 = vmatpush3.bf16.msra.mxu1 %v8578_v1 }
0x1b03   :  { %6164 = vmatprep.subr.bf16.mxu1 %v8579_v62 }
0x1b05   :  { %5481 = vmatmul.mubr.msk.f32.gmra.mrb[90].mxu1 %vm285_vm0, %v6322_v39 }
0x1b06   :  { %5483 = vmatprep.mubr.msk.f32.mxu1 %vm285_vm0, %v6323_v21  ;;  %6166 = vmatpush3.bf16.msra.mxu1 %v8579_v62 }
0x1b07   :  { %6168 = vmatprep.subr.bf16.mxu1 %v8580_v7 }
0x1b09   :  { %5484 = vmatmul.mubr.msk.f32.gmra.mrb[92].mxu1 %vm285_vm0, %v6324_v3 }
0x1b0a   :  { %5486 = vmatprep.mubr.msk.f32.mxu1 %vm285_vm0, %v6325_v54  ;;  %6170 = vmatpush3.bf16.msra.mxu1 %v8580_v7 }
0x1b0b   :  { %6172 = vmatprep.subr.bf16.mxu1 %v8581_v28 }
0x1b0d   :  { %5487 = vmatmul.mubr.msk.f32.gmra.mrb[94].mxu1 %vm285_vm0, %v6326_v51 }
0x1b0e   :  { %6174 = vmatpush3.bf16.msra.mxu1 %v8581_v28 }
0x1b0f   :  { %6176 = vmatprep.subr.bf16.mxu1 %v8582_v46 }
0x1b12   :  { %6178 = vmatpush3.bf16.msra.mxu1 %v8582_v46 }
0x1b13   :  { %6180 = vmatprep.subr.bf16.mxu1 %v8583_v56 }
0x1b16   :  { %6182 = vmatpush3.bf16.msra.mxu1 %v8583_v56 }
0x1b17   :  { %6184 = vmatprep.subr.bf16.mxu1 %v8584_v6 }
0x1b1a   :  { %6186 = vmatpush3.bf16.msra.mxu1 %v8584_v6 }
0x1b1b   :  { %6188 = vmatprep.subr.bf16.mxu1 %v8585_v60 }
0x1b1e   :  { %6190 = vmatpush3.bf16.msra.mxu1 %v8585_v60 }
0x1bd4   :  { %v5479_v10 = vpop.f32.mrb[88].mxu1 }
0x1bd5   :  { %v3682_v49 = vpop.f32.mrb[89].mxu1 }
0x1bd8   :  { %v5482_v42 = vpop.f32.mrb[90].mxu1 }
0x1bd9   :  { %v3692_v18 = vpop.f32.mrb[91].mxu1 }
0x1bdc   :  { %v5485_v5 = vpop.f32.mrb[92].mxu1 }
0x1bdd   :  { %3723 = vrot.lane.b32.xlu1 %v5485_v5, %s6490_s21  ;;  %v3702_v29 = vpop.f32.mrb[93].mxu1 }
0x1bde   :  { %3721 = vrot.lane.b32.xlu0 %v3702_v29, %s6490_s21 }
0x1be0   :  { %v5488_v43 = vpop.f32.mrb[94].mxu1 }
0x1be1   :  { %3727 = vrot.lane.b32.xlu1 %v5488_v43, %s6490_s21  ;;  %v3712_v36 = vpop.f32.mrb[95].mxu1 }
0x1be2   :  { %3725 = vrot.lane.b32.xlu0 %v3712_v36, %s6490_s21  ;;  %s3924_s21 = sshll.u32 %s6492_s4, 4  ;;  %s3925_s21 = int_to_ptr.vmem [resolvable:$true] %s3924_s21 }
0x1be3   :  { %s6427_s29 = scalar_lea.vmem %s3925_s21, 512  ;;  %p6432_p10 = scmp.lt.s32.totalorder %s3925_s21, %s3925_s21 }
0x1be4   :  { %p6428_p9 = scmp.ne.s32.totalorder %s3925_s21, %s6427_s29  ;;  %p6433_p11 = scmp.lt.s32.totalorder %s6427_s29, %s6427_s29 }
0x1be6   :  { %p6434_p12 = por %p6433_p11, %p6432_p10 }
0x1be8   :  { %p6435_p13 = pnand %p6434_p12, %p6428_p9 }
0x1c4f   :  { %v3724_v34 = vpop.permute.xlu1 %3723 }
0x1c50   :  { %v3730_v55 = vmul.f32 %v8224_v24, %v3724_v34  ;;  %v3722_v31 = vpop.permute.xlu0 %3721 }
0x1c51   :  { %v3729_v27 = vmul.f32 %v8224_v24, %v3722_v31 }
0x1c52   :  { %v3734_v4 = vadd.f32 %v5479_v10, %v3730_v55 }
0x1c53   :  { %v3733_v40 = vadd.f32 %v3729_v27, %v3682_v49  ;;  %v3728_v15 = vpop.permute.xlu1 %3727 }
0x1c54   :  { %v3732_v57 = vmul.f32 %v8224_v24, %v3728_v15  ;;  %v3726_v48 = vpop.permute.xlu0 %3725 }
0x1c55   :  { %v3731_v59 = vmul.f32 %v8224_v24, %v3726_v48  ;;  %5521 = vmatprep.mubr.f32.mxu1 %v3733_v40 }
0x1c56   :  { %5522 = vmatmul.mubr.f32.vlgmr.msra.gmra.mrb[96].mxu1 %v3734_v4  ;;  %v3736_v22 = vadd.f32 %v5482_v42, %v3732_v57 }
0x1c57   :  { %v3735_v30 = vadd.f32 %v3731_v59, %v3692_v18 }
0x1c59   :  { %5524 = vmatprep.mubr.f32.mxu1 %v3735_v30 }
0x1c5a   :  { %5525 = vmatmul.mubr.f32.gmra.mrb[98].mxu1 %v3736_v22 }
0x1d29   :  { %v5523_v44 = vpop.f32.mrb[96].mxu1 }
0x1d2a   :  { %v3803_v20 = vpop.f32.mrb[97].mxu1  ;;  %v3827_v13 = vmul.f32 %v5523_v44, %v6949_v63  ;;  %v3823_v24 = vmul.f32 %v8228_v26, %v5523_v44 }
0x1d2b   :  { %v3822_v11 = vmul.f32 %v8218_v47, %v3803_v20  ;;  %v3826_v2 = vmul.f32 %v3803_v20, %v6947_v58 }
0x1d2d   :  { %v5526_v32 = vpop.f32.mrb[98].mxu1  ;;  %3894 = vmatprep.mubr.f32.mxu0 %v3826_v2 }
0x1d2e   :  { %v3813_v23 = vpop.f32.mrb[99].mxu1  ;;  %3895 = vmatmul.mubr.f32.vlgmr.msra.gmra.mrb[88].mxu0 %v3822_v11  ;;  %v3829_v35 = vmul.f32 %v5526_v32, %v6958_v16  ;;  %v3825_v58 = vmul.f32 %v8238_v33, %v5526_v32 }
0x1d2f   :  { %3899 = vmatprep.mubr.f32.mxu0 %v3827_v13  ;;  %v3828_v25 = vmul.f32 %v3813_v23, %v6954_v9  ;;  %v3824_v12 = vmul.f32 %v8233_v61, %v3813_v23 }
0x1d32   :  { %3900 = vmatmul.mubr.f32.gmra.mrb[90].mxu0 %v3823_v24 }
0x1d33   :  { %3904 = vmatprep.mubr.f32.mxu0 %v3828_v25 }
0x1d36   :  { %3905 = vmatmul.mubr.f32.gmra.mrb[92].mxu0 %v3824_v12 }
0x1d37   :  { %3909 = vmatprep.mubr.f32.mxu0 %v3829_v35 }
0x1d3a   :  { %3910 = vmatmul.mubr.f32.gmra.mrb[94].mxu0 %v3825_v58 }
0x1d3b   :  { %6438 = shalt.err (!%p6435_p13)
}
0x1d3c   :  { %s6439_s30 = scalar_lea.hbm %s8410_s15, 512 }
0x1d3d   :  { %p6440_p0 = scmp.ne.s32.totalorder %s8410_s15, %s6439_s30  ;;  %p6443_p1 = scmp.lt.u32.totalorder %s6439_s30, %s8410_s15 }
0x1d3f   :  { %p6445_p2 = pnand %p6443_p1, %p6440_p0 }
0x1d41   :  { %6448 = shalt.err (!%p6445_p2)
}
0x1d42   :  { %3930 = dma.vmem_to_hbm [thread:$0]  %s3925_s21, 512, %s8410_s15, [#allocation4], %s6485_s18, %s6485_s18, %s6486_s19  }
0x1d43   :  { %s6493_s1 = smov [#allocation13]  }
0x1d44   :  { %s3936_s8 = sshll.u32 %s6493_s1, 4  ;;  %s3937_s8 = int_to_ptr.vmem [resolvable:$true] %s3936_s8 }
0x1d45   :  { %s6449_s15 = scalar_lea.vmem %s3937_s8, 512  ;;  %p6454_p4 = scmp.lt.s32.totalorder %s3937_s8, %s3937_s8 }
0x1d46   :  { %p6450_p3 = scmp.ne.s32.totalorder %s3937_s8, %s6449_s15  ;;  %p6455_p5 = scmp.lt.s32.totalorder %s6449_s15, %s6449_s15 }
0x1d48   :  { %p6456_p6 = por %p6455_p5, %p6454_p4 }
0x1d4a   :  { %p6457_p7 = pnand %p6456_p6, %p6450_p3 }
0x1e01   :  { %v4785_v63 = vpop.f32.mrb[88].mxu0 }
0x1e02   :  { %v4786_v9 = vpop.f32.mrb[89].mxu0 }
0x1e03   :  { %v4787_v16 = vadd.f32 %v4786_v9, %v4785_v63 }
0x1e05   :  { %3915 = vst [vmem:[#allocation13] sm:$0xff] %v4787_v16  ;;  %v4788_v47 = vpop.f32.mrb[90].mxu0 }
0x1e06   :  { %v4789_v26 = vpop.f32.mrb[91].mxu0 }
0x1e07   :  { %v4790_v61 = vadd.f32 %v4789_v26, %v4788_v47 }
0x1e09   :  { %3916 = vst [vmem:[#allocation13 + $0x8] sm:$0xff] %v4790_v61  ;;  %v4791_v33 = vpop.f32.mrb[92].mxu0 }
0x1e0a   :  { %v4792_v17 = vpop.f32.mrb[93].mxu0 }
0x1e0b   :  { %v4793_v14 = vadd.f32 %v4792_v17, %v4791_v33 }
0x1e0d   :  { %3917 = vst [vmem:[#allocation13 + $0x10] sm:$0xff] %v4793_v14  ;;  %v4794_v8 = vpop.f32.mrb[94].mxu0 }
0x1e0e   :  { %v4795_v53 = vpop.f32.mrb[95].mxu0 }
0x1e0f   :  { %v4796_v38 = vadd.f32 %v4795_v53, %v4794_v8 }
0x1e11   :  { %3918 = vst [vmem:[#allocation13 + $0x18] sm:$0xff] %v4796_v38 }
0x1e12   :  { %6460 = shalt.err (!%p6457_p7)
}
0x1e13   :  { %s8586_s9 = sld [smem:[#allocation61_spill]] }
0x1e19   :  { %s6461_s25 = scalar_lea.hbm %s8586_s9, 512 }
0x1e1a   :  { %p6462_p8 = scmp.ne.s32.totalorder %s8586_s9, %s6461_s25  ;;  %p6465_p9 = scmp.lt.u32.totalorder %s6461_s25, %s8586_s9 }
0x1e1c   :  { %p6467_p10 = pnand %p6465_p9, %p6462_p8 }
0x1e1e   :  { %6470 = shalt.err (!%p6467_p10)
}
0x1e1f   :  { %3942 = dma.vmem_to_hbm [thread:$0]  %s3937_s8, 512, %s8586_s9, [#allocation14], %s6485_s18, %s6485_s18, %s6486_s19  }
0x1e20   :  { %6479 = dma.done.wait [#allocation4], 512  }
0x1e21   :  { %6480 = vsyncadd [#allocation4], 4294966784 }
0x1e22   :  { %6481 = dma.done.wait [#allocation14], 512  }
0x1e23   :  { %6482 = vsyncadd [#allocation14], 4294966784 }
0x1e24   :  { %3949 = vsyncpa [#allocation3], 1 }
0x1e25   :  { %3950 = vsyncpa [#allocation7], 1 }
0x1e26   :  { %3951 = vsyncpa [#allocation10], 1 }
0x1e27   :  { %3952 = vsyncpa [#allocation4], 1 }
0x1e28   :  { %3953 = vsyncpa [#allocation14], 1 }
0x1e29   :  { %3954 = vsyncpa [#allocation5], 1 }

</bundles_post_ra>
